<compile_context>
chip_gen: v6e
topology: v6e:2x2x1
jax: 0.10.0
libtpu: 0.0.40
codegen_flags: <defaults>
</compile_context>

<pallas_src>
import math
import functools

import numpy as np
import jax
import jax.numpy as jnp
from jax import lax
from jax.experimental import pallas as pl
from jax.experimental.pallas import tpu as pltpu


# ----------------------------------------------------------------------------
# Rotary embedding precompute (host-side, mirrors RotaryEmbedding)
# ----------------------------------------------------------------------------
def rotary_cos_sin(seq_len_actual, head_dim, *, training=True,
                   training_seqlen=8192, base=10000.0):
    seq_len = seq_len_actual
    mscale = 1.0
    if not training:
        seq_len = max(seq_len, training_seqlen)
        scale = seq_len / training_seqlen
        mscale = 1.0 if scale <= 1 else 0.1 * math.log(scale) + 1.0
    context_value = math.log(seq_len / 4096, 2) + 1
    ntk_alpha = max(2 ** math.ceil(context_value) - 1, 1)
    base = base * ntk_alpha ** (head_dim / (head_dim - 2))
    inv_freq = 1.0 / base ** (np.arange(0, head_dim, 2, dtype=np.float32) / head_dim)
    t = np.arange(seq_len, dtype=np.float32)
    freqs = np.outer(t, inv_freq)                       # [seq_len, head_dim/2]
    emb = np.concatenate([freqs, freqs], axis=-1)       # [seq_len, head_dim]
    cos = (mscale * np.cos(emb)).astype(np.float32)
    sin = (mscale * np.sin(emb)).astype(np.float32)
    return jnp.asarray(cos[:seq_len_actual]), jnp.asarray(sin[:seq_len_actual])


# ----------------------------------------------------------------------------
# Kernel 1: QKV projection + rotary + masked softmax attention (per head)
# ----------------------------------------------------------------------------
def _attn_kernel(lens_ref, x_ref, wq_ref, wk_ref, wv_ref, cos_ref, sin_ref,
                 ctx_ref, k_scr, v_scr, *, tq, head_dim, inv_norm_factor):
    b = pl.program_id(0)
    qi = pl.program_id(2)
    seq_len = x_ref.shape[1]
    half = head_dim // 2
    neg_big = jnp.finfo(jnp.float32).min

    def rope(t, c, s_signed):
        # rotate_half(t) * sin == roll(t, hd/2) * sin_signed  (sign pre-folded)
        return t * c + pltpu.roll(t, shift=half, axis=1) * s_signed

    # Build K / V for this (batch, head) once; reuse across all q tiles.
    @pl.when(qi == 0)
    def _():
        xf = x_ref[0]                                                 # [S, H] bf16
        k = jnp.dot(xf, wk_ref[...], preferred_element_type=jnp.float32)
        k_scr[...] = rope(k, cos_ref[...], sin_ref[...]).astype(k_scr.dtype)
        v = jnp.dot(xf, wv_ref[...], preferred_element_type=jnp.float32)
        v_scr[...] = v.astype(v_scr.dtype)

    q_start = pl.multiple_of(qi * tq, tq)
    x_q = x_ref[0, pl.ds(q_start, tq), :]                             # [tq, H] bf16
    q = jnp.dot(x_q, wq_ref[...], preferred_element_type=jnp.float32)  # [tq, hd] f32
    q = rope(q, cos_ref[pl.ds(q_start, tq), :], sin_ref[pl.ds(q_start, tq), :])
    q = q * inv_norm_factor                                           # fold scale into q

    # scores = q @ k^T via dot_general (no materialized transpose)
    scores = lax.dot_general(
        q.astype(jnp.bfloat16), k_scr[...],
        dimension_numbers=(((1,), (1,)), ((), ())),
        preferred_element_type=jnp.float32)                           # [tq, S]

    # causal + per-batch valid-length mask, generated in-kernel
    row = q_start + lax.broadcasted_iota(jnp.int32, (tq, seq_len), 0)
    col = lax.broadcasted_iota(jnp.int32, (tq, seq_len), 1)
    limit = jnp.minimum(row + 1, lens_ref[b])                         # allowed: col < limit
    scores = jnp.where(col >= limit, neg_big, scores)

    # softmax (f32 statistics, EUP reciprocal for the normalization)
    m = jnp.max(scores, axis=1, keepdims=True)
    e = jnp.exp(scores - m)
    l = jnp.sum(e, axis=1, keepdims=True)
    p = e * pl.reciprocal(l, approx=True)

    ctx = jnp.dot(p.astype(jnp.bfloat16), v_scr[...],
                  preferred_element_type=jnp.float32)                 # [tq, hd]
    ctx_ref[0] = ctx.astype(ctx_ref.dtype)


# ----------------------------------------------------------------------------
# Kernel 2: dense projection + bias + residual add (dropout p=0.0 is a no-op)
# ----------------------------------------------------------------------------
def _dense_kernel(ctx_ref, res_ref, wd_ref, bd_ref, out_ref):
    out = jnp.dot(ctx_ref[0], wd_ref[...], preferred_element_type=jnp.float32)
    out_ref[0] = out + bd_ref[...] + res_ref[0]


# ----------------------------------------------------------------------------
# Wrapper
# ----------------------------------------------------------------------------
def telechat_attention(x, residual, valid_lens, wq, wkv, wd, bd, cos, sin,
                       *, num_heads, q_tile=128):
    B, S, H = x.shape
    hd = H // num_heads
    half = hd // 2
    assert hd % 128 == 0, "head_dim must be lane-aligned (multiple of 128)"
    assert S % q_tile == 0 and q_tile % 8 == 0
    qt = S // q_tile
    inv_norm_factor = 1.0 / math.sqrt(hd)

    # bf16 MXU operands; accumulation stays f32 inside the kernels.
    x_bf = x.astype(jnp.bfloat16)
    wq_bf = wq.astype(jnp.bfloat16)
    wkv_r = wkv.reshape(H, num_heads, 2, hd)
    wk_bf = wkv_r[:, :, 0, :].reshape(H, H).astype(jnp.bfloat16)   # K columns per head
    wv_bf = wkv_r[:, :, 1, :].reshape(H, H).astype(jnp.bfloat16)   # V columns per head
    wd_bf = wd.astype(jnp.bfloat16)

    # fold the rotate_half sign into the sin table
    sin_signed = jnp.concatenate([-sin[:, :half], sin[:, half:]], axis=1)

    kernel1 = functools.partial(_attn_kernel, tq=q_tile, head_dim=hd,
                                inv_norm_factor=inv_norm_factor)
    cost1 = pl.CostEstimate(
        flops=int(6 * B * S * H * H + 4 * B * S * S * H),
        transcendentals=int(B * num_heads * S * S),
        bytes_accessed=int(2 * B * S * H + 6 * B * H * H + 16 * S * hd
                           + 2 * B * S * H + 4 * B))

    ctx = pl.pallas_call(
        kernel1,
        out_shape=jax.ShapeDtypeStruct((B, S, H), jnp.bfloat16),
        grid_spec=pltpu.PrefetchScalarGridSpec(
            num_scalar_prefetch=1,
            grid=(B, num_heads, qt),
            in_specs=[
                pl.BlockSpec((1, S, H), lambda b, h, q, lens: (b, 0, 0)),   # x
                pl.BlockSpec((H, hd), lambda b, h, q, lens: (0, h)),        # W_q head cols
                pl.BlockSpec((H, hd), lambda b, h, q, lens: (0, h)),        # W_k head cols
                pl.BlockSpec((H, hd), lambda b, h, q, lens: (0, h)),        # W_v head cols
                pl.BlockSpec((S, hd), lambda b, h, q, lens: (0, 0)),        # cos
                pl.BlockSpec((S, hd), lambda b, h, q, lens: (0, 0)),        # sin (signed)
            ],
            out_specs=pl.BlockSpec((1, q_tile, hd), lambda b, h, q, lens: (b, q, h)),
            scratch_shapes=[pltpu.VMEM((S, hd), jnp.bfloat16),   # K cache (rotary applied)
                            pltpu.VMEM((S, hd), jnp.bfloat16)],  # V cache
        ),
        compiler_params=pltpu.CompilerParams(
            dimension_semantics=("parallel", "parallel", "arbitrary"),
            vmem_limit_bytes=48 * 1024 * 1024),
        cost_estimate=cost1,
    )(valid_lens, x_bf, wq_bf, wk_bf, wv_bf, cos, sin_signed)

    cost2 = pl.CostEstimate(
        flops=int(2 * B * S * H * H),
        transcendentals=0,
        bytes_accessed=int(2 * B * S * H + 2 * B * H * H + 8 * B * S * H + 4 * H))

    out = pl.pallas_call(
        _dense_kernel,
        out_shape=jax.ShapeDtypeStruct((B, S, H), jnp.float32),
        grid=(B, qt),
        in_specs=[
            pl.BlockSpec((1, q_tile, H), lambda b, q: (b, q, 0)),   # ctx
            pl.BlockSpec((1, q_tile, H), lambda b, q: (b, q, 0)),   # residual
            pl.BlockSpec((H, H), lambda b, q: (0, 0)),              # W_dense
            pl.BlockSpec((1, H), lambda b, q: (0, 0)),              # b_dense
        ],
        out_specs=pl.BlockSpec((1, q_tile, H), lambda b, q: (b, q, 0)),
        compiler_params=pltpu.CompilerParams(
            dimension_semantics=("parallel", "parallel"),
            vmem_limit_bytes=48 * 1024 * 1024),
        cost_estimate=cost2,
    )(ctx, residual, wd_bf, bd)
    return out


# ----------------------------------------------------------------------------
# Pure-JAX reference (mirrors the torch forward, f32 math)
# ----------------------------------------------------------------------------
def reference(x, residual, valid_lens, wq, wkv, wd, bd, cos, sin, num_heads):
    B, S, H = x.shape
    hd = H // num_heads
    q = (x @ wq).reshape(B, S, num_heads, hd)
    kv = (x @ wkv).reshape(B, S, num_heads, 2 * hd)
    k, v = kv[..., :hd], kv[..., hd:]

    def rot_half(t):
        return jnp.concatenate([-t[..., hd // 2:], t[..., :hd // 2]], axis=-1)

    c = cos[None, :, None, :]
    s = sin[None, :, None, :]
    q = q * c + rot_half(q) * s
    k = k * c + rot_half(k) * s
    sc = jnp.einsum('bqhd,bkhd->bhqk', q, k) / math.sqrt(hd)

    qpos = jnp.arange(S)[:, None]
    kpos = jnp.arange(S)[None, :]
    causal = (kpos > qpos)[None, :, :]                               # [1, S, S]
    pad = kpos[None, :, :] >= valid_lens[:, None, None]              # [B, 1, S]
    mask = causal | pad                                              # [B, S, S]
    sc = jnp.where(mask[:, None, :, :], jnp.finfo(jnp.float32).min, sc)
    p = jax.nn.softmax(sc, axis=-1)
    ctx = jnp.einsum('bhqk,bkhd->bqhd', p, v).reshape(B, S, H)
    return ctx @ wd + bd + residual


# ----------------------------------------------------------------------------
if __name__ == "__main__":
    # small shapes consistent with the module (head_dim=128 like real Telechat)
    B, NH, HD, S = 2, 2, 128, 256
    H = NH * HD

    key = jax.random.PRNGKey(0)
    k_x, k_r, k_q, k_kv, k_d, k_b = jax.random.split(key, 6)

    x = jax.random.normal(k_x, (B, S, H), dtype=jnp.float32)
    residual = jax.random.normal(k_r, (B, S, H), dtype=jnp.float32)

    # deterministic parameter init (std = initializer_range = 0.02)
    wq = 0.02 * jax.random.normal(k_q, (H, H), dtype=jnp.float32)
    wkv = 0.02 * jax.random.normal(k_kv, (H, 2 * H), dtype=jnp.float32)
    wd = 0.02 * jax.random.normal(k_d, (H, H), dtype=jnp.float32)
    bd = 0.02 * jax.random.normal(k_b, (1, H), dtype=jnp.float32)

    # causal mask + right-padding expressed as per-batch valid key length
    valid_lens = jnp.array([S, S - 32], dtype=jnp.int32)

    # rotary tables (module default training=True)
    cos, sin = rotary_cos_sin(S, HD, training=True, training_seqlen=8192)

    out = telechat_attention(x, residual, valid_lens, wq, wkv, wd, bd, cos, sin,
                             num_heads=NH, q_tile=128)
    out = jax.block_until_ready(out)

    ref = reference(x, residual, valid_lens, wq, wkv, wd, bd, cos, sin, NH)
    np.testing.assert_allclose(np.asarray(out), np.asarray(ref),
                               rtol=2e-2, atol=2e-2)
    print("KERNEL_OK")
</pallas_src>

<mosaic_0001>
module attributes {stable_mosaic.version = 11 : i64} {
  func.func @_attn_kernel(%arg0: i32, %arg1: i32, %arg2: i32, %arg3: memref<2xi32, #tpu.memory_space<smem>>, %arg4: memref<1x256x256xbf16, #tpu.memory_space<vmem>>, %arg5: memref<256x128xbf16, #tpu.memory_space<vmem>>, %arg6: memref<256x128xbf16, #tpu.memory_space<vmem>>, %arg7: memref<256x128xbf16, #tpu.memory_space<vmem>>, %arg8: memref<256x128xf32, #tpu.memory_space<vmem>>, %arg9: memref<256x128xf32, #tpu.memory_space<vmem>>, %arg10: memref<1x128x128xbf16, #tpu.memory_space<vmem>>, %arg11: memref<256x128xbf16, #tpu.memory_space<vmem>>, %arg12: memref<256x128xbf16, #tpu.memory_space<vmem>>) attributes {dimension_semantics = [#tpu.dimension_semantics<parallel>, #tpu.dimension_semantics<parallel>, #tpu.dimension_semantics<arbitrary>], iteration_bounds = array<i64: 2, 2, 2>, scalar_prefetch = 1 : i64, scratch_operands = 2 : i64, tpu.core_type = #tpu.core_type<tc>, window_params = [{transform_indices = @transform_0, window_bounds = array<i64: 1, 256, 256>}, {transform_indices = @transform_1, window_bounds = array<i64: 256, 128>}, {transform_indices = @transform_2, window_bounds = array<i64: 256, 128>}, {transform_indices = @transform_3, window_bounds = array<i64: 256, 128>}, {pipeline_mode = #tpu.pipeline_mode<synchronous>, transform_indices = @transform_4, window_bounds = array<i64: 256, 128>}, {pipeline_mode = #tpu.pipeline_mode<synchronous>, transform_indices = @transform_5, window_bounds = array<i64: 256, 128>}, {transform_indices = @transform_6, window_bounds = array<i64: 1, 128, 128>}]} {
    %c0_i32 = arith.constant 0 : i32
    %0 = arith.cmpi eq, %arg2, %c0_i32 : i32
    %1 = arith.extui %0 : i1 to i32
    %c0_i32_0 = arith.constant 0 : i32
    %2 = arith.cmpi ne, %1, %c0_i32_0 : i32
    scf.if %2 {
      %c0_19 = arith.constant 0 : index
      %c0_20 = arith.constant 0 : index
      %c0_21 = arith.constant 0 : index
      %53 = vector.load %arg4[%c0_19, %c0_20, %c0_21] : memref<1x256x256xbf16, #tpu.memory_space<vmem>>, vector<1x256x256xbf16>
      %54 = vector.shape_cast %53 : vector<1x256x256xbf16> to vector<256x256xbf16>
      %c0_22 = arith.constant 0 : index
      %c0_23 = arith.constant 0 : index
      %55 = vector.load %arg6[%c0_22, %c0_23] : memref<256x128xbf16, #tpu.memory_space<vmem>>, vector<256x128xbf16>
      %cst_24 = arith.constant dense<0.000000e+00> : vector<256x128xf32>
      %56 = tpu.matmul %54, %55, %cst_24 {dimension_numbers = #tpu.dot_dimension_numbers<[1], [0], [0], [1], [0, 0, 1, 1], [], []>} : vector<256x256xbf16>, vector<256x128xbf16>, vector<256x128xf32> -> vector<256x128xf32>
      %c0_25 = arith.constant 0 : index
      %c0_26 = arith.constant 0 : index
      %57 = vector.load %arg8[%c0_25, %c0_26] : memref<256x128xf32, #tpu.memory_space<vmem>>, vector<256x128xf32>
      %c0_27 = arith.constant 0 : index
      %c0_28 = arith.constant 0 : index
      %58 = vector.load %arg9[%c0_27, %c0_28] : memref<256x128xf32, #tpu.memory_space<vmem>>, vector<256x128xf32>
      %59 = arith.mulf %56, %57 : vector<256x128xf32>
      %c64_i32_29 = arith.constant 64 : i32
      %60 = tpu.dynamic_rotate %56 by %c64_i32_29 dim 1 : vector<256x128xf32>, i32 -> vector<256x128xf32>
      %61 = arith.mulf %60, %58 : vector<256x128xf32>
      %62 = arith.addf %59, %61 : vector<256x128xf32>
      %63 = arith.truncf %62 : vector<256x128xf32> to vector<256x128xbf16>
      %c0_30 = arith.constant 0 : index
      %c0_31 = arith.constant 0 : index
      %64 = vector.load %arg11[%c0_30, %c0_31] : memref<256x128xbf16, #tpu.memory_space<vmem>>, vector<256x128xbf16>
      tpu.vector_store %arg11[%c0_30, %c0_31], %63 {strides = array<i32>} : memref<256x128xbf16, #tpu.memory_space<vmem>>, vector<256x128xbf16>,
      %c0_32 = arith.constant 0 : index
      %c0_33 = arith.constant 0 : index
      %65 = vector.load %arg7[%c0_32, %c0_33] : memref<256x128xbf16, #tpu.memory_space<vmem>>, vector<256x128xbf16>
      %cst_34 = arith.constant dense<0.000000e+00> : vector<256x128xf32>
      %66 = tpu.matmul %54, %65, %cst_34 {dimension_numbers = #tpu.dot_dimension_numbers<[1], [0], [0], [1], [0, 0, 1, 1], [], []>} : vector<256x256xbf16>, vector<256x128xbf16>, vector<256x128xf32> -> vector<256x128xf32>
      %67 = arith.truncf %66 : vector<256x128xf32> to vector<256x128xbf16>
      %c0_35 = arith.constant 0 : index
      %c0_36 = arith.constant 0 : index
      %68 = vector.load %arg12[%c0_35, %c0_36] : memref<256x128xbf16, #tpu.memory_space<vmem>>, vector<256x128xbf16>
      tpu.vector_store %arg12[%c0_35, %c0_36], %67 {strides = array<i32>} : memref<256x128xbf16, #tpu.memory_space<vmem>>, vector<256x128xbf16>,
    } else {
    }
    %c128_i32 = arith.constant 128 : i32
    %3 = arith.muli %arg2, %c128_i32 : i32
    %4 = tpu.assume_multiple %3, 128 : i32
    %c0 = arith.constant 0 : index
    %5 = arith.index_cast %4 : i32 to index
    %c0_1 = arith.constant 0 : index
    %6 = vector.load %arg4[%c0, %5, %c0_1] : memref<1x256x256xbf16, #tpu.memory_space<vmem>>, vector<1x128x256xbf16>
    %7 = vector.shape_cast %6 : vector<1x128x256xbf16> to vector<128x256xbf16>
    %c0_2 = arith.constant 0 : index
    %c0_3 = arith.constant 0 : index
    %8 = vector.load %arg5[%c0_2, %c0_3] : memref<256x128xbf16, #tpu.memory_space<vmem>>, vector<256x128xbf16>
    %cst = arith.constant dense<0.000000e+00> : vector<128x128xf32>
    %9 = tpu.matmul %7, %8, %cst {dimension_numbers = #tpu.dot_dimension_numbers<[1], [0], [0], [1], [0, 0, 1, 1], [], []>} : vector<128x256xbf16>, vector<256x128xbf16>, vector<128x128xf32> -> vector<128x128xf32>
    %10 = arith.index_cast %4 : i32 to index
    %c0_4 = arith.constant 0 : index
    %11 = vector.load %arg8[%10, %c0_4] : memref<256x128xf32, #tpu.memory_space<vmem>>, vector<128x128xf32>
    %12 = arith.index_cast %4 : i32 to index
    %c0_5 = arith.constant 0 : index
    %13 = vector.load %arg9[%12, %c0_5] : memref<256x128xf32, #tpu.memory_space<vmem>>, vector<128x128xf32>
    %14 = arith.mulf %9, %11 : vector<128x128xf32>
    %c64_i32 = arith.constant 64 : i32
    %15 = tpu.dynamic_rotate %9 by %c64_i32 dim 1 : vector<128x128xf32>, i32 -> vector<128x128xf32>
    %16 = arith.mulf %15, %13 : vector<128x128xf32>
    %17 = arith.addf %14, %16 : vector<128x128xf32>
    %cst_6 = arith.constant 0.0883883461 : f32
    %18 = vector.broadcast %cst_6 : f32 to vector<128x128xf32>
    %19 = arith.mulf %17, %18 : vector<128x128xf32>
    %20 = arith.truncf %19 : vector<128x128xf32> to vector<128x128xbf16>
    %c0_7 = arith.constant 0 : index
    %c0_8 = arith.constant 0 : index
    %21 = vector.load %arg11[%c0_7, %c0_8] : memref<256x128xbf16, #tpu.memory_space<vmem>>, vector<256x128xbf16>
    %cst_9 = arith.constant dense<0.000000e+00> : vector<128x256xf32>
    %22 = tpu.matmul %20, %21, %cst_9 {dimension_numbers = #tpu.dot_dimension_numbers<[1], [1], [0], [0], [0, 0, 1, 0], [], []>} : vector<128x128xbf16>, vector<256x128xbf16>, vector<128x256xf32> -> vector<128x256xf32>
    %23 = tpu.iota {dimensions = array<i32: 0>} : vector<128x256xi32>
    %24 = vector.broadcast %4 : i32 to vector<128x256xi32>
    %25 = arith.addi %24, %23 : vector<128x256xi32>
    %26 = tpu.iota {dimensions = array<i32: 1>} : vector<128x256xi32>
    %c1_i32 = arith.constant 1 : i32
    %27 = vector.broadcast %c1_i32 : i32 to vector<128x256xi32>
    %28 = arith.addi %25, %27 : vector<128x256xi32>
    %29 = arith.index_cast %arg0 : i32 to index
    %30 = memref.load %arg3[%29] : memref<2xi32, #tpu.memory_space<smem>>
    %31 = vector.broadcast %30 : i32 to vector<128x256xi32>
    %32 = arith.minsi %28, %31 : vector<128x256xi32>
    %33 = arith.cmpi sge, %26, %32 : vector<128x256xi32>
    %cst_10 = arith.constant -3.40282347E+38 : f32
    %34 = vector.broadcast %cst_10 : f32 to vector<128x256xf32>
    %35 = arith.select %33, %34, %22 : vector<128x256xi1>, vector<128x256xf32>
    %cst_11 = arith.constant dense<0xFF800000> : vector<128xf32>
    %36 = vector.multi_reduction <maximumf>, %35, %cst_11 [1] : vector<128x256xf32> to vector<128xf32>
    %37 = vector.shape_cast %36 : vector<128xf32> to vector<128x1xf32>
    %38 = vector.broadcast %37 : vector<128x1xf32> to vector<128x256xf32>
    %39 = arith.subf %35, %38 : vector<128x256xf32>
    %40 = math.exp %39 : vector<128x256xf32>
    %cst_12 = arith.constant dense<0.000000e+00> : vector<128xf32>
    %41 = vector.multi_reduction <add>, %40, %cst_12 [1] : vector<128x256xf32> to vector<128xf32>
    %42 = vector.shape_cast %41 : vector<128xf32> to vector<128x1xf32>
    %43 = tpu.reciprocal %42 {approx = true} : vector<128x1xf32> -> vector<128x1xf32>
    %44 = vector.broadcast %43 : vector<128x1xf32> to vector<128x256xf32>
    %45 = arith.mulf %40, %44 : vector<128x256xf32>
    %46 = arith.truncf %45 : vector<128x256xf32> to vector<128x256xbf16>
    %c0_13 = arith.constant 0 : index
    %c0_14 = arith.constant 0 : index
    %47 = vector.load %arg12[%c0_13, %c0_14] : memref<256x128xbf16, #tpu.memory_space<vmem>>, vector<256x128xbf16>
    %cst_15 = arith.constant dense<0.000000e+00> : vector<128x128xf32>
    %48 = tpu.matmul %46, %47, %cst_15 {dimension_numbers = #tpu.dot_dimension_numbers<[1], [0], [0], [1], [0, 0, 1, 1], [], []>} : vector<128x256xbf16>, vector<256x128xbf16>, vector<128x128xf32> -> vector<128x128xf32>
    %49 = arith.truncf %48 : vector<128x128xf32> to vector<128x128xbf16>
    %c0_16 = arith.constant 0 : index
    %c0_17 = arith.constant 0 : index
    %c0_18 = arith.constant 0 : index
    %50 = vector.load %arg10[%c0_16, %c0_17, %c0_18] : memref<1x128x128xbf16, #tpu.memory_space<vmem>>, vector<1x128x128xbf16>
    %51 = vector.shape_cast %50 : vector<1x128x128xbf16> to vector<128x128xbf16>
    %52 = vector.shape_cast %49 : vector<128x128xbf16> to vector<1x128x128xbf16>
    tpu.vector_store %arg10[%c0_16, %c0_17, %c0_18], %52 {strides = array<i32>} : memref<1x128x128xbf16, #tpu.memory_space<vmem>>, vector<1x128x128xbf16>,
    return
  }
  func.func @transform_0(%arg0: i32, %arg1: i32, %arg2: i32, %arg3: memref<2xi32, #tpu.memory_space<smem>>) -> (i32, i32, i32) {
    %c0_i32 = arith.constant 0 : i32
    %c0_i32_0 = arith.constant 0 : i32
    %c0_i32_1 = arith.constant 0 : i32
    return %arg0, %c0_i32, %c0_i32_0 : i32, i32, i32
  }
  func.func @transform_1(%arg0: i32, %arg1: i32, %arg2: i32, %arg3: memref<2xi32, #tpu.memory_space<smem>>) -> (i32, i32) {
    %c0_i32 = arith.constant 0 : i32
    %c0_i32_0 = arith.constant 0 : i32
    return %c0_i32, %arg1 : i32, i32
  }
  func.func @transform_2(%arg0: i32, %arg1: i32, %arg2: i32, %arg3: memref<2xi32, #tpu.memory_space<smem>>) -> (i32, i32) {
    %c0_i32 = arith.constant 0 : i32
    %c0_i32_0 = arith.constant 0 : i32
    return %c0_i32, %arg1 : i32, i32
  }
  func.func @transform_3(%arg0: i32, %arg1: i32, %arg2: i32, %arg3: memref<2xi32, #tpu.memory_space<smem>>) -> (i32, i32) {
    %c0_i32 = arith.constant 0 : i32
    %c0_i32_0 = arith.constant 0 : i32
    return %c0_i32, %arg1 : i32, i32
  }
  func.func @transform_4(%arg0: i32, %arg1: i32, %arg2: i32, %arg3: memref<2xi32, #tpu.memory_space<smem>>) -> (i32, i32) {
    %c0_i32 = arith.constant 0 : i32
    %c0_i32_0 = arith.constant 0 : i32
    %c0_i32_1 = arith.constant 0 : i32
    return %c0_i32, %c0_i32_0 : i32, i32
  }
  func.func @transform_5(%arg0: i32, %arg1: i32, %arg2: i32, %arg3: memref<2xi32, #tpu.memory_space<smem>>) -> (i32, i32) {
    %c0_i32 = arith.constant 0 : i32
    %c0_i32_0 = arith.constant 0 : i32
    %c0_i32_1 = arith.constant 0 : i32
    return %c0_i32, %c0_i32_0 : i32, i32
  }
  func.func @transform_6(%arg0: i32, %arg1: i32, %arg2: i32, %arg3: memref<2xi32, #tpu.memory_space<smem>>) -> (i32, i32, i32) {
    %c0_i32 = arith.constant 0 : i32
    return %arg0, %arg2, %arg1 : i32, i32, i32
  }
}

</mosaic_0001>

<bundles_post_ra>
// kernel: tpu_custom_call.1
= control target key start
LH: loop header
LB: loop body
LE: loop exit
PB: predicated region body
PF: predicated region fallthrough
CT: control target
= control target key end

     0   :  { %s5131_s24 = smov [#allocation5]   ;;  %s6369_s0 = inlined_call_operand.hbm [shape: s32[2], index: 0, kind: input, shape index: {}]   ;;  %s6370_s1 = inlined_call_operand.hbm [shape: bf16[2,256,256], index: 1, kind: input, shape index: {}]   ;;  %s6371_s2 = inlined_call_operand.hbm [shape: bf16[256,256], index: 2, kind: input, shape index: {}]   ;;  %s6372_s3 = inlined_call_operand.hbm [shape: bf16[256,256], index: 3, kind: input, shape index: {}]   ;;  %s6373_s4 = inlined_call_operand.hbm [shape: bf16[256,256], index: 4, kind: input, shape index: {}]   ;;  %s6374_s5 = inlined_call_operand.hbm [shape: f32[256,128], index: 5, kind: input, shape index: {}]   ;;  %s6375_s6 = inlined_call_operand.hbm [shape: f32[256,128], index: 6, kind: input, shape index: {}]   ;;  %s6376_s7 = inlined_call_operand.hbm [shape: bf16[2,256,256], index: 7, kind: output, shape index: {}]  }
   0x1   :  { %6415 = sst [smem:[#allocation43_spill]] %s6371_s2 }
   0x2   :  { %6416 = sst [smem:[#allocation44_spill]] %s6373_s4 }
   0x3   :  { %6417 = sst [smem:[#allocation45_spill]] %s6374_s5 }
   0x4   :  { %6418 = sst [smem:[#allocation46_spill]] %s6375_s6 }
   0x5   :  { %6419 = sst [smem:[#allocation47_spill]] %s6376_s7 }
   0x6   :  { %13 = dma.hbm_to_smem %s6369_s0, 16, %s5131_s24, [#allocation4] }
   0x7   :  { %5041 = dma.done.wait [#allocation4], 16 }
   0x8   :  { %5042 = vsyncadd [#allocation4], 4294967280 }
   0x9   :  { %15 = sfence }
   0xa   :  { %16 = vsyncpa [#allocation7], 0 }
   0xb   :  { %18 = vsyncpa [#allocation7 + $0x1], 0 }
   0xc   :  { %19 = vsyncpa [#allocation10], 0 }
   0xd   :  { %21 = vsyncpa [#allocation10 + $0x1], 0 }
   0xe   :  { %22 = vsyncpa [#allocation13], 0 }
   0xf   :  { %24 = vsyncpa [#allocation13 + $0x1], 0 }
  0x10   :  { %25 = vsyncpa [#allocation16], 0 }
  0x11   :  { %26 = vsyncpa [#allocation8], 0 }
  0x12   :  { %28 = vsyncpa [#allocation8 + $0x1], 0  ;;  %s5190_s27 = smov 0   ;;  %s5192_s28 = smov 0  }
  0x13   :  { %s5194_s29 = smov 0   ;;  %s5196_s30 = smov 0  }
  0x14   :  { %s5198_s0 = smov 0   ;;  %s5200_s8 = smov 0  }
  0x15   :  { %s5202_s9 = smov 0   ;;  %s5204_s10 = smov 0  }
  0x16   :  { %s5206_s11 = smov 0   ;;  %s5208_s12 = smov 0  }
  0x17   :  { %s5210_s13 = smov 0   ;;  %s5212_s14 = smov 0  }
  0x18   :  { %s5214_s15 = smov 0   ;;  %s5216_s16 = smov 0  }
  0x19   :  { %s5218_s17 = smov 0   ;;  %s5220_s18 = smov 0  }
  0x1a LB: > { %6420 = sst [smem:[#allocation25_spill]] %s5069_s27  ;;  %s5267_s19 = sadd.s32 4294967295, %s5129_s18   ;;  %s5129_s18 = sphi %s5220_s18, %s34_s18   ;;  %s5125_s17 = sphi %s5218_s17, %s6504_s17   ;;  %s5121_s16 = sphi %s5216_s16, %s6494_s16   ;;  %s5117_s15 = sphi %s5214_s15, %s6503_s15   ;;  %s5113_s14 = sphi %s5212_s14, %s6502_s14   ;;  %s5109_s13 = sphi %s5210_s13, %s6492_s13   ;;  %s5105_s12 = sphi %s5208_s12, %s6491_s12   ;;  %s5101_s11 = sphi %s5206_s11, %s6501_s11   ;;  %s5097_s10 = sphi %s5204_s10, %s6500_s10   ;;  %s5093_s9 = sphi %s5202_s9, %s6490_s9   ;;  %s5089_s8 = sphi %s5200_s8, %s6499_s8   ;;  %s5085_s0 = sphi %s5198_s0, %s6498_s0   ;;  %s5081_s30 = sphi %s5196_s30, %s6489_s30   ;;  %s5077_s29 = sphi %s5194_s29, %s6497_s29   ;;  %s5073_s28 = sphi %s5192_s28, %s6496_s28   ;;  %s5069_s27 = sphi %s5190_s27, %s6488_s27  }
  0x1b   : > { %6421 = sst [smem:[#allocation26_spill]] %s5073_s28  ;;  %s3383_s20 = sadd.s32 4294967294, %s5129_s18  }
  0x1c   : > { %6422 = sst [smem:[#allocation27_spill]] %s5085_s0  ;;  %p73_p0 = scmp.ne.s32.totalorder %s5097_s10, %s5093_s9 }
  0x1d   : > { %6423 = sst [smem:[#allocation28_spill]] %s5097_s10  ;;  %p6391_p1 = scmp.eq.s32.totalorder %s5267_s19, 0 }
  0x1e   : > { %6424 = sst [smem:[#allocation29_spill]] %s5105_s12  ;;  %p99_p2 = scmp.ne.s32.totalorder %s5085_s0, %s5081_s30 }
  0x1f   : > { %6425 = sst [smem:[#allocation30_spill]] %s5109_s13  ;;  %p5276_p3 = por %p6391_p1, %p73_p0 }
  0x20   : > { %6426 = sst [smem:[#allocation31_spill]] %s5113_s14  ;;  %p220_p4 = scmp.ne.s32.totalorder %s5077_s29, %s5073_s28 }
  0x21   : > { %6427 = sst [smem:[#allocation32_spill]] %s5117_s15  ;;  %p5284_p5 = por %p99_p2, %p6391_p1 }
  0x22   : > { %6428 = sst [smem:[#allocation33_spill]] %s5121_s16  ;;  %p221_p6 = scmp.eq.s32.totalorder %s5267_s19, 7 }
  0x23   : > { %6429 = sst [smem:[#allocation34_spill]] %s5267_s19  ;;  %p226_p7 = scmp.ne.s32.totalorder %s5073_s28, %s5069_s27 }
  0x24   : > { %s6430_s22 = scalar_select %p5276_p3, 1, 0 }
  0x25   : > { %s6432_s23 = scalar_select %p5284_p5, 1, 0 }
  0x26   : > { %6431 = sst [smem:[#allocation35_spill]] %s6430_s22  ;;  %p227_p8 = scmp.eq.s32.totalorder %s3383_s20, 7 }
  0x27   : > { %6433 = sst [smem:[#allocation36_spill]] %s6432_s23  ;;  %p5291_p9 = por %p221_p6, %p220_p4 }
  0x28   : > { %p3384_p10 = scmp.ge.s32.totalorder %s5129_s18, 1  ;;  %p5296_p11 = por %p227_p8, %p226_p7 }
  0x29   : > { %s6434_s24 = scalar_select %p5291_p9, 1, 0 }
  0x2a   : > { %s6436_s25 = scalar_select %p5296_p11, 1, 0 }
  0x2b   : > { %6435 = sst [smem:[#allocation37_spill]] %s6434_s24  ;;  %p234_p12 = scmp.lt.s32.totalorder %s5129_s18, 9 }
  0x2c   : > { %6437 = sst [smem:[#allocation38_spill]] %s6436_s25  ;;  %s5132_s30 = smov [#allocation14]  }
  0x2d   : > { %p5301_p13 = pnand %p3384_p10, %p234_p12  ;;  %s246_s9 = sshll.u32 %s5132_s30, 4  ;;  %s247_s9 = int_to_ptr.vmem [resolvable:$true] %s246_s9 }
  0x2e   : > { %s4798_s25 = scalar_lea.vmem %s247_s9, 4096  ;;  %p4806_p10 = scmp.lt.s32.totalorder %s247_s9, %s247_s9 }
  0x2f   : > { %s6438_s26 = scalar_select %p5301_p13, 1, 0 }
  0x30   : > { %p4362_p0 = pneg %p5301_p13  ;;  %p4799_p6 = scmp.ne.s32.totalorder %s247_s9, %s4798_s25 }
  0x31   : > { %6439 = sst [smem:[#allocation39_spill]] %s6438_s26  ;;  %p4807_p12 = scmp.lt.s32.totalorder %s4798_s25, %s4798_s25 }
  0x32   : > { %p5309_p2 = pnand %p4362_p0, %p6391_p1 }
  0x33   : > { %p4808_p11 = por %p4807_p12, %p4806_p10 }
  0x34   : > { %p4789_p4 = pneg %p5309_p2 }
  0x36   : > { %p4801_p7 = pnand %p4799_p6, %p4789_p4 }
  0x38   : > { %p4802_p8 = pneg %p4801_p7 }
  0x3a   : > { %p4809_p9 = pnand %p4808_p11, %p4802_p8 }
  0x3c   : > { %4812 = shalt.err (!%p4809_p9)
}
  0x3d   : > { %s6394_s30 = smov 128   ;;  %s6389_s21 = smov 8  }
  0x3e   : > { %s6441_s5 = sld [smem:[#allocation45_spill]]  ;;  %p6393_p9 = scmp.eq.s32.totalorder %s5129_s18, 0 }
  0x3f   : > { %p93_p11 = scmp.ne.s32.totalorder %s5089_s8, %s5085_s0  ;;  %p6392_p0 = scmp.lt.s32.totalorder %s5129_s18, 8 }
  0x40   : > { %s6396_s24 = sand.u32 1, %s5129_s18   ;;  %s296_s13 = sand.u32 1, %s5089_s8  }
  0x41   : > { %p95_p6 = por %p93_p11, %p6393_p9  ;;  %s5336_s14 = sshll.u32 %s296_s13, 7 }
  0x42   : > { %s5339_s12 = sshll.u32 %s5121_s16, 6  ;;  %s6442_s2 = sld [smem:[#allocation43_spill]] }
  0x43   : > { %s298_s25 = scalar_lea.vmem [#allocation9], %s5336_s14  ;;  %p5348_p7 = pnand %p6392_p0, %p95_p6 }
  0x44   : > { %4365 = dma.hbm_to_vmem [thread:$0]  (!%p5309_p2), %s6441_s5, 4096, %s247_s9, [#allocation13], %s6394_s30, %s6394_s30, %s6389_s21  }
  0x45   : > { %s304_s9 = sshll.u32 %s298_s25, 4  ;;  %s5354_s13 = scalar_lea.sflag [#allocation10], %s6396_s24  ;;  %s305_s9 = int_to_ptr.vmem [resolvable:$true] %s304_s9 }
  0x46   : > { %6444 = sst [smem:[#allocation40_spill]] %s5354_s13  ;;  %p6414_p8 = pneg %p5348_p7 }
  0x47   : > { %s4826_s21 = scalar_lea.vmem %s305_s9, 2048  ;;  %s5135_s28 = smov [#allocation9]  }
  0x48   : > { %s303_s27 = scalar_lea.hbm %s6442_s2, %s5339_s12  ;;  %p4827_p10 = scmp.ne.s32.totalorder %s305_s9, %s4826_s21 }
  0x49   : > { %s4831_s23 = sshll.u32 %s5135_s28, 4  ;;  %s4832_s23 = int_to_ptr.vmem [resolvable:$false] %s4831_s23 }
  0x4a   : > { %p4829_p12 = pnand %p4827_p10, %p6414_p8  ;;  %s4833_s25 = scalar_lea.vmem %s4832_s23, 4096 }
  0x4b   : > { %p4834_p6 = scmp.lt.s32.totalorder %s305_s9, %s4832_s23  ;;  %p4835_p1 = scmp.lt.s32.totalorder %s4833_s25, %s4826_s21 }
  0x4c   : > { %p4830_p11 = pneg %p4829_p12 }
  0x4d   : > { %p4836_p0 = por %p4835_p1, %p4834_p6 }
  0x4f   : > { %p4837_p9 = pnand %p4836_p0, %p4830_p11 }
  0x51   : > { %4840 = shalt.err (!%p4837_p9)
}
  0x52   : > { %s6398_s30 = smov 64   ;;  %s6400_s24 = smov 4  }
  0x53   : > { %s6445_s2 = smov 128   ;;  %s5138_s5 = smov [#allocation15]  }
  0x54   : > { %4375 = dma.hbm_to_vmem [thread:$0]  (!%p5348_p7), %s303_s27, 2048, %s305_s9, %s5354_s13, %s6445_s2, %s6398_s30, %s6400_s24  }
  0x55   : > { %s259_s0 = sshll.u32 %s5138_s5, 4  ;;  %s260_s0 = int_to_ptr.vmem [resolvable:$true] %s259_s0 }
  0x56   : > { %s4852_s28 = scalar_lea.vmem %s260_s0, 4096  ;;  %p4860_p9 = scmp.lt.s32.totalorder %s260_s0, %s260_s0 }
  0x57   : > { %p4853_p10 = scmp.ne.s32.totalorder %s260_s0, %s4852_s28  ;;  %p4861_p12 = scmp.lt.s32.totalorder %s4852_s28, %s4852_s28 }
  0x59   : > { %p4855_p1 = pnand %p4853_p10, %p4789_p4  ;;  %p4862_p11 = por %p4861_p12, %p4860_p9 }
  0x5b   : > { %p4856_p0 = pneg %p4855_p1 }
  0x5d   : > { %p4863_p6 = pnand %p4862_p11, %p4856_p0 }
  0x5f   : > { %4866 = shalt.err (!%p4863_p6)
}
  0x60   : > { %s6446_s21 = smov 8   ;;  %s6447_s6 = sld [smem:[#allocation46_spill]] }
  0x61   : > { %s46_s5 = sadd.s32 1, %s5117_s15  ;;  %s53_s20 = sadd.s32 1, %s5125_s17 }
  0x62   : > { %p47_p4 = scmp.ge.s32.totalorder %s46_s5, 2  ;;  %s60_s23 = sadd.s32 1, %s5101_s11 }
  0x63   : > { %p67_p10 = scmp.ne.s32.totalorder %s5101_s11, %s5097_s10  ;;  %s273_s25 = sand.u32 1, %s5101_s11  }
  0x64   : > { %s6506_s5 = smov (%p47_p4, %s46_s5), 0  ;;  %s6449_s28 = sadd.s32 1, %s5121_s16 }
  0x65   : > { %6448 = sst [smem:[#allocation41_spill]] %s6506_s5  ;;  %s6508_s28 = smov (!%p47_p4, %s6449_s28), %s5121_s16 }
  0x66   : > { %4368 = dma.hbm_to_vmem [thread:$0]  (!%p5309_p2), %s6447_s6, 4096, %s260_s0, [#allocation16], %s6445_s2, %s6445_s2, %s6446_s21  }
  0x67   : > { %p6450_p1 = scmp.eq.s32.totalorder %s5129_s18, 0  ;;  %s204_s0 = ssub.s32 %s5117_s15, %s6506_s5 }
  0x68   : > { %p51_p2 = scmp.ge.s32.totalorder %s6508_s28, 2  ;;  %s3388_s9 = sshll.u32 %s273_s25, 8 }
  0x69   : > { %p5391_p0 = por %p6450_p1, %p67_p10  ;;  %s3624_s30 = sshll.u32 %s5125_s17, 12 }
  0x6a   : > { %s6510_s28 = smov (%p51_p2, %s6508_s28), 0  ;;  %s6512_s20 = smov (!%p51_p2, %s53_s20), %s5125_s17 }
  0x6b   : > { %6452 = sst [smem:[#allocation42_spill]] %s6510_s28  ;;  %s83_s24 = ssub.s32 %s5121_s16, %s6510_s28 }
  0x6c   : > { %p55_p9 = scmp.ge.s32.totalorder %s6512_s20, 2  ;;  %p84_p12 = scmp.eq.s32.totalorder %s83_s24, 0 }
  0x6d   : > { %s5406_s22 = scalar_lea.hbm %s6370_s1, %s3624_s30  ;;  %s277_s10 = scalar_lea.vmem [#allocation6], %s3388_s9 }
  0x6e   : > { %s284_s5 = sshll.u32 %s277_s10, 4  ;;  %s6514_s20 = smov (%p55_p9, %s6512_s20), 0  ;;  %s285_s5 = int_to_ptr.vmem [resolvable:$true] %s284_s5 }
  0x6f   : > { %s6453_s15 = sadd.s32 1, %s5089_s8  ;;  %s57_s13 = ssub.s32 %s5125_s17, %s6514_s20 }
  0x70   : > { %s5413_s26 = scalar_select %p84_p12, %s5089_s8, %s6453_s15  }
  0x71   : > { %p58_p11 = scmp.eq.s32.totalorder %s57_s13, 0  ;;  %s205_s4 = sor.u32 %s204_s0, %s57_s13 }
  0x72   : > { %s207_s28 = sor.u32 %s205_s4, %s83_s24  ;;  %p6454_p6 = scmp.lt.s32.totalorder %s5129_s18, 8 }
  0x73   : > { %s5426_s6 = scalar_select %p58_p11, %s5101_s11, %s60_s23  }
  0x74   : > { %p5421_p4 = pnand %p6454_p6, %p5391_p0  ;;  %p5428_p10 = scmp.eq.s32.totalorder %s207_s28, 0 }
  0x75   : > { %s274_s15 = scalar_lea.sflag [#allocation7], %s273_s25  ;;  %s4880_s19 = scalar_lea.vmem %s285_s5, 4096 }
  0x76   : > { %p4869_p1 = pneg %p5421_p4  ;;  %p4881_p2 = scmp.ne.s32.totalorder %s285_s5, %s4880_s19 }
  0x77   : > { %s5139_s4 = smov [#allocation6]  }
  0x78   : > { %p4883_p9 = pnand %p4881_p2, %p4869_p1  ;;  %s4885_s24 = sshll.u32 %s5139_s4, 4  ;;  %s4886_s24 = int_to_ptr.vmem [resolvable:$false] %s4885_s24 }
  0x79   : > { %s4887_s30 = scalar_lea.vmem %s4886_s24, 8192  ;;  %p4888_p0 = scmp.lt.s32.totalorder %s285_s5, %s4886_s24 }
  0x7a   : > { %p4884_p12 = pneg %p4883_p9  ;;  %p4889_p6 = scmp.lt.s32.totalorder %s4887_s30, %s4880_s19 }
  0x7c   : > { %p4890_p8 = por %p4889_p6, %p4888_p0 }
  0x7e   : > { %p4891_p11 = pnand %p4890_p8, %p4884_p12 }
  0x80   : > { %4894 = shalt.err (!%p4891_p11)
}
  0x81   : > { %4372 = dma.hbm_to_vmem [thread:$0]  (!%p5421_p4), %s5406_s22, 4096, %s285_s5, %s274_s15, %s6445_s2, %s6445_s2, %s6446_s21  }
  0x82   : > { %s6457_s13 = sadd.s32 1, %s5077_s29  ;;  %s323_s16 = scalar_lea.hbm %s6372_s3, %s5339_s12 }
  0x83   : > { %s5445_s23 = scalar_select %p5428_p10, %s5077_s29, %s6457_s13  }
  0x84   : > { %s318_s27 = scalar_lea.vmem [#allocation11], %s5336_s14  ;;  %s6458_s4 = sld [smem:[#allocation44_spill]] }
  0x85   : > { %s324_s0 = sshll.u32 %s318_s27, 4  ;;  %p6459_p1 = pneg %p5348_p7  ;;  %s325_s0 = int_to_ptr.vmem [resolvable:$true] %s324_s0 }
  0x86   : > { %s4908_s30 = scalar_lea.vmem %s325_s0, 2048  ;;  %s5140_s22 = smov [#allocation11]  }
  0x87   : > { %p4909_p8 = scmp.ne.s32.totalorder %s325_s0, %s4908_s30  ;;  %s4913_s21 = sshll.u32 %s5140_s22, 4  ;;  %s4914_s21 = int_to_ptr.vmem [resolvable:$false] %s4913_s21 }
  0x88   : > { %s4915_s5 = scalar_lea.vmem %s4914_s21, 4096  ;;  %p4916_p10 = scmp.lt.s32.totalorder %s325_s0, %s4914_s21 }
  0x89   : > { %p4911_p4 = pnand %p4909_p8, %p6459_p1  ;;  %p4917_p9 = scmp.lt.s32.totalorder %s4915_s5, %s4908_s30 }
  0x8a   : > { %s343_s24 = scalar_lea.hbm %s6458_s4, %s5339_s12 }
  0x8b   : > { %p4912_p2 = pneg %p4911_p4  ;;  %p4918_p12 = por %p4917_p9, %p4916_p10 }
  0x8d   : > { %p4919_p0 = pnand %p4918_p12, %p4912_p2 }
  0x8f   : > { %4922 = shalt.err (!%p4919_p0)
}
  0x90   : > { %s6460_s10 = smov 4   ;;  %s6461_s15 = smov 64  }
  0x91   : > { %s6462_s13 = sld [smem:[#allocation40_spill]]  ;;  %s338_s25 = scalar_lea.vmem [#allocation12], %s5336_s14 }
  0x92   : > { %s344_s28 = sshll.u32 %s338_s25, 4  ;;  %s6463_s27 = sand.u32 1, %s5129_s18   ;;  %s345_s28 = int_to_ptr.vmem [resolvable:$true] %s344_s28 }
  0x93   : > { %s335_s9 = scalar_lea.sflag [#allocation13], %s6463_s27  ;;  %s4936_s19 = scalar_lea.vmem %s345_s28, 2048 }
  0x94   : > { %p4937_p6 = scmp.ne.s32.totalorder %s345_s28, %s4936_s19  ;;  %p6464_p11 = pmov %p6459_p1 }
  0x95   : > { %s5141_s30 = smov [#allocation12]  }
  0x96   : > { %p4939_p8 = pnand %p4937_p6, %p6464_p11  ;;  %s4941_s22 = sshll.u32 %s5141_s30, 4  ;;  %s4942_s22 = int_to_ptr.vmem [resolvable:$false] %s4941_s22 }
  0x97   : > { %4378 = dma.hbm_to_vmem [thread:$0]  (!%p5348_p7), %s323_s16, 2048, %s325_s0, %s6462_s13, %s6445_s2, %s6461_s15, %s6460_s10  }
  0x98   : > { %p4940_p1 = pneg %p4939_p8  ;;  %s4943_s21 = scalar_lea.vmem %s4942_s22, 4096 }
  0x99   : > { %p4944_p4 = scmp.lt.s32.totalorder %s345_s28, %s4942_s22  ;;  %p4945_p2 = scmp.lt.s32.totalorder %s4943_s21, %s4936_s19 }
  0x9b   : > { %p4946_p10 = por %p4945_p2, %p4944_p4 }
  0x9d   : > { %p4947_p9 = pnand %p4946_p10, %p4940_p1 }
  0x9f   : > { %4950 = shalt.err (!%p4947_p9)
}
  0xa0   : > { %4381 = dma.hbm_to_vmem [thread:$0]  (!%p5348_p7), %s343_s24, 2048, %s345_s28, %s335_s9, %s6445_s2, %s6461_s15, %s6460_s10  }
  0xa1   : > { %356 = sbr.rel (%p5301_p13) target bundleno = 1832 (0x728), region = 44  ;;  %s6466_s5 = sld [smem:[#allocation28_spill]] (!%p5301_p13) }
  0xa7   : > { %s358_s25 = sand.u32 1, %s6466_s5  }
  0xa8   : > { %s3398_s27 = sshll.u32 %s358_s25, 8  ;;  %s359_s19 = scalar_lea.sflag [#allocation7], %s358_s25 }
  0xa9   : > { %s5484_s30 = scalar_lea.vmem [#allocation6], %s3398_s27 }
  0xaa   : > { %5044 = dma.done.wait (%p5276_p3), %s359_s19, 4096  }
  0xab   : > { %5046 = vsyncadd (%p5276_p3), %s359_s19, 4294963200  ;;  %s6468_s7 = sld [smem:[#allocation34_spill]] }
  0xac   : > { %s6469_s22 = sld [smem:[#allocation27_spill]] }
  0xb1   : > { %s367_s12 = sand.u32 1, %s6468_s7  }
  0xb2   : > { %s369_s2 = sand.u32 1, %s6469_s22   ;;  %s368_s10 = scalar_lea.sflag [#allocation10], %s367_s12 }
  0xb3   : > { %s3399_s24 = sshll.u32 %s369_s2, 7 }
  0xb4   : > { %s5492_s15 = scalar_lea.vmem [#allocation9], %s3399_s24 }
  0xb5   : > { %5048 = dma.done.wait (%p5284_p5), %s368_s10, 4096  }
  0xb6   : > { %5050 = vsyncadd (%p5284_p5), %s368_s10, 4294963200  ;;  %s5498_s28 = scalar_lea.vmem [#allocation11], %s3399_s24  ;;  %s386_s9 = scalar_lea.sflag [#allocation13], %s367_s12 }
  0xb7   : > { %s5500_s14 = scalar_lea.vmem [#allocation12], %s3399_s24 }
  0xb8   : > { %5052 = dma.done.wait (%p5284_p5), %s386_s9, 2048  }
  0xb9   : > { %5054 = vsyncadd (%p5284_p5), %s386_s9, 4294965248  ;;  %p6471_p3 = scmp.eq.s32.totalorder %s6468_s7, 0 }
  0xbb   : > { %5056 = dma.done.wait (%p6471_p3), [#allocation13], 4096   ;;  %p6472_p13 = pmov %p6471_p3 }
  0xbc   : > { %p6473_p7 = pmov %p6471_p3 }
  0xbd   : > { %5058 = vsyncadd (%p6472_p13), [#allocation13], 4294963200 }
  0xbe   : > { %5060 = dma.done.wait (%p6473_p7), [#allocation16], 4096   ;;  %p6474_p12 = pmov %p6471_p3 }
  0xbf   : > { %s6475_s16 = sld [smem:[#allocation26_spill]] }
  0xc0   : > { %5062 = vsyncadd (%p6474_p12), [#allocation16], 4294963200  ;;  %s6476_s25 = sld [smem:[#allocation29_spill]] }
  0xc5   : > { %s438_s0 = sand.u32 1, %s6475_s16  }
  0xc6   : > { %s3404_s5 = sshll.u32 %s438_s0, 6  ;;  %p3405_p5 = scmp.ne.s32.totalorder %s6476_s25, 0 }
  0xc7   : > { %s5517_s13 = scalar_lea.vmem [#allocation17], %s3404_s5  ;;  %s5142_s27 = smov (!%p3405_p5), 64  }
  0xc8   : > { %446 = sbr.rel (%p3405_p5) target bundleno = 681 (0x2a9), region = 72 }
  0xcd   : > { %v4531_v0 = vld [vmem:[%s5498_s28 + $0x78] sm:$0xff]   ;;  %v4533_v2 = vld [vmem:[%s5498_s28 + $0x70] sm:$0xff]   ;;  %v4535_v4 = vld [vmem:[%s5498_s28 + $0x68] sm:$0xff]  }
  0xce   : > { %v4532_v1 = vld [vmem:[%s5498_s28 + $0x38] sm:$0xff]   ;;  %3944 = vmatprep.subr.bf16.mxu0 %v4531_v0  ;;  %v4534_v3 = vld [vmem:[%s5498_s28 + $0x30] sm:$0xff]   ;;  %v4536_v5 = vld [vmem:[%s5498_s28 + $0x28] sm:$0xff]  }
  0xcf   : > { %3945 = vmatpush3.bf16.msra.mxu0 %v4532_v1  ;;  %v4537_v6 = vld [vmem:[%s5498_s28 + $0x60] sm:$0xff]   ;;  %v4539_v8 = vld [vmem:[%s5498_s28 + $0x58] sm:$0xff]   ;;  %v4541_v10 = vld [vmem:[%s5498_s28 + $0x50] sm:$0xff]  }
  0xd0   : > { %3946 = vmatprep.subr.bf16.mxu0 %v4533_v2  ;;  %v4538_v7 = vld [vmem:[%s5498_s28 + $0x20] sm:$0xff]   ;;  %v4540_v9 = vld [vmem:[%s5498_s28 + $0x18] sm:$0xff]   ;;  %v4542_v12 = vld [vmem:[%s5498_s28 + $0x10] sm:$0xff]  }
  0xd1   : > { %v4549_v11 = vld [vmem:[%s5484_s30 + $0x4] ss:$8 sps:$4 sm:$0xff]   ;;  %v4547_v17 = vld [vmem:[%s5484_s30] ss:$8 sps:$4 sm:$0xff]   ;;  %v4550_v18 = vld [vmem:[%s5484_s30 + $0x14] ss:$8 sps:$4 sm:$0xff]  }
  0xd2   : > { %799 = vmatprep.mubr.bf16.mxu0 %v4549_v11  ;;  %v4543_v13 = vld [vmem:[%s5498_s28 + $0x48] sm:$0xff]   ;;  %1472 = vmatprep.mubr.bf16.mxu1 %v4549_v11  ;;  %v4545_v15 = vld [vmem:[%s5498_s28 + $0x40] sm:$0xff]   ;;  %v4580_v19 = vld [vmem:[%s5500_s14 + $0x78] sm:$0xff]  }
  0xd3   : > { %3947 = vmatpush3.bf16.msra.mxu0 %v4534_v3  ;;  %v4544_v14 = vld [vmem:[%s5498_s28 + $0x8] sm:$0xff]   ;;  %v4546_v16 = vld [vmem:[%s5498_s28] sm:$0xff]   ;;  %v4581_v20 = vld [vmem:[%s5500_s14 + $0x38] sm:$0xff]   ;;  %4056 = vmatprep.subr.bf16.mxu1 %v4580_v19 }
  0xd4   : > { %3948 = vmatprep.subr.bf16.mxu0 %v4535_v4  ;;  %v4582_v21 = vld [vmem:[%s5500_s14 + $0x70] sm:$0xff]   ;;  %4057 = vmatpush3.bf16.msra.mxu1 %v4581_v20  ;;  %v4587_v24 = vld [vmem:[%s5500_s14 + $0x68] sm:$0xff]   ;;  %v4589_v27 = vld [vmem:[%s5500_s14 + $0x60] sm:$0xff]  }
  0xd5   : > { %v4583_v22 = vld [vmem:[%s5500_s14 + $0x30] sm:$0xff]   ;;  %4058 = vmatprep.subr.bf16.mxu1 %v4582_v21  ;;  %v4553_v25 = vld [vmem:[%s5484_s30 + $0x24] ss:$8 sps:$4 sm:$0xff]   ;;  %v4594_v29 = vld [vmem:[%s5500_s14 + $0x58] sm:$0xff]  }
  0xd6   : > { %v4552_v23 = vld [vmem:[%s5484_s30 + $0x10] ss:$8 sps:$4 sm:$0xff]   ;;  %v4588_v26 = vld [vmem:[%s5500_s14 + $0x28] sm:$0xff]   ;;  %v4590_v28 = vld [vmem:[%s5500_s14 + $0x20] sm:$0xff]  }
  0xd7   : > { %3949 = vmatpush3.bf16.msra.mxu0 %v4536_v5  ;;  %v4555_v30 = vld [vmem:[%s5484_s30 + $0x20] ss:$8 sps:$4 sm:$0xff]   ;;  %v4556_v31 = vld [vmem:[%s5484_s30 + $0x34] ss:$8 sps:$4 sm:$0xff]   ;;  %v4558_v36 = vld [vmem:[%s5484_s30 + $0x30] ss:$8 sps:$4 sm:$0xff]  }
  0xd8   : > { %3950 = vmatprep.subr.bf16.mxu0 %v4537_v6  ;;  %4059 = vmatpush3.bf16.msra.mxu1 %v4583_v22  ;;  %v4595_v32 = vld [vmem:[%s5500_s14 + $0x18] sm:$0xff]   ;;  %v4596_v33 = vld [vmem:[%s5500_s14 + $0x50] sm:$0xff]   ;;  %v4601_v35 = vld [vmem:[%s5500_s14 + $0x48] sm:$0xff]  }
  0xd9   : > { %4060 = vmatprep.subr.bf16.mxu1 %v4587_v24  ;;  %v4597_v34 = vld [vmem:[%s5500_s14 + $0x10] sm:$0xff]   ;;  %v4602_v37 = vld [vmem:[%s5500_s14 + $0x8] sm:$0xff]   ;;  %v4603_v39 = vld [vmem:[%s5500_s14 + $0x40] sm:$0xff]  }
  0xda   : > { %v4559_v38 = vld [vmem:[%s5484_s30 + $0x44] ss:$8 sps:$4 sm:$0xff]   ;;  %v4561_v41 = vld [vmem:[%s5484_s30 + $0x40] ss:$8 sps:$4 sm:$0xff]   ;;  %v4562_v42 = vld [vmem:[%s5484_s30 + $0x54] ss:$8 sps:$4 sm:$0xff]  }
  0xdb   : > { %3951 = vmatpush3.bf16.msra.mxu0 %v4538_v7  ;;  %v4604_v40 = vld [vmem:[%s5500_s14] sm:$0xff]   ;;  %v4564_v43 = vld [vmem:[%s5484_s30 + $0x50] ss:$8 sps:$4 sm:$0xff]   ;;  %v4568_v46 = vld [vmem:[%s5484_s30 + $0x74] ss:$8 sps:$4 sm:$0xff]  }
  0xdc   : > { %3952 = vmatprep.subr.bf16.mxu0 %v4539_v8  ;;  %4061 = vmatpush3.bf16.msra.mxu1 %v4588_v26  ;;  %v4565_v44 = vld [vmem:[%s5484_s30 + $0x64] ss:$8 sps:$4 sm:$0xff]   ;;  %v4567_v45 = vld [vmem:[%s5484_s30 + $0x60] ss:$8 sps:$4 sm:$0xff]   ;;  %v4570_v47 = vld [vmem:[%s5484_s30 + $0x70] ss:$8 sps:$4 sm:$0xff]  }
  0xdd   : > { %4062 = vmatprep.subr.bf16.mxu1 %v4589_v27  ;;  %v4571_v48 = vld [vmem:[%s5484_s30 + $0x84] ss:$8 sps:$4 sm:$0xff]   ;;  %v4573_v49 = vld [vmem:[%s5484_s30 + $0x80] ss:$8 sps:$4 sm:$0xff]   ;;  %v4574_v50 = vld [vmem:[%s5484_s30 + $0x94] ss:$8 sps:$4 sm:$0xff]  }
  0xde   : > { %v4576_v51 = vld [vmem:[%s5484_s30 + $0x90] ss:$8 sps:$4 sm:$0xff]   ;;  %v4577_v52 = vld [vmem:[%s5484_s30 + $0xa4] ss:$8 sps:$4 sm:$0xff]   ;;  %v4579_v53 = vld [vmem:[%s5484_s30 + $0xa0] ss:$8 sps:$4 sm:$0xff]  }
  0xdf   : > { %3953 = vmatpush3.bf16.msra.mxu0 %v4540_v9  ;;  %v4584_v54 = vld [vmem:[%s5484_s30 + $0xb4] ss:$8 sps:$4 sm:$0xff]   ;;  %v4586_v55 = vld [vmem:[%s5484_s30 + $0xb0] ss:$8 sps:$4 sm:$0xff]   ;;  %v4591_v56 = vld [vmem:[%s5484_s30 + $0xc4] ss:$8 sps:$4 sm:$0xff]  }
  0xe0   : > { %3954 = vmatprep.subr.bf16.mxu0 %v4541_v10  ;;  %4063 = vmatpush3.bf16.msra.mxu1 %v4590_v28  ;;  %v4593_v57 = vld [vmem:[%s5484_s30 + $0xc0] ss:$8 sps:$4 sm:$0xff]   ;;  %v4598_v58 = vld [vmem:[%s5484_s30 + $0xd4] ss:$8 sps:$4 sm:$0xff]   ;;  %v4600_v59 = vld [vmem:[%s5484_s30 + $0xd0] ss:$8 sps:$4 sm:$0xff]  }
  0xe1   : > { %4064 = vmatprep.subr.bf16.mxu1 %v4594_v29  ;;  %v4605_v60 = vld [vmem:[%s5484_s30 + $0xe4] ss:$8 sps:$4 sm:$0xff]   ;;  %v4607_v61 = vld [vmem:[%s5484_s30 + $0xe0] ss:$8 sps:$4 sm:$0xff]   ;;  %v4608_v62 = vld [vmem:[%s5484_s30 + $0xf4] ss:$8 sps:$4 sm:$0xff]  }
  0xe2   : > { %v4610_v63 = vld [vmem:[%s5484_s30 + $0xf0] ss:$8 sps:$4 sm:$0xff]  }
  0xe3   : > { %3955 = vmatpush3.bf16.msra.mxu0 %v4542_v12 }
  0xe4   : > { %3956 = vmatprep.subr.bf16.mxu0 %v4543_v13  ;;  %4065 = vmatpush3.bf16.msra.mxu1 %v4595_v32 }
  0xe5   : > { %4066 = vmatprep.subr.bf16.mxu1 %v4596_v33 }
  0xe7   : > { %3957 = vmatpush3.bf16.msra.mxu0 %v4544_v14 }
  0xe8   : > { %3958 = vmatprep.subr.bf16.mxu0 %v4545_v15  ;;  %4067 = vmatpush3.bf16.msra.mxu1 %v4597_v34 }
  0xe9   : > { %4068 = vmatprep.subr.bf16.mxu1 %v4601_v35 }
  0xeb   : > { %3959 = vmatpush3.bf16.msra.mxu0 %v4546_v16 }
  0xec   : > { %4069 = vmatpush3.bf16.msra.mxu1 %v4602_v37 }
  0xed   : > { %4070 = vmatprep.subr.bf16.mxu1 %v4603_v39 }
  0xee   : > { %800 = vmatmul.mubr.bf16.vlgmr.msra.gmra.mxu0 %v4547_v17 }
  0xef   : > { %807 = vmatprep.mubr.bf16.mxu0 %v4550_v18 }
  0xf0   : > { %4071 = vmatpush3.bf16.msra.mxu1 %v4604_v40 }
  0xf3   : > { %1473 = vmatmul.mubr.bf16.vlgmr.msra.gmra.mxu1 %v4547_v17 }
  0xf4   : > { %1480 = vmatprep.mubr.bf16.mxu1 %v4550_v18 }
  0xf6   : > { %808 = vmatmul.mubr.bf16.gmra.mxu0 %v4552_v23 }
  0xf7   : > { %815 = vmatprep.mubr.bf16.mxu0 %v4553_v25 }
  0xfb   : > { %1481 = vmatmul.mubr.bf16.gmra.mxu1 %v4552_v23 }
  0xfc   : > { %1488 = vmatprep.mubr.bf16.mxu1 %v4553_v25 }
  0xfe   : > { %816 = vmatmul.mubr.bf16.gmra.mxu0 %v4555_v30 }
  0xff   : > { %823 = vmatprep.mubr.bf16.mxu0 %v4556_v31 }
 0x103   : > { %1489 = vmatmul.mubr.bf16.gmra.mxu1 %v4555_v30 }
 0x104   : > { %1496 = vmatprep.mubr.bf16.mxu1 %v4556_v31 }
 0x106   : > { %824 = vmatmul.mubr.bf16.gmra.mxu0 %v4558_v36 }
 0x107   : > { %831 = vmatprep.mubr.bf16.mxu0 %v4559_v38 }
 0x10b   : > { %1497 = vmatmul.mubr.bf16.gmra.mxu1 %v4558_v36 }
 0x10c   : > { %1504 = vmatprep.mubr.bf16.mxu1 %v4559_v38 }
 0x10e   : > { %832 = vmatmul.mubr.bf16.gmra.mxu0 %v4561_v41 }
 0x10f   : > { %839 = vmatprep.mubr.bf16.mxu0 %v4562_v42 }
 0x113   : > { %1505 = vmatmul.mubr.bf16.gmra.mxu1 %v4561_v41 }
 0x114   : > { %1512 = vmatprep.mubr.bf16.mxu1 %v4562_v42 }
 0x116   : > { %840 = vmatmul.mubr.bf16.gmra.mxu0 %v4564_v43 }
 0x117   : > { %847 = vmatprep.mubr.bf16.mxu0 %v4565_v44 }
 0x11b   : > { %1513 = vmatmul.mubr.bf16.gmra.mxu1 %v4564_v43 }
 0x11c   : > { %1520 = vmatprep.mubr.bf16.mxu1 %v4565_v44 }
 0x11e   : > { %848 = vmatmul.mubr.bf16.gmra.mxu0 %v4567_v45 }
 0x11f   : > { %855 = vmatprep.mubr.bf16.mxu0 %v4568_v46 }
 0x123   : > { %1521 = vmatmul.mubr.bf16.gmra.mxu1 %v4567_v45 }
 0x124   : > { %1528 = vmatprep.mubr.bf16.mxu1 %v4568_v46 }
 0x126   : > { %856 = vmatmul.mubr.bf16.gmra.mxu0 %v4570_v47 }
 0x127   : > { %863 = vmatprep.mubr.bf16.mxu0 %v4571_v48 }
 0x12b   : > { %1529 = vmatmul.mubr.bf16.gmra.mxu1 %v4570_v47 }
 0x12c   : > { %1536 = vmatprep.mubr.bf16.mxu1 %v4571_v48 }
 0x12e   : > { %864 = vmatmul.mubr.bf16.gmra.mxu0 %v4573_v49 }
 0x12f   : > { %871 = vmatprep.mubr.bf16.mxu0 %v4574_v50 }
 0x133   : > { %1537 = vmatmul.mubr.bf16.gmra.mxu1 %v4573_v49 }
 0x134   : > { %1544 = vmatprep.mubr.bf16.mxu1 %v4574_v50 }
 0x136   : > { %872 = vmatmul.mubr.bf16.gmra.mxu0 %v4576_v51 }
 0x137   : > { %879 = vmatprep.mubr.bf16.mxu0 %v4577_v52 }
 0x13b   : > { %1545 = vmatmul.mubr.bf16.gmra.mxu1 %v4576_v51 }
 0x13c   : > { %1552 = vmatprep.mubr.bf16.mxu1 %v4577_v52 }
 0x13e   : > { %880 = vmatmul.mubr.bf16.gmra.mxu0 %v4579_v53 }
 0x13f   : > { %887 = vmatprep.mubr.bf16.mxu0 %v4584_v54 }
 0x143   : > { %1553 = vmatmul.mubr.bf16.gmra.mxu1 %v4579_v53 }
 0x144   : > { %1560 = vmatprep.mubr.bf16.mxu1 %v4584_v54 }
 0x146   : > { %888 = vmatmul.mubr.bf16.gmra.mxu0 %v4586_v55 }
 0x147   : > { %895 = vmatprep.mubr.bf16.mxu0 %v4591_v56 }
 0x14b   : > { %1561 = vmatmul.mubr.bf16.gmra.mxu1 %v4586_v55 }
 0x14c   : > { %1568 = vmatprep.mubr.bf16.mxu1 %v4591_v56 }
 0x14e   : > { %896 = vmatmul.mubr.bf16.gmra.mxu0 %v4593_v57 }
 0x14f   : > { %903 = vmatprep.mubr.bf16.mxu0 %v4598_v58 }
 0x153   : > { %1569 = vmatmul.mubr.bf16.gmra.mxu1 %v4593_v57 }
 0x154   : > { %1576 = vmatprep.mubr.bf16.mxu1 %v4598_v58 }
 0x156   : > { %904 = vmatmul.mubr.bf16.gmra.mxu0 %v4600_v59 }
 0x157   : > { %911 = vmatprep.mubr.bf16.mxu0 %v4605_v60 }
 0x15b   : > { %1577 = vmatmul.mubr.bf16.gmra.mxu1 %v4600_v59 }
 0x15c   : > { %1584 = vmatprep.mubr.bf16.mxu1 %v4605_v60 }
 0x15e   : > { %912 = vmatmul.mubr.bf16.gmra.mxu0 %v4607_v61 }
 0x15f   : > { %919 = vmatprep.mubr.bf16.mxu0 %v4608_v62 }
 0x163   : > { %1585 = vmatmul.mubr.bf16.gmra.mxu1 %v4607_v61 }
 0x164   : > { %1592 = vmatprep.mubr.bf16.mxu1 %v4608_v62 }
 0x166   : > { %920 = vmatmul.mubr.bf16.gmra.mxu0 %v4610_v63 }
 0x16b   : > { %1593 = vmatmul.mubr.bf16.gmra.mxu1 %v4610_v63 }
 0x1ae   : > { %v3960_v0 = vpop.f32.mrf.mxu0 }
 0x1b0   : > { %v3961_v1 = vpop.f32.mrf.mxu0 }
 0x1b1   : > { %v5584_v2 = vadd.f32 %v3961_v1, %v3960_v0 }
 0x1b2   : > { %v3963_v3 = vpop.f32.mrf.mxu0 }
 0x1b3   : > { %1024 = vrot.lane.b32.xlu0 %v5584_v2, %s5142_s27  ;;  %v4072_v24 = vpop.f32.mrf.mxu1 }
 0x1b4   : > { %v3964_v4 = vpop.f32.mrf.mxu0 }
 0x1b5   : > { %v5588_v5 = vadd.f32 %v3964_v4, %v3963_v3  ;;  %v4073_v26 = vpop.f32.mrf.mxu1 }
 0x1b6   : > { %v3966_v6 = vpop.f32.mrf.mxu0  ;;  %v4074_v31 = vadd.f32 %v4073_v26, %v4072_v24 }
 0x1b7   : > { %1026 = vrot.lane.b32.xlu0 %v5588_v5, %s5142_s27  ;;  %v4075_v29 = vpop.f32.mrf.mxu1 }
 0x1b8   : > { %v3967_v7 = vpop.f32.mrf.mxu0 }
 0x1b9   : > { %v5592_v8 = vadd.f32 %v3967_v7, %v3966_v6  ;;  %v4076_v32 = vpop.f32.mrf.mxu1 }
 0x1ba   : > { %v3969_v9 = vpop.f32.mrf.mxu0  ;;  %v4077_v34 = vadd.f32 %v4076_v32, %v4075_v29 }
 0x1bb   : > { %1028 = vrot.lane.b32.xlu1 %v5592_v8, %s5142_s27  ;;  %v4078_v36 = vpop.f32.mrf.mxu1 }
 0x1bc   : > { %v3970_v10 = vpop.f32.mrf.mxu0  ;;  %v3790_v38 = vpack.c.bf16 %v4077_v34, %v4074_v31 }
 0x1bd   : > { %v5596_v11 = vadd.f32 %v3970_v10, %v3969_v9  ;;  %v4079_v39 = vpop.f32.mrf.mxu1 }
 0x1be   : > { %v3972_v12 = vpop.f32.mrf.mxu0  ;;  %3791 = vst [vmem:[#allocation3] sm:$0xff] %v3790_v38   ;;  %v4080_v44 = vadd.f32 %v4079_v39, %v4078_v36 }
 0x1bf   : > { %1030 = vrot.lane.b32.xlu1 %v5596_v11, %s5142_s27  ;;  %v4081_v42 = vpop.f32.mrf.mxu1 }
 0x1c0   : > { %v3973_v13 = vpop.f32.mrf.mxu0 }
 0x1c1   : > { %v5600_v14 = vadd.f32 %v3973_v13, %v3972_v12  ;;  %v4082_v45 = vpop.f32.mrf.mxu1 }
 0x1c2   : > { %v3975_v15 = vpop.f32.mrf.mxu0  ;;  %v4083_v47 = vadd.f32 %v4082_v45, %v4081_v42 }
 0x1c3   : > { %1032 = vrot.lane.b32.xlu0 %v5600_v14, %s5142_s27  ;;  %v4084_v49 = vpop.f32.mrf.mxu1 }
 0x1c4   : > { %v3976_v16 = vpop.f32.mrf.mxu0  ;;  %v3795_v51 = vpack.c.bf16 %v4083_v47, %v4080_v44 }
 0x1c5   : > { %v5604_v17 = vadd.f32 %v3976_v16, %v3975_v15  ;;  %v4085_v52 = vpop.f32.mrf.mxu1 }
 0x1c6   : > { %v3978_v18 = vpop.f32.mrf.mxu0  ;;  %3922 = vst [vmem:[#allocation3 + $0x8] sm:$0xff] %v3795_v51   ;;  %v4086_v57 = vadd.f32 %v4085_v52, %v4084_v49 }
 0x1c7   : > { %1034 = vrot.lane.b32.xlu1 %v5604_v17, %s5142_s27  ;;  %v4087_v55 = vpop.f32.mrf.mxu1 }
 0x1c8   : > { %v3979_v19 = vpop.f32.mrf.mxu0 }
 0x1c9   : > { %v5608_v20 = vadd.f32 %v3979_v19, %v3978_v18  ;;  %v4088_v58 = vpop.f32.mrf.mxu1 }
 0x1ca   : > { %v3981_v21 = vpop.f32.mrf.mxu0  ;;  %v4089_v60 = vadd.f32 %v4088_v58, %v4087_v55 }
 0x1cb   : > { %1036 = vrot.lane.b32.xlu0 %v5608_v20, %s5142_s27  ;;  %v4090_v62 = vpop.f32.mrf.mxu1 }
 0x1cc   : > { %v3982_v22 = vpop.f32.mrf.mxu0  ;;  %v3800_v0 = vpack.c.bf16 %v4089_v60, %v4086_v57 }
 0x1cd   : > { %v5612_v23 = vadd.f32 %v3982_v22, %v3981_v21  ;;  %v4091_v1 = vpop.f32.mrf.mxu1 }
 0x1ce   : > { %v3984_v25 = vpop.f32.mrf.mxu0  ;;  %3923 = vst [vmem:[#allocation3 + $0x10] sm:$0xff] %v3800_v0   ;;  %v4092_v9 = vadd.f32 %v4091_v1, %v4090_v62 }
 0x1cf   : > { %1038 = vrot.lane.b32.xlu1 %v5612_v23, %s5142_s27  ;;  %v4093_v6 = vpop.f32.mrf.mxu1 }
 0x1d0   : > { %v3985_v27 = vpop.f32.mrf.mxu0 }
 0x1d1   : > { %v5616_v28 = vadd.f32 %v3985_v27, %v3984_v25  ;;  %v4094_v10 = vpop.f32.mrf.mxu1 }
 0x1d2   : > { %v3987_v30 = vpop.f32.mrf.mxu0  ;;  %v4095_v13 = vadd.f32 %v4094_v10, %v4093_v6 }
 0x1d3   : > { %1040 = vrot.lane.b32.xlu0 %v5616_v28, %s5142_s27  ;;  %v4096_v16 = vpop.f32.mrf.mxu1 }
 0x1d4   : > { %v3988_v33 = vpop.f32.mrf.mxu0  ;;  %v3805_v19 = vpack.c.bf16 %v4095_v13, %v4092_v9 }
 0x1d5   : > { %v5620_v35 = vadd.f32 %v3988_v33, %v3987_v30  ;;  %v4097_v21 = vpop.f32.mrf.mxu1 }
 0x1d6   : > { %v3990_v37 = vpop.f32.mrf.mxu0  ;;  %3924 = vst [vmem:[#allocation3 + $0x18] sm:$0xff] %v3805_v19   ;;  %v4098_v27 = vadd.f32 %v4097_v21, %v4096_v16 }
 0x1d7   : > { %1042 = vrot.lane.b32.xlu1 %v5620_v35, %s5142_s27  ;;  %v4099_v25 = vpop.f32.mrf.mxu1 }
 0x1d8   : > { %v3991_v40 = vpop.f32.mrf.mxu0 }
 0x1d9   : > { %v5624_v41 = vadd.f32 %v3991_v40, %v3990_v37  ;;  %v4100_v29 = vpop.f32.mrf.mxu1 }
 0x1da   : > { %v3993_v43 = vpop.f32.mrf.mxu0  ;;  %v4101_v31 = vadd.f32 %v4100_v29, %v4099_v25 }
 0x1db   : > { %1044 = vrot.lane.b32.xlu0 %v5624_v41, %s5142_s27  ;;  %v4102_v33 = vpop.f32.mrf.mxu1 }
 0x1dc   : > { %v3994_v46 = vpop.f32.mrf.mxu0  ;;  %v3810_v36 = vpack.c.bf16 %v4101_v31, %v4098_v27 }
 0x1dd   : > { %v5628_v48 = vadd.f32 %v3994_v46, %v3993_v43  ;;  %v4103_v37 = vpop.f32.mrf.mxu1 }
 0x1de   : > { %v3996_v50 = vpop.f32.mrf.mxu0  ;;  %3925 = vst [vmem:[#allocation3 + $0x20] sm:$0xff] %v3810_v36   ;;  %v4104_v43 = vadd.f32 %v4103_v37, %v4102_v33 }
 0x1df   : > { %1046 = vrot.lane.b32.xlu1 %v5628_v48, %s5142_s27  ;;  %v4105_v40 = vpop.f32.mrf.mxu1 }
 0x1e0   : > { %v3997_v53 = vpop.f32.mrf.mxu0 }
 0x1e1   : > { %v5632_v54 = vadd.f32 %v3997_v53, %v3996_v50  ;;  %v4106_v44 = vpop.f32.mrf.mxu1 }
 0x1e2   : > { %v3999_v56 = vpop.f32.mrf.mxu0  ;;  %v4107_v46 = vadd.f32 %v4106_v44, %v4105_v40 }
 0x1e3   : > { %1048 = vrot.lane.b32.xlu0 %v5632_v54, %s5142_s27  ;;  %v4108_v49 = vpop.f32.mrf.mxu1 }
 0x1e4   : > { %v4000_v59 = vpop.f32.mrf.mxu0  ;;  %v3815_v51 = vpack.c.bf16 %v4107_v46, %v4104_v43 }
 0x1e5   : > { %v5636_v61 = vadd.f32 %v4000_v59, %v3999_v56  ;;  %v4109_v52 = vpop.f32.mrf.mxu1 }
 0x1e6   : > { %v4002_v63 = vpop.f32.mrf.mxu0  ;;  %3926 = vst [vmem:[#allocation3 + $0x28] sm:$0xff] %v3815_v51   ;;  %v4110_v58 = vadd.f32 %v4109_v52, %v4108_v49 }
 0x1e7   : > { %1050 = vrot.lane.b32.xlu1 %v5636_v61, %s5142_s27  ;;  %v4111_v56 = vpop.f32.mrf.mxu1 }
 0x1e8   : > { %v4003_v3 = vpop.f32.mrf.mxu0 }
 0x1e9   : > { %v5640_v4 = vadd.f32 %v4003_v3, %v4002_v63  ;;  %v4112_v59 = vpop.f32.mrf.mxu1 }
 0x1ea   : > { %v4005_v7 = vpop.f32.mrf.mxu0  ;;  %v4113_v62 = vadd.f32 %v4112_v59, %v4111_v56 }
 0x1eb   : > { %1052 = vrot.lane.b32.xlu0 %v5640_v4, %s5142_s27  ;;  %v4114_v0 = vpop.f32.mrf.mxu1 }
 0x1ec   : > { %v4006_v12 = vpop.f32.mrf.mxu0  ;;  %v3820_v3 = vpack.c.bf16 %v4113_v62, %v4110_v58 }
 0x1ed   : > { %v5644_v15 = vadd.f32 %v4006_v12, %v4005_v7  ;;  %v4115_v6 = vpop.f32.mrf.mxu1 }
 0x1ee   : > { %v4008_v18 = vpop.f32.mrf.mxu0  ;;  %3927 = vst [vmem:[#allocation3 + $0x30] sm:$0xff] %v3820_v3   ;;  %v4116_v13 = vadd.f32 %v4115_v6, %v4114_v0 }
 0x1ef   : > { %1054 = vrot.lane.b32.xlu1 %v5644_v15, %s5142_s27  ;;  %v4117_v10 = vpop.f32.mrf.mxu1 }
 0x1f0   : > { %v4009_v22 = vpop.f32.mrf.mxu0 }
 0x1f1   : > { %v5648_v24 = vadd.f32 %v4009_v22, %v4008_v18  ;;  %v4118_v16 = vpop.f32.mrf.mxu1 }
 0x1f2   : > { %v4011_v26 = vpop.f32.mrf.mxu0  ;;  %v4119_v19 = vadd.f32 %v4118_v16, %v4117_v10 }
 0x1f3   : > { %1056 = vrot.lane.b32.xlu0 %v5648_v24, %s5142_s27  ;;  %v4120_v22 = vpop.f32.mrf.mxu1 }
 0x1f4   : > { %v4012_v30 = vpop.f32.mrf.mxu0 }
 0x1f5   : > { %v5652_v32 = vadd.f32 %v4012_v30, %v4011_v26  ;;  %v3825_v26 = vpack.c.bf16 %v4119_v19, %v4116_v13  ;;  %v4121_v27 = vpop.f32.mrf.mxu1  ;;  %v960_v19 = vld [vmem:[#allocation15] sm:$0xff] }
 0x1f6   : > { %v4014_v34 = vpop.f32.mrf.mxu0 }
 0x1f7   : > { %1058 = vrot.lane.b32.xlu1 %v5652_v32, %s5142_s27  ;;  %3928 = vst [vmem:[#allocation3 + $0x38] sm:$0xff] %v3825_v26   ;;  %v4123_v31 = vpop.f32.mrf.mxu1 }
 0x1f8   : > { %v4015_v38 = vpop.f32.mrf.mxu0 }
 0x1f9   : > { %v5656_v39 = vadd.f32 %v4015_v38, %v4014_v34  ;;  %v4122_v34 = vadd.f32 %v4121_v27, %v4120_v22  ;;  %v4124_v36 = vpop.f32.mrf.mxu1 }
 0x1fa   : > { %v4017_v42 = vpop.f32.mrf.mxu0  ;;  %v4125_v38 = vadd.f32 %v4124_v36, %v4123_v31  ;;  %v929_v31 = vld [vmem:[#allocation14 + $0x8] sm:$0xff] }
 0x1fb   : > { %1060 = vrot.lane.b32.xlu0 %v5656_v39, %s5142_s27 }
 0x1fc   : > { %v4018_v45 = vpop.f32.mrf.mxu0  ;;  %v3830_v44 = vpack.c.bf16 %v4125_v38, %v4122_v34 }
 0x1fd   : > { %v5660_v47 = vadd.f32 %v4018_v45, %v4017_v42  ;;  %v4126_v42 = vpop.f32.mrf.mxu1 }
 0x1fe   : > { %v4020_v50 = vpop.f32.mrf.mxu0  ;;  %3929 = vst [vmem:[#allocation3 + $0x40] sm:$0xff] %v3830_v44  }
 0x1ff   : > { %1062 = vrot.lane.b32.xlu1 %v5660_v47, %s5142_s27  ;;  %v4127_v45 = vpop.f32.mrf.mxu1 }
 0x200   : > { %v4021_v53 = vpop.f32.mrf.mxu0  ;;  %v4128_v52 = vadd.f32 %v4127_v45, %v4126_v42  ;;  %v993_v45 = vmul.f32 %v5588_v5, %v929_v31  ;;  %v931_v5 = vld [vmem:[#allocation14 + $0x18] sm:$0xff] }
 0x201   : > { %v5664_v55 = vadd.f32 %v4021_v53, %v4020_v50  ;;  %v4129_v50 = vpop.f32.mrf.mxu1 }
 0x202   : > { %v4023_v57 = vpop.f32.mrf.mxu0 }
 0x203   : > { %1064 = vrot.lane.b32.xlu0 %v5664_v55, %s5142_s27  ;;  %v4130_v53 = vpop.f32.mrf.mxu1 }
 0x204   : > { %v4024_v60 = vpop.f32.mrf.mxu0 }
 0x205   : > { %v5668_v63 = vadd.f32 %v4024_v60, %v4023_v57  ;;  %v4131_v57 = vadd.f32 %v4130_v53, %v4129_v50  ;;  %v4132_v59 = vpop.f32.mrf.mxu1 }
 0x206   : > { %v4026_v1 = vpop.f32.mrf.mxu0 }
 0x207   : > { %1066 = vrot.lane.b32.xlu1 %v5668_v63, %s5142_s27  ;;  %v3835_v62 = vpack.c.bf16 %v4131_v57, %v4128_v52  ;;  %v4133_v0 = vpop.f32.mrf.mxu1 }
 0x208   : > { %v4027_v7 = vpop.f32.mrf.mxu0  ;;  %v4134_v10 = vadd.f32 %v4133_v0, %v4132_v59 }
 0x209   : > { %v5672_v9 = vadd.f32 %v4027_v7, %v4026_v1  ;;  %3930 = vst [vmem:[#allocation3 + $0x48] sm:$0xff] %v3835_v62   ;;  %v4135_v6 = vpop.f32.mrf.mxu1  ;;  %v962_v62 = vld [vmem:[#allocation15 + $0x10] sm:$0xff] }
 0x20a   : > { %v4029_v12 = vpop.f32.mrf.mxu0 }
 0x20b   : > { %1068 = vrot.lane.b32.xlu0 %v5672_v9, %s5142_s27 }
 0x20c   : > { %v4030_v18 = vpop.f32.mrf.mxu0 }
 0x20d   : > { %v5676_v21 = vadd.f32 %v4030_v18, %v4029_v12  ;;  %v4136_v12 = vpop.f32.mrf.mxu1 }
 0x20e   : > { %v4032_v25 = vpop.f32.mrf.mxu0  ;;  %v4137_v16 = vadd.f32 %v4136_v12, %v4135_v6 }
 0x20f   : > { %1070 = vrot.lane.b32.xlu1 %v5676_v21, %s5142_s27 }
 0x210   : > { %v4033_v29 = vpop.f32.mrf.mxu0  ;;  %v3840_v27 = vpack.c.bf16 %v4137_v16, %v4134_v10  ;;  %v963_v10 = vld [vmem:[#allocation15 + $0x18] sm:$0xff] }
 0x211   : > { %v5680_v30 = vadd.f32 %v4033_v29, %v4032_v25  ;;  %v4138_v25 = vpop.f32.mrf.mxu1  ;;  %v928_v29 = vld [vmem:[#allocation14] sm:$0xff] }
 0x212   : > { %v4035_v33 = vpop.f32.mrf.mxu0  ;;  %3931 = vst [vmem:[#allocation3 + $0x50] sm:$0xff] %v3840_v27   ;;  %v992_v44 = vmul.f32 %v5584_v2, %v928_v29 }
 0x213   : > { %1072 = vrot.lane.b32.xlu0 %v5680_v30, %s5142_s27  ;;  %v4139_v34 = vpop.f32.mrf.mxu1 }
 0x214   : > { %v4036_v37 = vpop.f32.mrf.mxu0 }
 0x215   : > { %v5684_v40 = vadd.f32 %v4036_v37, %v4035_v33  ;;  %v961_v33 = vld [vmem:[#allocation15 + $0x8] sm:$0xff] }
 0x216   : > { %v4038_v43 = vpop.f32.mrf.mxu0 }
 0x217   : > { %1074 = vrot.lane.b32.xlu1 %v5684_v40, %s5142_s27 }
 0x218   : > { %v4039_v46 = vpop.f32.mrf.mxu0 }
 0x219   : > { %v5688_v49 = vadd.f32 %v4039_v46, %v4038_v43  ;;  %v4141_v43 = vpop.f32.mrf.mxu1 }
 0x21a   : > { %v4041_v51 = vpop.f32.mrf.mxu0 }
 0x21b   : > { %1076 = vrot.lane.b32.xlu0 %v5688_v49, %s5142_s27  ;;  %v4142_v52 = vpop.f32.mrf.mxu1 }
 0x21c   : > { %v4042_v56 = vpop.f32.mrf.mxu0  ;;  %v4143_v59 = vadd.f32 %v4142_v52, %v4141_v43 }
 0x21d   : > { %v5692_v58 = vadd.f32 %v4042_v56, %v4041_v51  ;;  %v4140_v51 = vadd.f32 %v4139_v34, %v4138_v25  ;;  %v995_v25 = vmul.f32 %v5596_v11, %v931_v5 }
 0x21e   : > { %v4044_v60 = vpop.f32.mrf.mxu0 }
 0x21f   : > { %1078 = vrot.lane.b32.xlu1 %v5692_v58, %s5142_s27  ;;  %v3845_v2 = vpack.c.bf16 %v4143_v59, %v4140_v51 }
 0x220   : > { %v4045_v1 = vpop.f32.mrf.mxu0 }
 0x221   : > { %v5696_v3 = vadd.f32 %v4045_v1, %v4044_v60  ;;  %v4144_v1 = vpop.f32.mrf.mxu1  ;;  %3932 = vst [vmem:[#allocation3 + $0x58] sm:$0xff] %v3845_v2   ;;  %v966_v2 = vld [vmem:[#allocation15 + $0x30] sm:$0xff] }
 0x222   : > { %v4047_v7 = vpop.f32.mrf.mxu0 }
 0x223   : > { %1080 = vrot.lane.b32.xlu0 %v5696_v3, %s5142_s27  ;;  %v4145_v12 = vpop.f32.mrf.mxu1 }
 0x224   : > { %v4048_v13 = vpop.f32.mrf.mxu0  ;;  %v4146_v27 = vadd.f32 %v4145_v12, %v4144_v1 }
 0x225   : > { %v5700_v18 = vadd.f32 %v4048_v13, %v4047_v7  ;;  %v1025_v22 = vpop.permute.xlu0 %1024  ;;  %v930_v7 = vld [vmem:[#allocation14 + $0x10] sm:$0xff] }
 0x226   : > { %v4050_v26 = vpop.f32.mrf.mxu0  ;;  %v1088_v36 = vmul.f32 %v1025_v22, %v960_v19  ;;  %v4147_v19 = vpop.f32.mrf.mxu1  ;;  %v994_v22 = vmul.f32 %v5592_v8, %v930_v7 }
 0x227   : > { %1082 = vrot.lane.b32.xlu1 %v5700_v18, %s5142_s27 }
 0x228   : > { %v4051_v37 = vpop.f32.mrf.mxu0  ;;  %v1120_v53 = vadd.f32 %v1088_v36, %v992_v44  ;;  %v4148_v29 = vpop.f32.mrf.mxu1  ;;  %v964_v36 = vld [vmem:[#allocation15 + $0x20] sm:$0xff] }
 0x229   : > { %v5704_v38 = vadd.f32 %v4051_v37, %v4050_v26  ;;  %v1027_v42 = vpop.permute.xlu0 %1026  ;;  %v4149_v34 = vadd.f32 %v4148_v29, %v4147_v19  ;;  %v967_v19 = vld [vmem:[#allocation15 + $0x38] sm:$0xff] }
 0x22a   : > { %v1089_v46 = vmul.f32 %v1027_v42, %v961_v33  ;;  %v4053_v50 = vpop.f32.mrf.mxu0  ;;  %v4150_v42 = vpop.f32.mrf.mxu1 }
 0x22b   : > { %1084 = vrot.lane.b32.xlu0 %v5704_v38, %s5142_s27  ;;  %v3850_v44 = vpack.c.bf16 %v4149_v34, %v4146_v27 }
 0x22c   : > { %v1121_v56 = vadd.f32 %v1089_v46, %v993_v45  ;;  %v4054_v57 = vpop.f32.mrf.mxu0  ;;  %v932_v45 = vld [vmem:[#allocation14 + $0x20] sm:$0xff]  ;;  %v933_v46 = vld [vmem:[#allocation14 + $0x28] sm:$0xff]  ;;  %v4151_v51 = vpop.f32.mrf.mxu1 }
 0x22d   : > { %v5710_v60 = vadd.f32 %v4054_v57, %v4053_v50  ;;  %v1029_v0 = vpop.permute.xlu1 %1028  ;;  %v965_v50 = vld [vmem:[#allocation15 + $0x28] sm:$0xff]  ;;  %3933 = vst [vmem:[#allocation3 + $0x60] sm:$0xff] %v3850_v44   ;;  %v4152_v59 = vadd.f32 %v4151_v51, %v4150_v42  ;;  %v968_v42 = vld [vmem:[#allocation15 + $0x40] sm:$0xff] }
 0x22e   : > { %v3710_v6 = vpack.c.bf16 %v1121_v56, %v1120_v53  ;;  %v1090_v13 = vmul.f32 %v1029_v0, %v962_v62  ;;  %v4153_v11 = vpop.f32.mrf.mxu1  ;;  %v996_v53 = vmul.f32 %v5600_v14, %v932_v45  ;;  %v997_v56 = vmul.f32 %v5604_v17, %v933_v46  ;;  %v937_v51 = vld [vmem:[#allocation14 + $0x48] sm:$0xff] }
 0x22f   : > { %1086 = vrot.lane.b32.xlu1 %v5710_v60, %s5142_s27 }
 0x230   : > { %3711 = vst [vmem:[#allocation2] sm:$0xff] %v3710_v6   ;;  %v1122_v31 = vadd.f32 %v1090_v13, %v994_v22  ;;  %v4154_v62 = vpop.f32.mrf.mxu1  ;;  %v934_v13 = vld [vmem:[#allocation14 + $0x30] sm:$0xff] }
 0x231   : > { %v1031_v16 = vpop.permute.xlu1 %1030  ;;  %v4155_v6 = vadd.f32 %v4154_v62, %v4153_v11 }
 0x232   : > { %v1091_v26 = vmul.f32 %v1031_v16, %v963_v10  ;;  %v4156_v5 = vpop.f32.mrf.mxu1  ;;  %v935_v16 = vld [vmem:[#allocation14 + $0x38] sm:$0xff] }
 0x233   : > { %v3855_v12 = vpack.c.bf16 %v4155_v6, %v4152_v59  ;;  %v999_v27 = vmul.f32 %v5612_v23, %v935_v16  ;;  %v971_v16 = vld [vmem:[#allocation15 + $0x58] sm:$0xff] }
 0x234   : > { %v1123_v33 = vadd.f32 %v1091_v26, %v995_v25  ;;  %v4157_v22 = vpop.f32.mrf.mxu1  ;;  %v998_v26 = vmul.f32 %v5608_v20, %v934_v13  ;;  %v939_v13 = vld [vmem:[#allocation14 + $0x58] sm:$0xff] }
 0x235   : > { %v1033_v37 = vpop.permute.xlu0 %1032  ;;  %3934 = vst [vmem:[#allocation3 + $0x68] sm:$0xff] %v3855_v12   ;;  %v938_v12 = vld [vmem:[#allocation14 + $0x50] sm:$0xff] }
 0x236   : > { %v3715_v43 = vpack.c.bf16 %v1123_v33, %v1122_v31  ;;  %v1092_v52 = vmul.f32 %v1033_v37, %v964_v36  ;;  %v4159_v17 = vpop.f32.mrf.mxu1  ;;  %v4158_v31 = vadd.f32 %v4157_v22, %v4156_v5 }
 0x238   : > { %3907 = vst [vmem:[#allocation2 + $0x8] sm:$0xff] %v3715_v43   ;;  %v1124_v0 = vadd.f32 %v1092_v52, %v996_v53  ;;  %v4160_v33 = vpop.f32.mrf.mxu1  ;;  %v969_v52 = vld [vmem:[#allocation15 + $0x48] sm:$0xff] }
 0x239   : > { %v1035_v8 = vpop.permute.xlu1 %1034  ;;  %v4161_v37 = vadd.f32 %v4160_v33, %v4159_v17  ;;  %v941_v33 = vld [vmem:[#allocation14 + $0x68] sm:$0xff] }
 0x23a   : > { %v1093_v57 = vmul.f32 %v1035_v8, %v965_v50  ;;  %v4162_v44 = vpop.f32.mrf.mxu1  ;;  %v936_v50 = vld [vmem:[#allocation14 + $0x40] sm:$0xff] }
 0x23b   : > { %v3860_v46 = vpack.c.bf16 %v4161_v37, %v4158_v31  ;;  %v1000_v53 = vmul.f32 %v5616_v28, %v936_v50  ;;  %v1002_v28 = vmul.f32 %v5624_v41, %v938_v12  ;;  %v940_v31 = vld [vmem:[#allocation14 + $0x60] sm:$0xff] }
 0x23c   : > { %v1125_v1 = vadd.f32 %v1093_v57, %v997_v56  ;;  %v4163_v8 = vpop.f32.mrf.mxu1  ;;  %v1001_v56 = vmul.f32 %v5620_v35, %v937_v51  ;;  %v1003_v35 = vmul.f32 %v5628_v48, %v939_v13  ;;  %v974_v48 = vld [vmem:[#allocation15 + $0x70] sm:$0xff] }
 0x23d   : > { %v1037_v7 = vpop.permute.xlu0 %1036  ;;  %3935 = vst [vmem:[#allocation3 + $0x70] sm:$0xff] %v3860_v46   ;;  %v4164_v59 = vadd.f32 %v4163_v8, %v4162_v44  ;;  %v942_v51 = vld [vmem:[#allocation14 + $0x70] sm:$0xff]  ;;  %v975_v8 = vld [vmem:[#allocation15 + $0x78] sm:$0xff] }
 0x23e   : > { %v3720_v10 = vpack.c.bf16 %v1125_v1, %v1124_v0  ;;  %v1094_v25 = vmul.f32 %v1037_v7, %v966_v2  ;;  %v4165_v23 = vpop.f32.mrf.mxu1  ;;  %v970_v2 = vld [vmem:[#allocation15 + $0x50] sm:$0xff] }
 0x240   : > { %3908 = vst [vmem:[#allocation2 + $0x10] sm:$0xff] %v3720_v10   ;;  %v1126_v34 = vadd.f32 %v1094_v25, %v998_v26  ;;  %v4166_v62 = vpop.f32.mrf.mxu1  ;;  %v972_v26 = vld [vmem:[#allocation15 + $0x60] sm:$0xff] }
 0x241   : > { %v1039_v14 = vpop.permute.xlu1 %1038  ;;  %v4167_v6 = vadd.f32 %v4166_v62, %v4165_v23  ;;  %v1006_v23 = vmul.f32 %v5640_v4, %v942_v51  ;;  %v950_v51 = vld [vmem:[#allocation14 + $0xb0] sm:$0xff] }
 0x242   : > { %v1095_v29 = vmul.f32 %v1039_v14, %v967_v19 }
 0x243   : > { %v3865_v10 = vpack.c.bf16 %v4167_v6, %v4164_v59  ;;  %v977_v6 = vld [vmem:[#allocation15 + $0x88] sm:$0xff] }
 0x244   : > { %v1127_v36 = vadd.f32 %v1095_v29, %v999_v27 }
 0x245   : > { %v1041_v43 = vpop.permute.xlu0 %1040  ;;  %3936 = vst [vmem:[#allocation3 + $0x78] sm:$0xff] %v3865_v10  }
 0x246   : > { %v3725_v45 = vpack.c.bf16 %v1127_v36, %v1126_v34  ;;  %v1096_v11 = vmul.f32 %v1041_v43, %v968_v42  ;;  %v973_v34 = vld [vmem:[#allocation15 + $0x68] sm:$0xff]  ;;  %v1004_v42 = vmul.f32 %v5632_v54, %v940_v31  ;;  %v1005_v43 = vmul.f32 %v5636_v61, %v941_v33  ;;  %v976_v61 = vld [vmem:[#allocation15 + $0x80] sm:$0xff] }
 0x248   : > { %3909 = vst [vmem:[#allocation2 + $0x18] sm:$0xff] %v3725_v45   ;;  %v1128_v0 = vadd.f32 %v1096_v11, %v1000_v53 }
 0x249   : > { %v1043_v20 = vpop.permute.xlu1 %1042 }
 0x24a   : > { %v1097_v57 = vmul.f32 %v1043_v20, %v969_v52  ;;  %v943_v52 = vld [vmem:[#allocation14 + $0x78] sm:$0xff] }
 0x24b   : > { %v1007_v53 = vmul.f32 %v5644_v15, %v943_v52  ;;  %v978_v15 = vld [vmem:[#allocation15 + $0x90] sm:$0xff]  ;;  %v951_v52 = vld [vmem:[#allocation14 + $0xb8] sm:$0xff] }
 0x24c   : > { %v1129_v1 = vadd.f32 %v1097_v57, %v1001_v56 }
 0x24d   : > { %v1045_v7 = vpop.permute.xlu0 %1044 }
 0x24e   : > { %v3730_v5 = vpack.c.bf16 %v1129_v1, %v1128_v0  ;;  %v1098_v19 = vmul.f32 %v1045_v7, %v970_v2  ;;  %v944_v0 = vld [vmem:[#allocation14 + $0x80] sm:$0xff]  ;;  %v945_v1 = vld [vmem:[#allocation14 + $0x88] sm:$0xff] }
 0x24f   : > { %v1009_v10 = vmul.f32 %v5652_v32, %v945_v1  ;;  %v980_v32 = vld [vmem:[#allocation15 + $0xa0] sm:$0xff] }
 0x250   : > { %3910 = vst [vmem:[#allocation2 + $0x20] sm:$0xff] %v3730_v5   ;;  %v1130_v14 = vadd.f32 %v1098_v19, %v1002_v28  ;;  %v1008_v5 = vmul.f32 %v5648_v24, %v944_v0  ;;  %v947_v28 = vld [vmem:[#allocation14 + $0x98] sm:$0xff]  ;;  %v985_v0 = vld [vmem:[#allocation15 + $0xc8] sm:$0xff] }
 0x251   : > { %v1047_v22 = vpop.permute.xlu1 %1046 }
 0x252   : > { %v1099_v25 = vmul.f32 %v1047_v22, %v971_v16  ;;  %v946_v22 = vld [vmem:[#allocation14 + $0x90] sm:$0xff] }
 0x254   : > { %v1131_v17 = vadd.f32 %v1099_v25, %v1003_v35  ;;  %v979_v35 = vld [vmem:[#allocation15 + $0x98] sm:$0xff] }
 0x255   : > { %v1049_v27 = vpop.permute.xlu0 %1048 }
 0x256   : > { %v3735_v29 = vpack.c.bf16 %v1131_v17, %v1130_v14  ;;  %v1100_v36 = vmul.f32 %v1049_v27, %v972_v26  ;;  %v1010_v17 = vmul.f32 %v5656_v39, %v946_v22  ;;  %v1011_v26 = vmul.f32 %v5660_v47, %v947_v28  ;;  %v982_v47 = vld [vmem:[#allocation15 + $0xb0] sm:$0xff] }
 0x258   : > { %3911 = vst [vmem:[#allocation2 + $0x28] sm:$0xff] %v3735_v29   ;;  %v1132_v41 = vadd.f32 %v1100_v36, %v1004_v42  ;;  %v949_v36 = vld [vmem:[#allocation14 + $0xa8] sm:$0xff] }
 0x259   : > { %v1051_v37 = vpop.permute.xlu1 %1050 }
 0x25a   : > { %v1101_v44 = vmul.f32 %v1051_v37, %v973_v34  ;;  %v948_v34 = vld [vmem:[#allocation14 + $0xa0] sm:$0xff]  ;;  %v981_v37 = vld [vmem:[#allocation15 + $0xa8] sm:$0xff] }
 0x25c   : > { %v1133_v45 = vadd.f32 %v1101_v44, %v1005_v43  ;;  %v1012_v44 = vmul.f32 %v5664_v55, %v948_v34 }
 0x25d   : > { %v1053_v46 = vpop.permute.xlu0 %1052 }
 0x25e   : > { %v3740_v50 = vpack.c.bf16 %v1133_v45, %v1132_v41  ;;  %v1102_v11 = vmul.f32 %v1053_v46, %v974_v48  ;;  %v1013_v41 = vmul.f32 %v5668_v63, %v949_v36  ;;  %v984_v63 = vld [vmem:[#allocation15 + $0xc0] sm:$0xff] }
 0x260   : > { %3912 = vst [vmem:[#allocation2 + $0x30] sm:$0xff] %v3740_v50   ;;  %v1134_v54 = vadd.f32 %v1102_v11, %v1006_v23  ;;  %v1014_v23 = vmul.f32 %v5672_v9, %v950_v51 }
 0x261   : > { %v1055_v20 = vpop.permute.xlu1 %1054 }
 0x262   : > { %v1103_v56 = vmul.f32 %v1055_v20, %v975_v8  ;;  %v983_v8 = vld [vmem:[#allocation15 + $0xb8] sm:$0xff] }
 0x264   : > { %v1135_v57 = vadd.f32 %v1103_v56, %v1007_v53  ;;  %v1015_v53 = vmul.f32 %v5676_v21, %v951_v52  ;;  %v986_v21 = vld [vmem:[#allocation15 + $0xd0] sm:$0xff] }
 0x265   : > { %v1057_v59 = vpop.permute.xlu0 %1056 }
 0x266   : > { %v3745_v62 = vpack.c.bf16 %v1135_v57, %v1134_v54  ;;  %v1104_v2 = vmul.f32 %v1057_v59, %v976_v61  ;;  %v952_v59 = vld [vmem:[#allocation14 + $0xc0] sm:$0xff] }
 0x268   : > { %3913 = vst [vmem:[#allocation2 + $0x38] sm:$0xff] %v3745_v62   ;;  %v1136_v4 = vadd.f32 %v1104_v2, %v1008_v5  ;;  %v953_v62 = vld [vmem:[#allocation14 + $0xc8] sm:$0xff]  ;;  %v1016_v2 = vmul.f32 %v5680_v30, %v952_v59 }
 0x269   : > { %v1059_v7 = vpop.permute.xlu1 %1058 }
 0x26a   : > { %v1105_v12 = vmul.f32 %v1059_v7, %v977_v6  ;;  %v1017_v7 = vmul.f32 %v5684_v40, %v953_v62  ;;  %v988_v40 = vld [vmem:[#allocation15 + $0xe0] sm:$0xff] }
 0x26c   : > { %v1137_v13 = vadd.f32 %v1105_v12, %v1009_v10 }
 0x26d   : > { %v1061_v16 = vpop.permute.xlu0 %1060 }
 0x26e   : > { %v3750_v19 = vpack.c.bf16 %v1137_v13, %v1136_v4  ;;  %v1106_v25 = vmul.f32 %v1061_v16, %v978_v15  ;;  %v954_v13 = vld [vmem:[#allocation14 + $0xd0] sm:$0xff]  ;;  %v955_v15 = vld [vmem:[#allocation14 + $0xd8] sm:$0xff] }
 0x26f   : > { %v987_v16 = vld [vmem:[#allocation15 + $0xd8] sm:$0xff]  ;;  %v1018_v28 = vmul.f32 %v5688_v49, %v954_v13 }
 0x270   : > { %3914 = vst [vmem:[#allocation2 + $0x40] sm:$0xff] %v3750_v19   ;;  %v1138_v24 = vadd.f32 %v1106_v25, %v1010_v17 }
 0x271   : > { %v1063_v14 = vpop.permute.xlu1 %1062 }
 0x272   : > { %v1107_v27 = vmul.f32 %v1063_v14, %v979_v35  ;;  %v1019_v35 = vmul.f32 %v5692_v58, %v955_v15  ;;  %v990_v58 = vld [vmem:[#allocation15 + $0xf0] sm:$0xff] }
 0x274   : > { %v1139_v29 = vadd.f32 %v1107_v27, %v1011_v26  ;;  %v956_v27 = vld [vmem:[#allocation14 + $0xe0] sm:$0xff] }
 0x275   : > { %v1065_v31 = vpop.permute.xlu0 %1064 }
 0x276   : > { %v3755_v33 = vpack.c.bf16 %v1139_v29, %v1138_v24  ;;  %v1108_v42 = vmul.f32 %v1065_v31, %v980_v32  ;;  %v957_v24 = vld [vmem:[#allocation14 + $0xe8] sm:$0xff] }
 0x277   : > { %v989_v29 = vld [vmem:[#allocation15 + $0xe8] sm:$0xff]  ;;  %v1021_v34 = vmul.f32 %v5700_v18, %v957_v24 }
 0x278   : > { %3915 = vst [vmem:[#allocation2 + $0x48] sm:$0xff] %v3755_v33   ;;  %v1140_v39 = vadd.f32 %v1108_v42, %v1012_v44  ;;  %v1020_v33 = vmul.f32 %v5696_v3, %v956_v27  ;;  %v958_v44 = vld [vmem:[#allocation14 + $0xf0] sm:$0xff] }
 0x279   : > { %v1067_v43 = vpop.permute.xlu1 %1066 }
 0x27a   : > { %v1109_v45 = vmul.f32 %v1067_v43, %v981_v37 }
 0x27c   : > { %v1141_v48 = vadd.f32 %v1109_v45, %v1013_v41  ;;  %v959_v41 = vld [vmem:[#allocation14 + $0xf8] sm:$0xff] }
 0x27d   : > { %v1069_v46 = vpop.permute.xlu0 %1068  ;;  %v991_v45 = vld [vmem:[#allocation15 + $0xf8] sm:$0xff] }
 0x27e   : > { %v3760_v50 = vpack.c.bf16 %v1141_v48, %v1140_v39  ;;  %v1110_v11 = vmul.f32 %v1069_v46, %v982_v47  ;;  %v1022_v47 = vmul.f32 %v5704_v38, %v958_v44  ;;  %v1023_v46 = vmul.f32 %v5710_v60, %v959_v41 }
 0x280   : > { %3916 = vst [vmem:[#allocation2 + $0x50] sm:$0xff] %v3760_v50   ;;  %v1142_v55 = vadd.f32 %v1110_v11, %v1014_v23 }
 0x281   : > { %v1071_v20 = vpop.permute.xlu1 %1070 }
 0x282   : > { %v1111_v56 = vmul.f32 %v1071_v20, %v983_v8 }
 0x284   : > { %v1143_v54 = vadd.f32 %v1111_v56, %v1015_v53 }
 0x285   : > { %v1073_v57 = vpop.permute.xlu0 %1072 }
 0x286   : > { %v3765_v61 = vpack.c.bf16 %v1143_v54, %v1142_v55  ;;  %v1112_v1 = vmul.f32 %v1073_v57, %v984_v63 }
 0x288   : > { %3917 = vst [vmem:[#allocation2 + $0x58] sm:$0xff] %v3765_v61   ;;  %v1144_v9 = vadd.f32 %v1112_v1, %v1016_v2 }
 0x289   : > { %v1075_v6 = vpop.permute.xlu1 %1074 }
 0x28a   : > { %v1113_v5 = vmul.f32 %v1075_v6, %v985_v0 }
 0x28c   : > { %v1145_v10 = vadd.f32 %v1113_v5, %v1017_v7 }
 0x28d   : > { %v1077_v12 = vpop.permute.xlu0 %1076 }
 0x28e   : > { %v3770_v4 = vpack.c.bf16 %v1145_v10, %v1144_v9  ;;  %v1114_v19 = vmul.f32 %v1077_v12, %v986_v21 }
 0x290   : > { %3918 = vst [vmem:[#allocation2 + $0x60] sm:$0xff] %v3770_v4   ;;  %v1146_v30 = vadd.f32 %v1114_v19, %v1018_v28 }
 0x291   : > { %v1079_v22 = vpop.permute.xlu1 %1078 }
 0x292   : > { %v1115_v25 = vmul.f32 %v1079_v22, %v987_v16 }
 0x294   : > { %v1147_v14 = vadd.f32 %v1115_v25, %v1019_v35 }
 0x295   : > { %v1081_v17 = vpop.permute.xlu0 %1080 }
 0x296   : > { %v3775_v26 = vpack.c.bf16 %v1147_v14, %v1146_v30  ;;  %v1116_v32 = vmul.f32 %v1081_v17, %v988_v40 }
 0x298   : > { %3919 = vst [vmem:[#allocation2 + $0x68] sm:$0xff] %v3775_v26   ;;  %v1148_v49 = vadd.f32 %v1116_v32, %v1020_v33 }
 0x299   : > { %v1083_v31 = vpop.permute.xlu1 %1082 }
 0x29a   : > { %v1117_v36 = vmul.f32 %v1083_v31, %v989_v29 }
 0x29c   : > { %v1149_v37 = vadd.f32 %v1117_v36, %v1021_v34 }
 0x29d   : > { %v1085_v42 = vpop.permute.xlu0 %1084 }
 0x29e   : > { %v3780_v43 = vpack.c.bf16 %v1149_v37, %v1148_v49  ;;  %v1118_v39 = vmul.f32 %v1085_v42, %v990_v58 }
 0x2a0   : > { %3920 = vst [vmem:[#allocation2 + $0x70] sm:$0xff] %v3780_v43   ;;  %v1150_v3 = vadd.f32 %v1118_v39, %v1022_v47 }
 0x2a1   : > { %v1087_v48 = vpop.permute.xlu1 %1086 }
 0x2a2   : > { %v1119_v50 = vmul.f32 %v1087_v48, %v991_v45 }
 0x2a4   : > { %v1151_v51 = vadd.f32 %v1119_v50, %v1023_v46 }
 0x2a6   : > { %v3785_v18 = vpack.c.bf16 %v1151_v51, %v1150_v3 }
 0x2a8   : > { %3921 = vst [vmem:[#allocation2 + $0x78] sm:$0xff] %v3785_v18  }
 0x2a9 PF: > { %s6477_s19 = sld [smem:[#allocation29_spill]]  ;;  %v4611_v52 = vld [vmem:[%s5492_s15 + $0x78] sm:$0xff]   ;;  %v4613_v60 = vld [vmem:[%s5492_s15 + $0x70] sm:$0xff]   ;;  %v4615_v11 = vld [vmem:[%s5492_s15 + $0x68] sm:$0xff]   ;;  %s3197_s27 = sshll.u32 %s5517_s13, 4  ;;  %s6282_s27 = int_to_ptr.vmem [resolvable:$true] %s3197_s27 }
 0x2aa   : > { %v4612_v38 = vld [vmem:[%s5492_s15 + $0x38] sm:$0xff]   ;;  %4168 = vmatprep.subr.bf16.mxu0 %v4611_v52  ;;  %v4614_v8 = vld [vmem:[%s5492_s15 + $0x30] sm:$0xff]   ;;  %v4616_v20 = vld [vmem:[%s5492_s15 + $0x28] sm:$0xff]   ;;  %s6478_s2 = sld [smem:[#allocation31_spill]] }
 0x2ab   : > { %4169 = vmatpush3.bf16.msra.mxu0 %v4612_v38  ;;  %v4617_v23 = vld [vmem:[%s5492_s15 + $0x60] sm:$0xff]   ;;  %v4619_v56 = vld [vmem:[%s5492_s15 + $0x58] sm:$0xff]   ;;  %v4621_v54 = vld [vmem:[%s5492_s15 + $0x50] sm:$0xff]   ;;  %s6479_s10 = sld [smem:[#allocation30_spill]] }
 0x2ac   : > { %4170 = vmatprep.subr.bf16.mxu0 %v4613_v60  ;;  %v4618_v53 = vld [vmem:[%s5492_s15 + $0x20] sm:$0xff]   ;;  %v4620_v55 = vld [vmem:[%s5492_s15 + $0x18] sm:$0xff]   ;;  %v4622_v57 = vld [vmem:[%s5492_s15 + $0x10] sm:$0xff]   ;;  %s6481_s5 = sld [smem:[#allocation37_spill]] }
 0x2ad   : > { %v4623_v61 = vld [vmem:[%s5492_s15 + $0x48] sm:$0xff]   ;;  %v4625_v62 = vld [vmem:[%s5492_s15 + $0x40] sm:$0xff]   ;;  %v4652_v35 = vld [vmem:[#allocation2 + $0x38] sm:$0xff]  }
 0x2ae   : > { %v4624_v59 = vld [vmem:[%s5492_s15 + $0x8] sm:$0xff]   ;;  %v4626_v0 = vld [vmem:[%s5492_s15] sm:$0xff]   ;;  %v4653_v25 = vld [vmem:[#allocation2 + $0x70] sm:$0xff]  }
 0x2af   : > { %4171 = vmatpush3.bf16.msra.mxu0 %v4614_v8  ;;  %s5753_s7 = sshll.u32 %s6477_s19, 7  ;;  %v4651_v28 = vld [vmem:[#allocation2 + $0x78] sm:$0xff]   ;;  %v4654_v30 = vld [vmem:[#allocation2 + $0x30] sm:$0xff]   ;;  %v4655_v14 = vld [vmem:[#allocation2 + $0x68] sm:$0xff]   ;;  %s3706_s15 = sshll.u32 %s6477_s19, 5 }
 0x2b0   : > { %4172 = vmatprep.subr.bf16.mxu0 %v4615_v11  ;;  %s5758_s22 = scalar_lea.vmem %s5484_s30, %s5753_s7 [#allocation6]  ;;  %4232 = vmatprep.subr.bf16.mxu1 %v4651_v28  ;;  %v4656_v40 = vld [vmem:[#allocation2 + $0x28] sm:$0xff]   ;;  %v4657_v17 = vld [vmem:[#allocation2 + $0x60] sm:$0xff]   ;;  %v4659_v27 = vld [vmem:[#allocation2 + $0x58] sm:$0xff]   ;;  %s5143_s30 = smov 64  }
 0x2b1   : > { %v4629_v63 = vld [vmem:[%s5758_s22 + $0x4] ss:$8 sps:$4 sm:$0xff]   ;;  %v4627_v1 = vld [vmem:[%s5758_s22] ss:$8 sps:$4 sm:$0xff]   ;;  %v4630_v6 = vld [vmem:[%s5758_s22 + $0x14] ss:$8 sps:$4 sm:$0xff]   ;;  %4233 = vmatpush3.bf16.xpose.msra.mxu1 %v4652_v35  ;;  %s3192_s28 = sadd.s32 %s6479_s10, %s3706_s15 }
 0x2b2   : > { %2023 = vmatprep.mubr.bf16.mxu0 %v4629_v63  ;;  %v4632_v2 = vld [vmem:[%s5758_s22 + $0x10] ss:$8 sps:$4 sm:$0xff]   ;;  %v4633_v7 = vld [vmem:[%s5758_s22 + $0x24] ss:$8 sps:$4 sm:$0xff]   ;;  %v4635_v5 = vld [vmem:[%s5758_s22 + $0x20] ss:$8 sps:$4 sm:$0xff]   ;;  %4234 = vmatprep.subr.bf16.mxu1 %v4653_v25 }
 0x2b3   : > { %4173 = vmatpush3.bf16.msra.mxu0 %v4616_v20  ;;  %v4636_v9 = vld [vmem:[%s5758_s22 + $0x34] ss:$8 sps:$4 sm:$0xff]   ;;  %v4638_v10 = vld [vmem:[%s5758_s22 + $0x30] ss:$8 sps:$4 sm:$0xff]   ;;  %v4639_v21 = vld [vmem:[%s5758_s22 + $0x44] ss:$8 sps:$4 sm:$0xff]  }
 0x2b4   : > { %4174 = vmatprep.subr.bf16.mxu0 %v4617_v23  ;;  %v4641_v12 = vld [vmem:[%s5758_s22 + $0x40] ss:$8 sps:$4 sm:$0xff]   ;;  %v4642_v4 = vld [vmem:[%s5758_s22 + $0x54] ss:$8 sps:$4 sm:$0xff]   ;;  %v4644_v13 = vld [vmem:[%s5758_s22 + $0x50] ss:$8 sps:$4 sm:$0xff]  }
 0x2b5   : > { %v4645_v15 = vld [vmem:[%s5758_s22 + $0x64] ss:$8 sps:$4 sm:$0xff]   ;;  %v4647_v16 = vld [vmem:[%s5758_s22 + $0x60] ss:$8 sps:$4 sm:$0xff]   ;;  %v4648_v19 = vld [vmem:[%s5758_s22 + $0x74] ss:$8 sps:$4 sm:$0xff]  }
 0x2b6   : > { %v4650_v22 = vld [vmem:[%s5758_s22 + $0x70] ss:$8 sps:$4 sm:$0xff]   ;;  %v4658_v26 = vld [vmem:[#allocation2 + $0x20] sm:$0xff]   ;;  %v4663_v31 = vld [vmem:[#allocation2 + $0x48] sm:$0xff]   ;;  %s5848_s21 = scalar_lea.vmem [#allocation15], %s5753_s7  ;;  %s5852_s12 = scalar_lea.vmem [#allocation14], %s5753_s7 }
 0x2b7   : > { %4175 = vmatpush3.bf16.msra.mxu0 %v4618_v53  ;;  %v4660_v24 = vld [vmem:[#allocation2 + $0x18] sm:$0xff]   ;;  %v4661_v29 = vld [vmem:[#allocation2 + $0x50] sm:$0xff]   ;;  %v4664_v33 = vld [vmem:[#allocation2 + $0x8] sm:$0xff]   ;;  %s2520_s24 = sld [smem:[#allocation5 + %s6478_s2]]  ;;  %s3620_s9 = sshll.u32 %s6478_s2, 6 }
 0x2b8   : > { %4176 = vmatprep.subr.bf16.mxu0 %v4619_v56  ;;  %v4662_v32 = vld [vmem:[#allocation2 + $0x10] sm:$0xff]   ;;  %v4665_v34 = vld [vmem:[#allocation2 + $0x40] sm:$0xff]   ;;  %s3194_s14 = sadd.s32 %s3620_s9, %s3192_s28  ;;  %s6482_s22 = sld [smem:[#allocation47_spill]] }
 0x2b9   : > { %4235 = vmatpush3.bf16.xpose.msra.mxu1 %v4654_v30  ;;  %v4666_v36 = vld [vmem:[#allocation2] sm:$0xff]   ;;  %s3621_s25 = sshll.u32 %s3194_s14, 6  ;;  %s4951_s2 = scalar_lea.vmem %s6282_s27, 1024 }
 0x2ba   : > { %4236 = vmatprep.subr.bf16.mxu1 %v4655_v14  ;;  %v2106_v28 = vld [vmem:[%s5848_s21] sm:$0xff]  ;;  %v2090_v14 = vld [vmem:[%s5852_s12 + $0x8] sm:$0xff]  ;;  %p4952_p0 = scmp.ne.s32.totalorder %s6282_s27, %s4951_s2  ;;  %p6483_p6 = scmp.ne.s32.totalorder %s6481_s5, 0 }
 0x2bb   : > { %4177 = vmatpush3.bf16.msra.mxu0 %v4620_v55  ;;  %v2089_v35 = vld [vmem:[%s5852_s12] sm:$0xff] }
 0x2bc   : > { %4178 = vmatprep.subr.bf16.mxu0 %v4621_v54  ;;  %p4953_p11 = pnand %p4952_p0, %p6483_p6 }
 0x2be   : > { %p4954_p8 = pneg %p4953_p11 }
 0x2bf   : > { %4179 = vmatpush3.bf16.msra.mxu0 %v4622_v57 }
 0x2c0   : > { %4180 = vmatprep.subr.bf16.mxu0 %v4623_v61 }
 0x2c1   : > { %4237 = vmatpush3.bf16.xpose.msra.mxu1 %v4656_v40  ;;  %v2107_v40 = vld [vmem:[%s5848_s21 + $0x8] sm:$0xff] }
 0x2c2   : > { %4238 = vmatprep.subr.bf16.mxu1 %v4657_v17 }
 0x2c3   : > { %4181 = vmatpush3.bf16.msra.mxu0 %v4624_v59 }
 0x2c4   : > { %4182 = vmatprep.subr.bf16.mxu0 %v4625_v62 }
 0x2c7   : > { %4183 = vmatpush3.bf16.msra.mxu0 %v4626_v0 }
 0x2c9   : > { %4239 = vmatpush3.bf16.xpose.msra.mxu1 %v4658_v26 }
 0x2ca   : > { %2024 = vmatmul.mubr.bf16.vlgmr.msra.gmra.mxu0 %v4627_v1  ;;  %4240 = vmatprep.subr.bf16.mxu1 %v4659_v27 }
 0x2cb   : > { %2031 = vmatprep.mubr.bf16.mxu0 %v4630_v6 }
 0x2d1   : > { %4241 = vmatpush3.bf16.xpose.msra.mxu1 %v4660_v24 }
 0x2d2   : > { %2032 = vmatmul.mubr.bf16.gmra.mxu0 %v4632_v2  ;;  %4242 = vmatprep.subr.bf16.mxu1 %v4661_v29 }
 0x2d3   : > { %2039 = vmatprep.mubr.bf16.mxu0 %v4633_v7 }
 0x2d9   : > { %4243 = vmatpush3.bf16.xpose.msra.mxu1 %v4662_v32  ;;  %v2108_v32 = vld [vmem:[%s5848_s21 + $0x10] sm:$0xff] }
 0x2da   : > { %2040 = vmatmul.mubr.bf16.gmra.mxu0 %v4635_v5  ;;  %4244 = vmatprep.subr.bf16.mxu1 %v4663_v31 }
 0x2db   : > { %2047 = vmatprep.mubr.bf16.mxu0 %v4636_v9 }
 0x2e1   : > { %4245 = vmatpush3.bf16.xpose.msra.mxu1 %v4664_v33  ;;  %v2091_v33 = vld [vmem:[%s5852_s12 + $0x10] sm:$0xff] }
 0x2e2   : > { %2048 = vmatmul.mubr.bf16.gmra.mxu0 %v4638_v10  ;;  %4246 = vmatprep.subr.bf16.mxu1 %v4665_v34 }
 0x2e3   : > { %2055 = vmatprep.mubr.bf16.mxu0 %v4639_v21 }
 0x2e9   : > { %4247 = vmatpush3.bf16.xpose.msra.mxu1 %v4666_v36 }
 0x2ea   : > { %2056 = vmatmul.mubr.bf16.gmra.mxu0 %v4641_v12 }
 0x2eb   : > { %2063 = vmatprep.mubr.bf16.mxu0 %v4642_v4 }
 0x2f2   : > { %2064 = vmatmul.mubr.bf16.gmra.mxu0 %v4644_v13 }
 0x2f3   : > { %2071 = vmatprep.mubr.bf16.mxu0 %v4645_v15 }
 0x2fa   : > { %2072 = vmatmul.mubr.bf16.gmra.mxu0 %v4647_v16 }
 0x2fb   : > { %2079 = vmatprep.mubr.bf16.mxu0 %v4648_v19 }
 0x302   : > { %2080 = vmatmul.mubr.bf16.gmra.mxu0 %v4650_v22 }
 0x38a   : > { %v4184_v49 = vpop.f32.mrf.mxu0 }
 0x38c   : > { %v4185_v37 = vpop.f32.mrf.mxu0 }
 0x38d   : > { %v5783_v58 = vadd.f32 %v4185_v37, %v4184_v49 }
 0x38e   : > { %v4187_v42 = vpop.f32.mrf.mxu0 }
 0x38f   : > { %2138 = vrot.lane.b32.xlu0 %v5783_v58, %s5143_s30  ;;  %v2122_v17 = vmul.f32 %v5783_v58, %v2089_v35 }
 0x390   : > { %v4188_v43 = vpop.f32.mrf.mxu0 }
 0x391   : > { %v5787_v44 = vadd.f32 %v4188_v43, %v4187_v42  ;;  %v2092_v42 = vld [vmem:[%s5852_s12 + $0x18] sm:$0xff] }
 0x392   : > { %v4190_v41 = vpop.f32.mrf.mxu0  ;;  %v2109_v43 = vld [vmem:[%s5848_s21 + $0x18] sm:$0xff] }
 0x393   : > { %2140 = vrot.lane.b32.xlu0 %v5787_v44, %s5143_s30  ;;  %v2123_v27 = vmul.f32 %v5787_v44, %v2090_v14  ;;  %v2097_v14 = vld [vmem:[%s5852_s12 + $0x40] sm:$0xff] }
 0x394   : > { %v4191_v45 = vpop.f32.mrf.mxu0 }
 0x395   : > { %v5791_v39 = vadd.f32 %v4191_v45, %v4190_v41 }
 0x396   : > { %v4193_v48 = vpop.f32.mrf.mxu0 }
 0x397   : > { %2142 = vrot.lane.b32.xlu1 %v5791_v39, %s5143_s30  ;;  %v2124_v41 = vmul.f32 %v5791_v39, %v2091_v33  ;;  %v2111_v39 = vld [vmem:[%s5848_s21 + $0x28] sm:$0xff] }
 0x398   : > { %v4194_v47 = vpop.f32.mrf.mxu0 }
 0x399   : > { %v5795_v46 = vadd.f32 %v4194_v47, %v4193_v48 }
 0x39a   : > { %v4196_v50 = vpop.f32.mrf.mxu0 }
 0x39b   : > { %2144 = vrot.lane.b32.xlu1 %v5795_v46, %s5143_s30  ;;  %v2125_v44 = vmul.f32 %v5795_v46, %v2092_v42 }
 0x39c   : > { %v4197_v3 = vpop.f32.mrf.mxu0 }
 0x39d   : > { %v5799_v51 = vadd.f32 %v4197_v3, %v4196_v50  ;;  %v2110_v50 = vld [vmem:[%s5848_s21 + $0x20] sm:$0xff] }
 0x39e   : > { %v4199_v18 = vpop.f32.mrf.mxu0 }
 0x39f   : > { %2146 = vrot.lane.b32.xlu0 %v5799_v51, %s5143_s30 }
 0x3a0   : > { %v4200_v52 = vpop.f32.mrf.mxu0 }
 0x3a1   : > { %v5803_v38 = vadd.f32 %v4200_v52, %v4199_v18  ;;  %v2093_v18 = vld [vmem:[%s5852_s12 + $0x20] sm:$0xff] }
 0x3a2   : > { %v4202_v60 = vpop.f32.mrf.mxu0 }
 0x3a3   : > { %2148 = vrot.lane.b32.xlu1 %v5803_v38, %s5143_s30 }
 0x3a4   : > { %v4203_v8 = vpop.f32.mrf.mxu0 }
 0x3a5   : > { %v5807_v11 = vadd.f32 %v4203_v8, %v4202_v60 }
 0x3a6   : > { %v4205_v20 = vpop.f32.mrf.mxu0 }
 0x3a7   : > { %2150 = vrot.lane.b32.xlu0 %v5807_v11, %s5143_s30 }
 0x3a8   : > { %v4206_v23 = vpop.f32.mrf.mxu0 }
 0x3a9   : > { %v5811_v53 = vadd.f32 %v4206_v23, %v4205_v20  ;;  %v2094_v23 = vld [vmem:[%s5852_s12 + $0x28] sm:$0xff] }
 0x3aa   : > { %v4208_v56 = vpop.f32.mrf.mxu0 }
 0x3ab   : > { %2152 = vrot.lane.b32.xlu1 %v5811_v53, %s5143_s30 }
 0x3ac   : > { %v4209_v55 = vpop.f32.mrf.mxu0 }
 0x3ad   : > { %v5815_v54 = vadd.f32 %v4209_v55, %v4208_v56  ;;  %v2126_v56 = vmul.f32 %v5799_v51, %v2093_v18  ;;  %v2113_v51 = vld [vmem:[%s5848_s21 + $0x38] sm:$0xff]  ;;  %v2118_v18 = vld [vmem:[%s5848_s21 + $0x60] sm:$0xff] }
 0x3ae   : > { %v4211_v63 = vpop.f32.mrf.mxu0 }
 0x3af   : > { %2154 = vrot.lane.b32.xlu0 %v5815_v54, %s5143_s30 }
 0x3b0   : > { %v4212_v57 = vpop.f32.mrf.mxu0 }
 0x3b1   : > { %v5819_v61 = vadd.f32 %v4212_v57, %v4211_v63  ;;  %v2127_v63 = vmul.f32 %v5803_v38, %v2094_v23 }
 0x3b2   : > { %v4214_v59 = vpop.f32.mrf.mxu0 }
 0x3b3   : > { %2156 = vrot.lane.b32.xlu1 %v5819_v61, %s5143_s30 }
 0x3b4   : > { %v4215_v62 = vpop.f32.mrf.mxu0 }
 0x3b5   : > { %v5823_v0 = vadd.f32 %v4215_v62, %v4214_v59  ;;  %v2112_v62 = vld [vmem:[%s5848_s21 + $0x30] sm:$0xff] }
 0x3b6   : > { %v4217_v1 = vpop.f32.mrf.mxu0 }
 0x3b7   : > { %2158 = vrot.lane.b32.xlu0 %v5823_v0, %s5143_s30 }
 0x3b8   : > { %v4218_v6 = vpop.f32.mrf.mxu0 }
 0x3b9   : > { %v5827_v2 = vadd.f32 %v4218_v6, %v4217_v1  ;;  %v2095_v6 = vld [vmem:[%s5852_s12 + $0x30] sm:$0xff] }
 0x3ba   : > { %v4220_v7 = vpop.f32.mrf.mxu0 }
 0x3bb   : > { %2160 = vrot.lane.b32.xlu1 %v5827_v2, %s5143_s30 }
 0x3bc   : > { %v4221_v5 = vpop.f32.mrf.mxu0 }
 0x3bd   : > { %v5831_v9 = vadd.f32 %v4221_v5, %v4220_v7 }
 0x3be   : > { %v4223_v10 = vpop.f32.mrf.mxu0 }
 0x3bf   : > { %2162 = vrot.lane.b32.xlu0 %v5831_v9, %s5143_s30 }
 0x3c0   : > { %v4224_v21 = vpop.f32.mrf.mxu0 }
 0x3c1   : > { %v5835_v12 = vadd.f32 %v4224_v21, %v4223_v10 }
 0x3c2   : > { %v4226_v4 = vpop.f32.mrf.mxu0 }
 0x3c3   : > { %2164 = vrot.lane.b32.xlu1 %v5835_v12, %s5143_s30 }
 0x3c4   : > { %v4227_v13 = vpop.f32.mrf.mxu0 }
 0x3c5   : > { %v5839_v15 = vadd.f32 %v4227_v13, %v4226_v4  ;;  %v2096_v4 = vld [vmem:[%s5852_s12 + $0x38] sm:$0xff]  ;;  %v2128_v13 = vmul.f32 %v5807_v11, %v2095_v6  ;;  %v2115_v11 = vld [vmem:[%s5848_s21 + $0x48] sm:$0xff]  ;;  %v2103_v6 = vld [vmem:[%s5852_s12 + $0x70] sm:$0xff] }
 0x3c6   : > { %v4229_v16 = vpop.f32.mrf.mxu0 }
 0x3c7   : > { %2166 = vrot.lane.b32.xlu0 %v5839_v15, %s5143_s30 }
 0x3c8   : > { %v4230_v19 = vpop.f32.mrf.mxu0 }
 0x3c9   : > { %v5843_v22 = vadd.f32 %v4230_v19, %v4229_v16  ;;  %v2129_v19 = vmul.f32 %v5811_v53, %v2096_v4  ;;  %v2104_v4 = vld [vmem:[%s5852_s12 + $0x78] sm:$0xff] }
 0x3cb   : > { %2168 = vrot.lane.b32.xlu1 %v5843_v22, %s5143_s30 }
 0x401   : > { %v2139_v25 = vpop.permute.xlu0 %2138 }
 0x402   : > { %v2170_v30 = vmul.f32 %v2139_v25, %v2106_v28  ;;  %v2114_v25 = vld [vmem:[%s5848_s21 + $0x40] sm:$0xff] }
 0x404   : > { %v2186_v24 = vadd.f32 %v2170_v30, %v2122_v17 }
 0x405   : > { %v2141_v26 = vpop.permute.xlu0 %2140 }
 0x406   : > { %v2171_v29 = vmul.f32 %v2141_v26, %v2107_v40  ;;  %v2202_v36 = vmul.f32 0.088388346, %v2186_v24  ;;  %v2098_v24 = vld [vmem:[%s5852_s12 + $0x48] sm:$0xff] }
 0x408   : > { %v2187_v31 = vadd.f32 %v2171_v29, %v2123_v27  ;;  %v2130_v29 = vmul.f32 %v5815_v54, %v2097_v14  ;;  %v2117_v54 = vld [vmem:[%s5848_s21 + $0x58] sm:$0xff]  ;;  %v2467_v14 = vlaneseq }
 0x409   : > { %v2143_v34 = vpop.permute.xlu1 %2142 }
 0x40a   : > { %v2203_v49 = vmul.f32 0.088388346, %v2187_v31  ;;  %v2172_v37 = vmul.f32 %v2143_v34, %v2108_v32  ;;  %v2131_v31 = vmul.f32 %v5819_v61, %v2098_v24 }
 0x40c   : > { %v2218_v58 = vpack.c.bf16 %v2203_v49, %v2202_v36  ;;  %v2188_v48 = vadd.f32 %v2172_v37, %v2124_v41  ;;  %v2116_v36 = vld [vmem:[%s5848_s21 + $0x50] sm:$0xff] }
 0x40d   : > { %v2145_v45 = vpop.permute.xlu1 %2144  ;;  %v2099_v37 = vld [vmem:[%s5852_s12 + $0x50] sm:$0xff] }
 0x40e   : > { %v2173_v47 = vmul.f32 %v2145_v45, %v2109_v43  ;;  %4248 = vmatprep.mubr.bf16.mxu1 %v2218_v58  ;;  %v2204_v60 = vmul.f32 0.088388346, %v2188_v48  ;;  %v2100_v45 = vld [vmem:[%s5852_s12 + $0x58] sm:$0xff] }
 0x40f   : > { %4249 = vmatmul.mubr.bf16.vlgmr.msra.gmra.mxu1 %v2218_v58 }
 0x410   : > { %v2189_v3 = vadd.f32 %v2173_v47, %v2125_v44  ;;  %v2132_v44 = vmul.f32 %v5823_v0, %v2099_v37  ;;  %v2133_v47 = vmul.f32 %v5827_v2, %v2100_v45  ;;  %v2119_v0 = vld [vmem:[%s5848_s21 + $0x68] sm:$0xff] }
 0x411   : > { %v2147_v52 = vpop.permute.xlu0 %2146 }
 0x412   : > { %v2205_v8 = vmul.f32 0.088388346, %v2189_v3  ;;  %v2174_v20 = vmul.f32 %v2147_v52, %v2110_v50 }
 0x414   : > { %v2219_v46 = vpack.c.bf16 %v2205_v8, %v2204_v60  ;;  %v2190_v57 = vadd.f32 %v2174_v20, %v2126_v56  ;;  %v2101_v60 = vld [vmem:[%s5852_s12 + $0x60] sm:$0xff]  ;;  %v2102_v56 = vld [vmem:[%s5852_s12 + $0x68] sm:$0xff]  ;;  %s6287_s12 = scalar_lea.sflag [#allocation8], %s438_s0 }
 0x415   : > { %v2149_v55 = vpop.permute.xlu1 %2148 }
 0x416   : > { %v2175_v59 = vmul.f32 %v2149_v55, %v2111_v39  ;;  %4250 = vmatprep.mubr.bf16.mxu1 %v2219_v46  ;;  %v2206_v5 = vmul.f32 0.088388346, %v2190_v57 }
 0x417   : > { %4251 = vmatmul.mubr.bf16.gmra.mxu1 %v2219_v46  ;;  %v2134_v46 = vmul.f32 %v5831_v9, %v2101_v60  ;;  %v2136_v9 = vmul.f32 %v5839_v15, %v2103_v6  ;;  %v5904_v15 = vstv %s5753_s7 }
 0x418   : > { %v2191_v1 = vadd.f32 %v2175_v59, %v2127_v63  ;;  %v2135_v63 = vmul.f32 %v5835_v12, %v2102_v56  ;;  %v2137_v12 = vmul.f32 %v5843_v22, %v2104_v4 }
 0x419   : > { %v2151_v7 = vpop.permute.xlu0 %2150 }
 0x41a   : > { %v2207_v10 = vmul.f32 0.088388346, %v2191_v1  ;;  %v2176_v21 = vmul.f32 %v2151_v7, %v2112_v62  ;;  %v2120_v62 = vld [vmem:[%s5848_s21 + $0x70] sm:$0xff] }
 0x41c   : > { %v2220_v38 = vpack.c.bf16 %v2207_v10, %v2206_v5  ;;  %v2192_v28 = vadd.f32 %v2176_v21, %v2128_v13 }
 0x41d   : > { %v2153_v16 = vpop.permute.xlu1 %2152 }
 0x41e   : > { %v2177_v35 = vmul.f32 %v2153_v16, %v2113_v51  ;;  %4252 = vmatprep.mubr.bf16.mxu1 %v2220_v38  ;;  %v2208_v17 = vmul.f32 0.088388346, %v2192_v28  ;;  %v2121_v51 = vld [vmem:[%s5848_s21 + $0x78] sm:$0xff]  ;;  %s6280_s21 = scalar_lea.hbm %s6482_s22, %s3621_s25 }
 0x41f   : > { %4253 = vmatmul.mubr.bf16.gmra.mxu1 %v2220_v38 }
 0x420   : > { %v2193_v30 = vadd.f32 %v2177_v35, %v2129_v19 }
 0x421   : > { %v2155_v40 = vpop.permute.xlu0 %2154 }
 0x422   : > { %v2209_v26 = vmul.f32 0.088388346, %v2193_v30  ;;  %v2178_v27 = vmul.f32 %v2155_v40, %v2114_v25  ;;  %v5901_v40 = vshrl.u32 %v2467_v14, 7 }
 0x424   : > { %v2221_v53 = vpack.c.bf16 %v2209_v26, %v2208_v17  ;;  %v2194_v33 = vadd.f32 %v2178_v27, %v2130_v29  ;;  %v2485_v17 = vadd.s32 %v5904_v15, %v5901_v40  ;;  %v2469_v22 = vadd.s32 8, %v5901_v40 }
 0x425   : > { %v2157_v32 = vpop.permute.xlu1 %2156  ;;  %v2470_v24 = vadd.s32 16, %v5901_v40  ;;  %v5914_v29 = vand.u32 127, %v2467_v14  ;;  %v2472_v37 = vadd.s32 32, %v5901_v40  ;;  %v2474_v60 = vadd.s32 48, %v5901_v40 }
 0x426   : > { %v2179_v34 = vmul.f32 %v2157_v32, %v2115_v11  ;;  %4254 = vmatprep.mubr.bf16.mxu1 %v2221_v53  ;;  %v2210_v43 = vmul.f32 0.088388346, %v2194_v33  ;;  %v2504_v26 = vadd.s32 1, %v2485_v17  ;;  %v2486_v27 = vadd.s32 %v5904_v15, %v2469_v22 }
 0x427   : > { %4255 = vmatmul.mubr.bf16.gmra.mxu1 %v2221_v53  ;;  %v5912_v11 = vstv %s2520_s24  ;;  %v2487_v32 = vadd.s32 %v5904_v15, %v2470_v24  ;;  %v5920_v33 = vadd.s32 128, %v5914_v29  ;;  %v2489_v45 = vadd.s32 %v5904_v15, %v2472_v37  ;;  %s5144_s24 = smov [#allocation17]  }
 0x428   : > { %v2195_v49 = vadd.f32 %v2179_v34, %v2131_v31  ;;  %vm2522_vm0 = vcmp.lt.s32.totalorder %v2504_v26, %v5912_v11  ;;  %v2505_v53 = vadd.s32 1, %v2486_v27  ;;  %v2471_v31 = vadd.s32 24, %v5901_v40  ;;  %s4955_s10 = sshll.u32 %s5144_s24, 4  ;;  %s4956_s10 = int_to_ptr.vmem [resolvable:$false] %s4955_s10 }
 0x429   : > { %v2159_v42 = vpop.permute.xlu0 %2158  ;;  %v2523_v34 = vsel %vm2522_vm0, %v2504_v26, %v5912_v11  ;;  %s4957_s15 = scalar_lea.vmem %s4956_s10, 2048  ;;  %p4958_p1 = scmp.lt.s32.totalorder %s6282_s27, %s4956_s10 }
 0x42a   : > { %v2211_v41 = vmul.f32 0.088388346, %v2195_v49  ;;  %v2180_v58 = vmul.f32 %v2159_v42, %v2116_v36  ;;  %vm2524_vm1 = vcmp.lt.s32.totalorder %v2505_v53, %v5912_v11  ;;  %v2506_v36 = vadd.s32 1, %v2487_v32  ;;  %p4959_p4 = scmp.lt.s32.totalorder %s4957_s15, %s4951_s2 }
 0x42b   : > { %v2488_v49 = vadd.s32 %v5904_v15, %v2471_v31  ;;  %vm2554_vm2 = vcmp.ge.s32.totalorder %v5914_v29, %v2523_v34  ;;  %vm2555_vm3 = vcmp.ge.s32.totalorder %v5920_v33, %v2523_v34 }
 0x42c   : > { %v2222_v61 = vpack.c.bf16 %v2211_v41, %v2210_v43  ;;  %v2196_v50 = vadd.f32 %v2180_v58, %v2132_v44  ;;  %v2525_v43 = vsel %vm2524_vm1, %v2505_v53, %v5912_v11  ;;  %vm2526_vm4 = vcmp.lt.s32.totalorder %v2506_v36, %v5912_v11  ;;  %p4960_p2 = por %p4959_p4, %p4958_p1 }
 0x42d   : > { %v2161_v48 = vpop.permute.xlu1 %2160  ;;  %v2507_v58 = vadd.s32 1, %v2488_v49  ;;  %vm2556_vm5 = vcmp.ge.s32.totalorder %v5914_v29, %v2525_v43  ;;  %vm2557_vm6 = vcmp.ge.s32.totalorder %v5920_v33, %v2525_v43 }
 0x42e   : > { %v2181_v3 = vmul.f32 %v2161_v48, %v2117_v54  ;;  %4256 = vmatprep.mubr.bf16.mxu1 %v2222_v61  ;;  %v2212_v20 = vmul.f32 0.088388346, %v2196_v50  ;;  %v2473_v54 = vadd.s32 40, %v5901_v40  ;;  %v2527_v50 = vsel %vm2526_vm4, %v2506_v36, %v5912_v11  ;;  %p4961_p10 = pnand %p4960_p2, %p4954_p8 }
 0x42f   : > { %4257 = vmatmul.mubr.bf16.gmra.mxu1 %v2222_v61  ;;  %vm2528_vm7 = vcmp.lt.s32.totalorder %v2507_v58, %v5912_v11  ;;  %vm2558_vm8 = vcmp.ge.s32.totalorder %v5914_v29, %v2527_v50  ;;  %vm2559_vm9 = vcmp.ge.s32.totalorder %v5920_v33, %v2527_v50 }
 0x430   : > { %v2197_v52 = vadd.f32 %v2181_v3, %v2133_v47  ;;  %v2529_v56 = vsel %vm2528_vm7, %v2507_v58, %v5912_v11 }
 0x431   : > { %v2163_v8 = vpop.permute.xlu0 %2162  ;;  %vm2560_vm11 = vcmp.ge.s32.totalorder %v5914_v29, %v2529_v56  ;;  %vm2561_vm12 = vcmp.ge.s32.totalorder %v5920_v33, %v2529_v56 }
 0x432   : > { %v2213_v23 = vmul.f32 0.088388346, %v2197_v52  ;;  %v2182_v39 = vmul.f32 %v2163_v8, %v2118_v18  ;;  %v2508_v18 = vadd.s32 1, %v2489_v45  ;;  %v2490_v52 = vadd.s32 %v5904_v15, %v2473_v54 }
 0x433   : > { %v2480_v45 = vadd.s32 96, %v5901_v40 }
 0x434   : > { %v2223_v2 = vpack.c.bf16 %v2213_v23, %v2212_v20  ;;  %v2198_v57 = vadd.f32 %v2182_v39, %v2134_v46  ;;  %vm2530_vm10 = vcmp.lt.s32.totalorder %v2508_v18, %v5912_v11  ;;  %v2509_v46 = vadd.s32 1, %v2490_v52 }
 0x435   : > { %v2165_v55 = vpop.permute.xlu1 %2164 }
 0x436   : > { %v2183_v59 = vmul.f32 %v2165_v55, %v2119_v0  ;;  %4258 = vmatprep.mubr.bf16.mxu1 %v2223_v2  ;;  %v2214_v5 = vmul.f32 0.088388346, %v2198_v57  ;;  %v2475_v55 = vadd.s32 56, %v5901_v40  ;;  %vm2532_vm13 = vcmp.lt.s32.totalorder %v2509_v46, %v5912_v11 }
 0x437   : > { %4259 = vmatmul.mubr.bf16.gmra.mxu1 %v2223_v2  ;;  %v2491_v2 = vadd.s32 %v5904_v15, %v2474_v60  ;;  %v2497_v60 = vadd.s32 %v5904_v15, %v2480_v45 }
 0x438   : > { %v2199_v1 = vadd.f32 %v2183_v59, %v2135_v63 }
 0x439   : > { %v2167_v7 = vpop.permute.xlu0 %2166 }
 0x43a   : > { %v2215_v10 = vmul.f32 0.088388346, %v2199_v1  ;;  %v2184_v21 = vmul.f32 %v2167_v7, %v2120_v62  ;;  %v2531_v1 = vsel %vm2530_vm10, %v2508_v18, %v5912_v11  ;;  %v2510_v7 = vadd.s32 1, %v2491_v2 }
 0x43b   : > { %vm2562_vm14 = vcmp.ge.s32.totalorder %v5914_v29, %v2531_v1  ;;  %vm2563_vm15 = vcmp.ge.s32.totalorder %v5920_v33, %v2531_v1  ;;  %v2478_v18 = vadd.s32 80, %v5901_v40 }
 0x43c   : > { %v2224_v13 = vpack.c.bf16 %v2215_v10, %v2214_v5  ;;  %v2200_v16 = vadd.f32 %v2184_v21, %v2136_v9  ;;  %v2492_v5 = vadd.s32 %v5904_v15, %v2475_v55  ;;  %v2476_v10 = vadd.s32 64, %v5901_v40 }
 0x43d   : > { %v2169_v38 = vpop.permute.xlu1 %2168  ;;  %vm2534_vm0 = vcmp.lt.s32.totalorder %v2510_v7, %v5912_v11  ;;  %v2495_v2 = vadd.s32 %v5904_v15, %v2478_v18  ;;  %v2479_v55 = vadd.s32 88, %v5901_v40 }
 0x43e   : > { %v2185_v19 = vmul.f32 %v2169_v38, %v2121_v51  ;;  %4260 = vmatprep.mubr.bf16.mxu1 %v2224_v13  ;;  %v2216_v35 = vmul.f32 0.088388346, %v2200_v16  ;;  %v2493_v16 = vadd.s32 %v5904_v15, %v2476_v10  ;;  %v2535_v14 = vsel %vm2534_vm0, %v2510_v7, %v5912_v11 }
 0x43f   : > { %4261 = vmatmul.mubr.bf16.gmra.mxu1 %v2224_v13  ;;  %v2533_v13 = vsel %vm2532_vm13, %v2509_v46, %v5912_v11  ;;  %vm2566_vm4 = vcmp.ge.s32.totalorder %v5914_v29, %v2535_v14 }
 0x440   : > { %v2201_v28 = vadd.f32 %v2185_v19, %v2137_v12  ;;  %v2511_v12 = vadd.s32 1, %v2492_v5  ;;  %v2477_v19 = vadd.s32 72, %v5901_v40  ;;  %vm2564_vm1 = vcmp.ge.s32.totalorder %v5914_v29, %v2533_v13 }
 0x441   : > { %v2512_v22 = vadd.s32 1, %v2493_v16 }
 0x442   : > { %v2217_v25 = vmul.f32 0.088388346, %v2201_v28  ;;  %v2494_v26 = vadd.s32 %v5904_v15, %v2477_v19  ;;  %v2483_v19 = vadd.s32 120, %v5901_v40 }
 0x444   : > { %v2225_v30 = vpack.c.bf16 %v2217_v25, %v2216_v35  ;;  %v2513_v36 = vadd.s32 1, %v2494_v26  ;;  %v2500_v26 = vadd.s32 %v5904_v15, %v2483_v19  ;;  %v4672_v19 = vld [vmem:[#allocation3 + $0x28] sm:$0xff]  }
 0x446   : > { %4262 = vmatprep.mubr.bf16.mxu1 %v2225_v30 }
 0x447   : > { %4263 = vmatmul.mubr.bf16.gmra.mxu1 %v2225_v30 }
 0x4cf   : > { %v2388_v42 = vpop.f32.mrf.mxu1 }
 0x4d0   : > { %v5932_v44 = vsel %vm2554_vm2, -3.4028235e+38, %v2388_v42  ;;  %vm2565_vm2 = vcmp.ge.s32.totalorder %v5920_v33, %v2533_v13  ;;  %v2496_v13 = vadd.s32 %v5904_v15, %v2479_v55 }
 0x4d1   : > { %v2390_v41 = vpop.f32.mrf.mxu1 }
 0x4d2   : > { %v5934_v61 = vsel %vm2555_vm3, -3.4028235e+38, %v2390_v41  ;;  %vm2536_vm3 = vcmp.lt.s32.totalorder %v2511_v12, %v5912_v11 }
 0x4d3   : > { %v2392_v48 = vpop.f32.mrf.mxu1  ;;  %v2618_v47 = vmax.f32 %v5932_v44, %v5934_v61  ;;  %v2537_v31 = vsel %vm2536_vm3, %v2511_v12, %v5912_v11 }
 0x4d4   : > { %v5944_v8 = vsel %vm2556_vm5, -3.4028235e+38, %v2392_v48  ;;  %vm2567_vm5 = vcmp.ge.s32.totalorder %v5920_v33, %v2535_v14  ;;  %vm2568_vm7 = vcmp.ge.s32.totalorder %v5914_v29, %v2537_v31 }
 0x4d5   : > { %2619 = vmax.xlane.f32.xlu0 %v2618_v47  ;;  %v2394_v3 = vpop.f32.mrf.mxu1 }
 0x4d6   : > { %v5946_v20 = vsel %vm2557_vm6, -3.4028235e+38, %v2394_v3  ;;  %vm2538_vm6 = vcmp.lt.s32.totalorder %v2512_v22, %v5912_v11 }
 0x4d7   : > { %v2398_v23 = vpop.f32.mrf.mxu1  ;;  %v2621_v39 = vmax.f32 %v5944_v8, %v5946_v20  ;;  %v2539_v41 = vsel %vm2538_vm6, %v2512_v22, %v5912_v11 }
 0x4d8   : > { %v5956_v63 = vsel %vm2558_vm8, -3.4028235e+38, %v2398_v23  ;;  %vm2569_vm8 = vcmp.ge.s32.totalorder %v5920_v33, %v2537_v31  ;;  %vm2570_vm10 = vcmp.ge.s32.totalorder %v5914_v29, %v2539_v41  ;;  %v2481_v23 = vadd.s32 104, %v5901_v40 }
 0x4d9   : > { %2622 = vmax.xlane.f32.xlu1 %v2621_v39  ;;  %v2400_v0 = vpop.f32.mrf.mxu1 }
 0x4da   : > { %v5958_v57 = vsel %vm2559_vm9, -3.4028235e+38, %v2400_v0  ;;  %vm2540_vm9 = vcmp.lt.s32.totalorder %v2513_v36, %v5912_v11  ;;  %v2498_v1 = vadd.s32 %v5904_v15, %v2481_v23 }
 0x4db   : > { %v2402_v59 = vpop.f32.mrf.mxu1  ;;  %v2624_v62 = vmax.f32 %v5956_v63, %v5958_v57  ;;  %v2541_v3 = vsel %vm2540_vm9, %v2513_v36, %v5912_v11 }
 0x4dc   : > { %v5968_v21 = vsel %vm2560_vm11, -3.4028235e+38, %v2402_v59  ;;  %vm2571_vm11 = vcmp.ge.s32.totalorder %v5920_v33, %v2539_v41  ;;  %vm2573_vm13 = vcmp.ge.s32.totalorder %v5920_v33, %v2541_v3  ;;  %v2517_v12 = vadd.s32 1, %v2498_v1 }
 0x4dd   : > { %2625 = vmax.xlane.f32.xlu0 %v2624_v62  ;;  %v2404_v6 = vpop.f32.mrf.mxu1  ;;  %v2516_v62 = vadd.s32 1, %v2497_v60 }
 0x4de   : > { %v5970_v4 = vsel %vm2561_vm12, -3.4028235e+38, %v2404_v6  ;;  %vm2572_vm12 = vcmp.ge.s32.totalorder %v5914_v29, %v2541_v3  ;;  %v2482_v6 = vadd.s32 112, %v5901_v40  ;;  %vm2548_vm0 = vcmp.lt.s32.totalorder %v2517_v12, %v5912_v11 }
 0x4df   : > { %v2408_v51 = vpop.f32.mrf.mxu1  ;;  %v2627_v9 = vmax.f32 %v5968_v21, %v5970_v4  ;;  %v2549_v40 = vsel %vm2548_vm0, %v2517_v12, %v5912_v11  ;;  %v4669_v12 = vld [vmem:[#allocation3 + $0x70] sm:$0xff]  }
 0x4e0   : > { %v5980_v28 = vsel %vm2562_vm14, -3.4028235e+38, %v2408_v51  ;;  %vm2546_vm14 = vcmp.lt.s32.totalorder %v2516_v62, %v5912_v11  ;;  %v2499_v16 = vadd.s32 %v5904_v15, %v2482_v6 }
 0x4e1   : > { %2628 = vmax.xlane.f32.xlu0 %v2627_v9  ;;  %v2410_v38 = vpop.f32.mrf.mxu1  ;;  %v2514_v9 = vadd.s32 1, %v2495_v2  ;;  %v2547_v14 = vsel %vm2546_vm14, %v2516_v62, %v5912_v11 }
 0x4e2   : > { %v5982_v35 = vsel %vm2563_vm15, -3.4028235e+38, %v2410_v38  ;;  %v2518_v22 = vadd.s32 1, %v2499_v16  ;;  %v4670_v16 = vld [vmem:[#allocation3 + $0x30] sm:$0xff]  }
 0x4e3   : > { %v2412_v25 = vpop.f32.mrf.mxu1  ;;  %v2630_v30 = vmax.f32 %v5980_v28, %v5982_v35  ;;  %vm2542_vm15 = vcmp.lt.s32.totalorder %v2514_v9, %v5912_v11 }
 0x4e4   : > { %v5991_v27 = vsel %vm2564_vm1, -3.4028235e+38, %v2412_v25  ;;  %vm2578_vm1 = vcmp.ge.s32.totalorder %v5914_v29, %v2547_v14 }
 0x4e5   : > { %2631 = vmax.xlane.f32.xlu1 %v2630_v30  ;;  %v2414_v17 = vpop.f32.mrf.mxu1  ;;  %v2515_v30 = vadd.s32 1, %v2496_v13 }
 0x4e6   : > { %v5993_v24 = vsel %vm2565_vm2, -3.4028235e+38, %v2414_v17  ;;  %vm2579_vm2 = vcmp.ge.s32.totalorder %v5920_v33, %v2547_v14 }
 0x4e7   : > { %v2418_v53 = vpop.f32.mrf.mxu1  ;;  %v2633_v32 = vmax.f32 %v5991_v27, %v5993_v24  ;;  %vm2544_vm3 = vcmp.lt.s32.totalorder %v2515_v30, %v5912_v11 }
 0x4e8   : > { %v6001_v49 = vsel %vm2566_vm4, -3.4028235e+38, %v2418_v53  ;;  %v2543_v53 = vsel %vm2542_vm15, %v2514_v9, %v5912_v11 }
 0x4e9   : > { %2634 = vmax.xlane.f32.xlu0 %v2633_v32  ;;  %v2420_v34 = vpop.f32.mrf.mxu1  ;;  %vm2575_vm4 = vcmp.ge.s32.totalorder %v5920_v33, %v2543_v53  ;;  %vm2574_vm6 = vcmp.ge.s32.totalorder %v5914_v29, %v2543_v53 }
 0x4ea   : > { %v6003_v37 = vsel %vm2567_vm5, -3.4028235e+38, %v2420_v34  ;;  %vm2550_vm5 = vcmp.lt.s32.totalorder %v2518_v22, %v5912_v11  ;;  %v2519_v34 = vadd.s32 1, %v2500_v26 }
 0x4eb   : > { %v2422_v42 = vpop.f32.mrf.mxu1  ;;  %v2636_v43 = vmax.f32 %v6001_v49, %v6003_v37  ;;  %v2551_v45 = vsel %vm2550_vm5, %v2518_v22, %v5912_v11 }
 0x4ec   : > { %v6012_v54 = vsel %vm2568_vm7, -3.4028235e+38, %v2422_v42  ;;  %v2545_v42 = vsel %vm2544_vm3, %v2515_v30, %v5912_v11  ;;  %vm2580_vm7 = vcmp.ge.s32.totalorder %v5914_v29, %v2549_v40  ;;  %v4674_v30 = vld [vmem:[#allocation3 + $0x20] sm:$0xff]  }
 0x4ed   : > { %2637 = vmax.xlane.f32.xlu1 %v2636_v43  ;;  %v2424_v58 = vpop.f32.mrf.mxu1  ;;  %vm2577_vm9 = vcmp.ge.s32.totalorder %v5920_v33, %v2545_v42 }
 0x4ee   : > { %v6014_v48 = vsel %vm2569_vm8, -3.4028235e+38, %v2424_v58  ;;  %vm2581_vm8 = vcmp.ge.s32.totalorder %v5920_v33, %v2549_v40 }
 0x4ef   : > { %v2428_v47 = vpop.f32.mrf.mxu1  ;;  %v2639_v50 = vmax.f32 %v6012_v54, %v6014_v48 }
 0x4f0   : > { %v6024_v39 = vsel %vm2570_vm10, -3.4028235e+38, %v2428_v47  ;;  %vm2552_vm10 = vcmp.lt.s32.totalorder %v2519_v34, %v5912_v11 }
 0x4f1   : > { %2640 = vmax.xlane.f32.xlu0 %v2639_v50  ;;  %v2430_v52 = vpop.f32.mrf.mxu1 }
 0x4f2   : > { %v6026_v56 = vsel %vm2571_vm11, -3.4028235e+38, %v2430_v52  ;;  %vm2576_vm11 = vcmp.ge.s32.totalorder %v5914_v29, %v2545_v42 }
 0x4f3   : > { %v2432_v0 = vpop.f32.mrf.mxu1  ;;  %v2642_v46 = vmax.f32 %v6024_v39, %v6026_v56 }
 0x4f4   : > { %v6036_v7 = vsel %vm2572_vm12, -3.4028235e+38, %v2432_v0  ;;  %vm2582_vm12 = vcmp.ge.s32.totalorder %v5914_v29, %v2551_v45 }
 0x4f5   : > { %2643 = vmax.xlane.f32.xlu1 %v2642_v46  ;;  %v2434_v59 = vpop.f32.mrf.mxu1  ;;  %v2553_v46 = vsel %vm2552_vm10, %v2519_v34, %v5912_v11 }
 0x4f6   : > { %v6038_v5 = vsel %vm2573_vm13, -3.4028235e+38, %v2434_v59  ;;  %vm2583_vm13 = vcmp.ge.s32.totalorder %v5920_v33, %v2551_v45  ;;  %vm2584_vm14 = vcmp.ge.s32.totalorder %v5914_v29, %v2553_v46  ;;  %vm2585_vm15 = vcmp.ge.s32.totalorder %v5920_v33, %v2553_v46  ;;  %v4667_v29 = vld [vmem:[#allocation3 + $0x78] sm:$0xff]   ;;  %v4671_v33 = vld [vmem:[#allocation3 + $0x68] sm:$0xff]  }
 0x4f7   : > { %v2438_v10 = vpop.f32.mrf.mxu1  ;;  %v2645_v51 = vmax.f32 %v6036_v7, %v6038_v5  ;;  %4264 = vmatprep.subr.bf16.mxu0 %v4667_v29  ;;  %4328 = vmatprep.subr.bf16.mxu1 %v4667_v29 }
 0x4f8   : > { %v6072_v50 = vsel %vm2574_vm6, -3.4028235e+38, %v2438_v10 }
 0x4f9   : > { %2646 = vmax.xlane.f32.xlu0 %v2645_v51  ;;  %v2440_v38 = vpop.f32.mrf.mxu1 }
 0x4fa   : > { %v6067_v58 = vsel %vm2575_vm4, -3.4028235e+38, %v2440_v38  ;;  %v4668_v38 = vld [vmem:[#allocation3 + $0x38] sm:$0xff]  }
 0x4fb   : > { %v2442_v25 = vpop.f32.mrf.mxu1  ;;  %v2648_v60 = vmax.f32 %v6072_v50, %v6067_v58  ;;  %4265 = vmatpush3.bf16.msra.mxu0 %v4668_v38  ;;  %4336 = vmatpush3.bf16.msra.mxu1 %v4668_v38 }
 0x4fc   : > { %v6088_v55 = vsel %vm2576_vm11, -3.4028235e+38, %v2442_v25  ;;  %4266 = vmatprep.subr.bf16.mxu0 %v4669_v12  ;;  %4329 = vmatprep.subr.bf16.mxu1 %v4669_v12  ;;  %v4673_v25 = vld [vmem:[#allocation3 + $0x60] sm:$0xff]  }
 0x4fd   : > { %v2444_v17 = vpop.f32.mrf.mxu1 }
 0x4fe   : > { %v6085_v0 = vsel %vm2577_vm9, -3.4028235e+38, %v2444_v17 }
 0x4ff   : > { %v2448_v32 = vpop.f32.mrf.mxu1  ;;  %v2651_v6 = vmax.f32 %v6088_v55, %v6085_v0  ;;  %4267 = vmatpush3.bf16.msra.mxu0 %v4670_v16  ;;  %4337 = vmatpush3.bf16.msra.mxu1 %v4670_v16 }
 0x500   : > { %v6058_v15 = vsel %vm2578_vm1, -3.4028235e+38, %v2448_v32  ;;  %4268 = vmatprep.subr.bf16.mxu0 %v4671_v33  ;;  %4330 = vmatprep.subr.bf16.mxu1 %v4671_v33 }
 0x501   : > { %v2450_v31 = vpop.f32.mrf.mxu1 }
 0x502   : > { %v6060_v36 = vsel %vm2579_vm2, -3.4028235e+38, %v2450_v31 }
 0x503   : > { %v2452_v43 = vpop.f32.mrf.mxu1  ;;  %v2654_v41 = vmax.f32 %v6058_v15, %v6060_v36  ;;  %4269 = vmatpush3.bf16.msra.mxu0 %v4672_v19  ;;  %4338 = vmatpush3.bf16.msra.mxu1 %v4672_v19 }
 0x504   : > { %v6075_v3 = vsel %vm2580_vm7, -3.4028235e+38, %v2452_v43  ;;  %4270 = vmatprep.subr.bf16.mxu0 %v4673_v25  ;;  %4331 = vmatprep.subr.bf16.mxu1 %v4673_v25 }
 0x505   : > { %2655 = vmax.xlane.f32.xlu1 %v2654_v41  ;;  %v2454_v47 = vpop.f32.mrf.mxu1 }
 0x506   : > { %v6077_v18 = vsel %vm2581_vm8, -3.4028235e+38, %v2454_v47 }
 0x507   : > { %v2458_v52 = vpop.f32.mrf.mxu1  ;;  %v2657_v23 = vmax.f32 %v6075_v3, %v6077_v18  ;;  %4271 = vmatpush3.bf16.msra.mxu0 %v4674_v30  ;;  %4339 = vmatpush3.bf16.msra.mxu1 %v4674_v30 }
 0x508   : > { %v6090_v59 = vsel %vm2582_vm12, -3.4028235e+38, %v2458_v52 }
 0x509   : > { %2649 = vmax.xlane.f32.xlu1 %v2648_v60  ;;  %2658 = vmax.xlane.f32.xlu0 %v2657_v23  ;;  %v2460_v2 = vpop.f32.mrf.mxu1 }
 0x50a   : > { %v6092_v62 = vsel %vm2583_vm13, -3.4028235e+38, %v2460_v2 }
 0x50b   : > { %v2462_v1 = vpop.f32.mrf.mxu1  ;;  %v2660_v10 = vmax.f32 %v6090_v59, %v6092_v62 }
 0x50c   : > { %v6100_v51 = vsel %vm2584_vm14, -3.4028235e+38, %v2462_v1 }
 0x50d   : > { %2652 = vmax.xlane.f32.xlu0 %v2651_v6  ;;  %2661 = vmax.xlane.f32.xlu1 %v2660_v10  ;;  %v2464_v11 = vpop.f32.mrf.mxu1 }
 0x50e   : > { %v6102_v9 = vsel %vm2585_vm15, -3.4028235e+38, %v2464_v11 }
 0x50f   : > { %v2663_v13 = vmax.f32 %v6100_v51, %v6102_v9 }
 0x511   : > { %2664 = vmax.xlane.f32.xlu0 %v2663_v13 }
 0x55e   : > { %v2620_v14 = vpop.xlane.xlu0 %2619 }
 0x55f   : > { %v2666_v17 = vsub.f32 %v5932_v44, %v2620_v14  ;;  %v2667_v22 = vsub.f32 %v5934_v61, %v2620_v14 }
 0x561   : > { %v2698_v26 = vmul.f32 1.442695, %v2666_v17  ;;  %v2700_v53 = vmul.f32 1.442695, %v2667_v22 }
 0x562   : > { %v2623_v32 = vpop.xlane.xlu1 %2622 }
 0x563   : > { %4683 = vpow2.f32 %v2698_v26  ;;  %v2668_v40 = vsub.f32 %v5944_v8, %v2623_v32  ;;  %v2669_v31 = vsub.f32 %v5946_v20, %v2623_v32 }
 0x564   : > { %4685 = vpow2.f32 %v2700_v53 }
 0x565   : > { %v2702_v34 = vmul.f32 1.442695, %v2668_v40  ;;  %v2704_v42 = vmul.f32 1.442695, %v2669_v31 }
 0x566   : > { %v2626_v43 = vpop.xlane.xlu0 %2625 }
 0x567   : > { %4687 = vpow2.f32 %v2702_v34  ;;  %v2670_v41 = vsub.f32 %v5956_v63, %v2626_v43  ;;  %v2671_v45 = vsub.f32 %v5958_v57, %v2626_v43 }
 0x568   : > { %4689 = vpow2.f32 %v2704_v42 }
 0x569   : > { %v2706_v44 = vmul.f32 1.442695, %v2670_v41  ;;  %v2708_v61 = vmul.f32 1.442695, %v2671_v45 }
 0x56a   : > { %v2629_v47 = vpop.xlane.xlu0 %2628 }
 0x56b   : > { %4691 = vpow2.f32 %v2706_v44  ;;  %v2672_v52 = vsub.f32 %v5968_v21, %v2629_v47  ;;  %v2673_v8 = vsub.f32 %v5970_v4, %v2629_v47  ;;  %v4675_v44 = vld [vmem:[#allocation3 + $0x58] sm:$0xff]  }
 0x56c   : > { %4693 = vpow2.f32 %v2708_v61  ;;  %v4676_v61 = vld [vmem:[#allocation3 + $0x18] sm:$0xff]   ;;  %4272 = vmatprep.subr.bf16.mxu0 %v4675_v44  ;;  %4332 = vmatprep.subr.bf16.mxu1 %v4675_v44 }
 0x56d   : > { %v2710_v20 = vmul.f32 1.442695, %v2672_v52  ;;  %v2712_v60 = vmul.f32 1.442695, %v2673_v8  ;;  %4273 = vmatpush3.bf16.msra.mxu0 %v4676_v61  ;;  %4340 = vmatpush3.bf16.msra.mxu1 %v4676_v61 }
 0x56e   : > { %v2632_v23 = vpop.xlane.xlu1 %2631 }
 0x56f   : > { %4695 = vpow2.f32 %v2710_v20  ;;  %v2674_v46 = vsub.f32 %v5980_v28, %v2632_v23  ;;  %v2675_v63 = vsub.f32 %v5982_v35, %v2632_v23  ;;  %v4677_v23 = vld [vmem:[#allocation3 + $0x50] sm:$0xff]  }
 0x570   : > { %v6116_v2 = vpop.eup %4683  ;;  %4697 = vpow2.f32 %v2712_v60  ;;  %4274 = vmatprep.subr.bf16.mxu0 %v4677_v23  ;;  %4333 = vmatprep.subr.bf16.mxu1 %v4677_v23 }
 0x571   : > { %v6118_v57 = vpop.eup %4685  ;;  %v2714_v1 = vmul.f32 1.442695, %v2674_v46  ;;  %v2716_v6 = vmul.f32 1.442695, %v2675_v63  ;;  %v4678_v63 = vld [vmem:[#allocation3 + $0x10] sm:$0xff]  }
 0x572   : > { %v2635_v10 = vpop.xlane.xlu0 %2634  ;;  %v2762_v21 = vadd.f32 %v6118_v57, %v6116_v2  ;;  %4275 = vmatpush3.bf16.msra.mxu0 %v4678_v63  ;;  %4341 = vmatpush3.bf16.msra.mxu1 %v4678_v63 }
 0x573   : > { %4699 = vpow2.f32 %v2714_v1  ;;  %v2676_v4 = vsub.f32 %v5991_v27, %v2635_v10  ;;  %v2677_v11 = vsub.f32 %v5993_v24, %v2635_v10  ;;  %v4679_v1 = vld [vmem:[#allocation3 + $0x48] sm:$0xff]  }
 0x574   : > { %v6124_v13 = vpop.eup %4687  ;;  %4701 = vpow2.f32 %v2716_v6  ;;  %2763 = vadd.xlane.f32.xlu1 %v2762_v21  ;;  %4276 = vmatprep.subr.bf16.mxu0 %v4679_v1 }
 0x575   : > { %v6126_v28 = vpop.eup %4689  ;;  %v2718_v35 = vmul.f32 1.442695, %v2676_v4  ;;  %v2720_v29 = vmul.f32 1.442695, %v2677_v11  ;;  %v4680_v11 = vld [vmem:[#allocation3 + $0x8] sm:$0xff]   ;;  %4334 = vmatprep.subr.bf16.mxu1 %v4679_v1 }
 0x576   : > { %v2638_v38 = vpop.xlane.xlu1 %2637  ;;  %v2765_v12 = vadd.f32 %v6126_v28, %v6124_v13  ;;  %4277 = vmatpush3.bf16.msra.mxu0 %v4680_v11  ;;  %4342 = vmatpush3.bf16.msra.mxu1 %v4680_v11 }
 0x577   : > { %4703 = vpow2.f32 %v2718_v35  ;;  %v2678_v16 = vsub.f32 %v6001_v49, %v2638_v38  ;;  %v2679_v33 = vsub.f32 %v6003_v37, %v2638_v38  ;;  %v4681_v35 = vld [vmem:[#allocation3 + $0x40] sm:$0xff]  }
 0x578   : > { %v6132_v27 = vpop.eup %4691  ;;  %4705 = vpow2.f32 %v2720_v29  ;;  %2766 = vadd.xlane.f32.xlu0 %v2765_v12  ;;  %4278 = vmatprep.subr.bf16.mxu0 %v4681_v35 }
 0x579   : > { %v6134_v24 = vpop.eup %4693  ;;  %v2722_v19 = vmul.f32 1.442695, %v2678_v16  ;;  %v2724_v25 = vmul.f32 1.442695, %v2679_v33  ;;  %4335 = vmatprep.subr.bf16.mxu1 %v4681_v35 }
 0x57a   : > { %v2641_v30 = vpop.xlane.xlu0 %2640  ;;  %v2768_v14 = vadd.f32 %v6134_v24, %v6132_v27 }
 0x57b   : > { %4707 = vpow2.f32 %v2722_v19  ;;  %v2680_v17 = vsub.f32 %v6012_v54, %v2641_v30  ;;  %v2681_v22 = vsub.f32 %v6014_v48, %v2641_v30 }
 0x57c   : > { %v6140_v49 = vpop.eup %4695  ;;  %4709 = vpow2.f32 %v2724_v25  ;;  %2769 = vadd.xlane.f32.xlu1 %v2768_v14 }
 0x57d   : > { %v6142_v37 = vpop.eup %4697  ;;  %v2726_v26 = vmul.f32 1.442695, %v2680_v17  ;;  %v2728_v53 = vmul.f32 1.442695, %v2681_v22  ;;  %v4682_v17 = vld [vmem:[#allocation3] sm:$0xff]  }
 0x57e   : > { %v2644_v32 = vpop.xlane.xlu1 %2643  ;;  %v2771_v40 = vadd.f32 %v6142_v37, %v6140_v49  ;;  %4279 = vmatpush3.bf16.msra.mxu0 %v4682_v17  ;;  %4343 = vmatpush3.bf16.msra.mxu1 %v4682_v17 }
 0x57f   : > { %4711 = vpow2.f32 %v2726_v26  ;;  %v2682_v31 = vsub.f32 %v6024_v39, %v2644_v32  ;;  %v2683_v34 = vsub.f32 %v6026_v56, %v2644_v32 }
 0x580   : > { %v6148_v54 = vpop.eup %4699  ;;  %4713 = vpow2.f32 %v2728_v53  ;;  %2772 = vadd.xlane.f32.xlu0 %v2771_v40 }
 0x581   : > { %v6150_v48 = vpop.eup %4701  ;;  %v2730_v42 = vmul.f32 1.442695, %v2682_v31  ;;  %v2732_v43 = vmul.f32 1.442695, %v2683_v34 }
 0x582   : > { %v2647_v41 = vpop.xlane.xlu0 %2646  ;;  %v2774_v45 = vadd.f32 %v6150_v48, %v6148_v54 }
 0x583   : > { %4715 = vpow2.f32 %v2730_v42  ;;  %v2684_v47 = vsub.f32 %v6036_v7, %v2647_v41  ;;  %v2685_v39 = vsub.f32 %v6038_v5, %v2647_v41 }
 0x584   : > { %v6156_v56 = vpop.eup %4703  ;;  %4717 = vpow2.f32 %v2732_v43  ;;  %2775 = vadd.xlane.f32.xlu1 %v2774_v45 }
 0x585   : > { %v6158_v52 = vpop.eup %4705  ;;  %v2734_v8 = vmul.f32 1.442695, %v2684_v47  ;;  %v2736_v20 = vmul.f32 1.442695, %v2685_v39 }
 0x586   : > { %v2777_v60 = vadd.f32 %v6158_v52, %v6156_v56 }
 0x587   : > { %4719 = vpow2.f32 %v2734_v8 }
 0x588   : > { %v6162_v7 = vpop.eup %4707  ;;  %4721 = vpow2.f32 %v2736_v20  ;;  %2778 = vadd.xlane.f32.xlu0 %v2777_v60 }
 0x589   : > { %v6164_v5 = vpop.eup %4709 }
 0x58a   : > { %v2780_v46 = vadd.f32 %v6164_v5, %v6162_v7 }
 0x58c   : > { %v6168_v6 = vpop.eup %4711  ;;  %2781 = vadd.xlane.f32.xlu1 %v2780_v46 }
 0x58d   : > { %v6170_v10 = vpop.eup %4713 }
 0x58e   : > { %v2656_v21 = vpop.xlane.xlu1 %2655  ;;  %v2783_v4 = vadd.f32 %v6170_v10, %v6168_v6 }
 0x58f   : > { %v2690_v29 = vsub.f32 %v6058_v15, %v2656_v21  ;;  %v2691_v38 = vsub.f32 %v6060_v36, %v2656_v21 }
 0x590   : > { %v6176_v12 = vpop.eup %4715  ;;  %2784 = vadd.xlane.f32.xlu0 %v2783_v4 }
 0x591   : > { %v6178_v16 = vpop.eup %4717  ;;  %v2746_v33 = vmul.f32 1.442695, %v2690_v29  ;;  %v2748_v19 = vmul.f32 1.442695, %v2691_v38 }
 0x592   : > { %v2650_v25 = vpop.xlane.xlu1 %2649  ;;  %v2659_v30 = vpop.xlane.xlu0 %2658  ;;  %v2786_v14 = vadd.f32 %v6178_v16, %v6176_v12 }
 0x593   : > { %4723 = vpow2.f32 %v2746_v33  ;;  %v2686_v15 = vsub.f32 %v6072_v50, %v2650_v25  ;;  %v2687_v36 = vsub.f32 %v6067_v58, %v2650_v25  ;;  %v2692_v22 = vsub.f32 %v6075_v3, %v2659_v30 }
 0x594   : > { %v6185_v26 = vpop.eup %4719  ;;  %4725 = vpow2.f32 %v2748_v19  ;;  %v2693_v53 = vsub.f32 %v6077_v18, %v2659_v30  ;;  %2787 = vadd.xlane.f32.xlu1 %v2786_v14 }
 0x595   : > { %v6188_v32 = vpop.eup %4721  ;;  %v2738_v40 = vmul.f32 1.442695, %v2686_v15  ;;  %v2740_v31 = vmul.f32 1.442695, %v2687_v36  ;;  %v2750_v34 = vmul.f32 1.442695, %v2692_v22 }
 0x596   : > { %v2752_v42 = vmul.f32 1.442695, %v2693_v53  ;;  %v2653_v43 = vpop.xlane.xlu0 %2652  ;;  %v2662_v50 = vpop.xlane.xlu1 %2661  ;;  %v2789_v58 = vadd.f32 %v6188_v32, %v6185_v26 }
 0x597   : > { %4727 = vpow2.f32 %v2738_v40  ;;  %v2688_v3 = vsub.f32 %v6088_v55, %v2653_v43  ;;  %v2689_v41 = vsub.f32 %v6085_v0, %v2653_v43  ;;  %v2694_v18 = vsub.f32 %v6090_v59, %v2662_v50 }
 0x598   : > { %4729 = vpow2.f32 %v2740_v31  ;;  %v2695_v45 = vsub.f32 %v6092_v62, %v2662_v50  ;;  %2790 = vadd.xlane.f32.xlu0 %v2789_v58 }
 0x599   : > { %4731 = vpow2.f32 %v2750_v34  ;;  %v2742_v44 = vmul.f32 1.442695, %v2688_v3  ;;  %v2744_v61 = vmul.f32 1.442695, %v2689_v41  ;;  %v2754_v47 = vmul.f32 1.442695, %v2694_v18 }
 0x59a   : > { %4733 = vpow2.f32 %v2752_v42  ;;  %v2756_v39 = vmul.f32 1.442695, %v2695_v45  ;;  %v2665_v8 = vpop.xlane.xlu0 %2664 }
 0x59b   : > { %4735 = vpow2.f32 %v2742_v44  ;;  %v2696_v20 = vsub.f32 %v6100_v51, %v2665_v8  ;;  %v2697_v55 = vsub.f32 %v6102_v9, %v2665_v8 }
 0x59c   : > { %4737 = vpow2.f32 %v2744_v61 }
 0x59d   : > { %4739 = vpow2.f32 %v2754_v47  ;;  %v2758_v0 = vmul.f32 1.442695, %v2696_v20  ;;  %v2760_v59 = vmul.f32 1.442695, %v2697_v55 }
 0x59e   : > { %4741 = vpow2.f32 %v2756_v39 }
 0x59f   : > { %4743 = vpow2.f32 %v2758_v0 }
 0x5a0   : > { %v6198_v62 = vpop.eup %4723  ;;  %4745 = vpow2.f32 %v2760_v59 }
 0x5a1   : > { %v6200_v60 = vpop.eup %4725 }
 0x5a2   : > { %v2798_v23 = vadd.f32 %v6200_v60, %v6198_v62 }
 0x5a4   : > { %v6204_v46 = vpop.eup %4727  ;;  %2799 = vadd.xlane.f32.xlu1 %v2798_v23 }
 0x5a5   : > { %v6206_v51 = vpop.eup %4729 }
 0x5a6   : > { %v6208_v9 = vpop.eup %4731  ;;  %v2792_v63 = vadd.f32 %v6206_v51, %v6204_v46 }
 0x5a7   : > { %v6212_v1 = vpop.eup %4733 }
 0x5a8   : > { %v6214_v21 = vpop.eup %4735  ;;  %2793 = vadd.xlane.f32.xlu1 %v2792_v63  ;;  %v2801_v4 = vadd.f32 %v6212_v1, %v6208_v9 }
 0x5a9   : > { %v6218_v11 = vpop.eup %4737 }
 0x5aa   : > { %v6220_v35 = vpop.eup %4739  ;;  %2802 = vadd.xlane.f32.xlu0 %v2801_v4  ;;  %v2795_v29 = vadd.f32 %v6218_v11, %v6214_v21 }
 0x5ab   : > { %v6224_v38 = vpop.eup %4741 }
 0x5ac   : > { %v6226_v33 = vpop.eup %4743  ;;  %v2804_v19 = vadd.f32 %v6224_v38, %v6220_v35 }
 0x5ad   : > { %v6230_v25 = vpop.eup %4745 }
 0x5ae   : > { %2805 = vadd.xlane.f32.xlu1 %v2804_v19  ;;  %2796 = vadd.xlane.f32.xlu0 %v2795_v29  ;;  %v2807_v30 = vadd.f32 %v6230_v25, %v6226_v33 }
 0x5b2   : > { %2808 = vadd.xlane.f32.xlu0 %v2807_v30 }
 0x5fd   : > { %v2764_v14 = vpop.xlane.xlu1 %2763 }
 0x5fe   : > { %4747 = vrcp.f32 %v2764_v14 }
 0x601   : > { %v2767_v17 = vpop.xlane.xlu0 %2766 }
 0x602   : > { %4749 = vrcp.f32 %v2767_v17 }
 0x605   : > { %v2770_v15 = vpop.xlane.xlu1 %2769 }
 0x606   : > { %4751 = vrcp.f32 %v2770_v15 }
 0x609   : > { %v2773_v36 = vpop.xlane.xlu0 %2772 }
 0x60a   : > { %4753 = vrcp.f32 %v2773_v36 }
 0x60b   : > { %v4748_v22 = vpop.eup %4747 }
 0x60c   : > { %v2827_v31 = vmul.f32 %v4748_v22, %v6118_v57  ;;  %v2826_v42 = vmul.f32 %v4748_v22, %v6116_v2 }
 0x60d   : > { %v2776_v53 = vpop.xlane.xlu1 %2775 }
 0x60e   : > { %4755 = vrcp.f32 %v2776_v53 }
 0x60f   : > { %v4750_v40 = vpop.eup %4749 }
 0x610   : > { %v2829_v34 = vmul.f32 %v4750_v40, %v6126_v28  ;;  %v2828_v43 = vmul.f32 %v4750_v40, %v6124_v13 }
 0x611   : > { %v2779_v50 = vpop.xlane.xlu0 %2778 }
 0x612   : > { %4757 = vrcp.f32 %v2779_v50  ;;  %v2859_v58 = vpack.c.bf16 %v2829_v34, %v2827_v31  ;;  %v2858_v3 = vpack.c.bf16 %v2828_v43, %v2826_v42 }
 0x613   : > { %v4752_v41 = vpop.eup %4751 }
 0x614   : > { %3034 = vmatprep.mubr.bf16.mxu0 %v2859_v58  ;;  %v2831_v44 = vmul.f32 %v4752_v41, %v6134_v24  ;;  %v2830_v28 = vmul.f32 %v4752_v41, %v6132_v27 }
 0x615   : > { %v2782_v18 = vpop.xlane.xlu1 %2781  ;;  %3035 = vmatmul.mubr.bf16.vlgmr.msra.gmra.mxu0 %v2858_v3 }
 0x616   : > { %4759 = vrcp.f32 %v2782_v18 }
 0x617   : > { %v4754_v45 = vpop.eup %4753 }
 0x618   : > { %v2833_v57 = vmul.f32 %v4754_v45, %v6142_v37  ;;  %v2832_v2 = vmul.f32 %v4754_v45, %v6140_v49 }
 0x619   : > { %v2785_v61 = vpop.xlane.xlu0 %2784 }
 0x61a   : > { %4761 = vrcp.f32 %v2785_v61  ;;  %v2861_v13 = vpack.c.bf16 %v2833_v57, %v2831_v44  ;;  %v2860_v47 = vpack.c.bf16 %v2832_v2, %v2830_v28 }
 0x61b   : > { %v4756_v39 = vpop.eup %4755 }
 0x61c   : > { %3042 = vmatprep.mubr.bf16.mxu0 %v2861_v13  ;;  %v2835_v55 = vmul.f32 %v4756_v39, %v6150_v48  ;;  %v2834_v37 = vmul.f32 %v4756_v39, %v6148_v54 }
 0x61d   : > { %v2788_v8 = vpop.xlane.xlu1 %2787  ;;  %3043 = vmatmul.mubr.bf16.gmra.mxu0 %v2860_v47 }
 0x61e   : > { %4763 = vrcp.f32 %v2788_v8 }
 0x61f   : > { %v4758_v20 = vpop.eup %4757 }
 0x620   : > { %v2837_v24 = vmul.f32 %v4758_v20, %v6158_v52  ;;  %v2836_v27 = vmul.f32 %v4758_v20, %v6156_v56 }
 0x621   : > { %v2791_v0 = vpop.xlane.xlu0 %2790 }
 0x622   : > { %4765 = vrcp.f32 %v2791_v0  ;;  %v2863_v49 = vpack.c.bf16 %v2837_v24, %v2835_v55  ;;  %v2862_v59 = vpack.c.bf16 %v2836_v27, %v2834_v37 }
 0x623   : > { %v4760_v23 = vpop.eup %4759 }
 0x624   : > { %3050 = vmatprep.mubr.bf16.mxu0 %v2863_v49  ;;  %v2839_v4 = vmul.f32 %v4760_v23, %v6164_v5  ;;  %v2838_v48 = vmul.f32 %v4760_v23, %v6162_v7 }
 0x625   : > { %3051 = vmatmul.mubr.bf16.gmra.mxu0 %v2862_v59 }
 0x627   : > { %v4762_v63 = vpop.eup %4761 }
 0x628   : > { %v2841_v29 = vmul.f32 %v4762_v63, %v6170_v10  ;;  %v2840_v52 = vmul.f32 %v4762_v63, %v6168_v6 }
 0x62a   : > { %v2865_v19 = vpack.c.bf16 %v2841_v29, %v2839_v4  ;;  %v2864_v54 = vpack.c.bf16 %v2840_v52, %v2838_v48 }
 0x62b   : > { %v4764_v56 = vpop.eup %4763 }
 0x62c   : > { %3058 = vmatprep.mubr.bf16.mxu0 %v2865_v19  ;;  %v2843_v17 = vmul.f32 %v4764_v56, %v6178_v16  ;;  %v2842_v36 = vmul.f32 %v4764_v56, %v6176_v12 }
 0x62d   : > { %v2800_v30 = vpop.xlane.xlu1 %2799  ;;  %3059 = vmatmul.mubr.bf16.gmra.mxu0 %v2864_v54 }
 0x62e   : > { %4767 = vrcp.f32 %v2800_v30 }
 0x62f   : > { %v4766_v14 = vpop.eup %4765 }
 0x630   : > { %v2845_v15 = vmul.f32 %v4766_v14, %v6188_v32  ;;  %v2844_v5 = vmul.f32 %v4766_v14, %v6185_v26 }
 0x631   : > { %v2794_v10 = vpop.xlane.xlu1 %2793 }
 0x632   : > { %v2867_v7 = vpack.c.bf16 %v2845_v15, %v2843_v17  ;;  %v2866_v22 = vpack.c.bf16 %v2844_v5, %v2842_v36 }
 0x633   : > { %v2803_v6 = vpop.xlane.xlu0 %2802 }
 0x634   : > { %4769 = vrcp.f32 %v2803_v6  ;;  %3066 = vmatprep.mubr.bf16.mxu0 %v2867_v7 }
 0x635   : > { %3067 = vmatmul.mubr.bf16.gmra.mxu0 %v2866_v22  ;;  %4771 = vrcp.f32 %v2794_v10 }
 0x637   : > { %v2806_v53 = vpop.xlane.xlu1 %2805  ;;  %v2797_v40 = vpop.xlane.xlu0 %2796 }
 0x638   : > { %4773 = vrcp.f32 %v2797_v40 }
 0x639   : > { %4775 = vrcp.f32 %v2806_v53 }
 0x63b   : > { %v2809_v16 = vpop.xlane.xlu0 %2808  ;;  %v4768_v32 = vpop.eup %4767 }
 0x63c   : > { %4777 = vrcp.f32 %v2809_v16  ;;  %v2851_v12 = vmul.f32 %v4768_v32, %v6200_v60  ;;  %v2850_v34 = vmul.f32 %v4768_v32, %v6198_v62 }
 0x641   : > { %v4770_v31 = vpop.eup %4769 }
 0x642   : > { %v2853_v26 = vmul.f32 %v4770_v31, %v6212_v1  ;;  %v2852_v42 = vmul.f32 %v4770_v31, %v6208_v9  ;;  %v4772_v43 = vpop.eup %4771 }
 0x643   : > { %v2847_v18 = vmul.f32 %v4772_v43, %v6206_v51  ;;  %v2846_v44 = vmul.f32 %v4772_v43, %v6204_v46 }
 0x644   : > { %v2871_v50 = vpack.c.bf16 %v2853_v26, %v2851_v12  ;;  %v2870_v58 = vpack.c.bf16 %v2852_v42, %v2850_v34 }
 0x645   : > { %v4774_v3 = vpop.eup %4773 }
 0x646   : > { %3082 = vmatprep.mubr.bf16.mxu1 %v2871_v50  ;;  %v4776_v41 = vpop.eup %4775  ;;  %v2849_v45 = vmul.f32 %v4774_v3, %v6218_v11  ;;  %v2848_v60 = vmul.f32 %v4774_v3, %v6214_v21 }
 0x647   : > { %3083 = vmatmul.mubr.bf16.vlgmr.msra.gmra.mxu1 %v2870_v58  ;;  %v2855_v9 = vmul.f32 %v4776_v41, %v6224_v38  ;;  %v2854_v2 = vmul.f32 %v4776_v41, %v6220_v35 }
 0x648   : > { %v2869_v57 = vpack.c.bf16 %v2849_v45, %v2847_v18  ;;  %v2868_v62 = vpack.c.bf16 %v2848_v60, %v2846_v44 }
 0x649   : > { %v4778_v1 = vpop.eup %4777 }
 0x64a   : > { %v2857_v28 = vmul.f32 %v4778_v1, %v6230_v25  ;;  %v2856_v61 = vmul.f32 %v4778_v1, %v6226_v33  ;;  %3074 = vmatprep.mubr.bf16.mxu0 %v2869_v57 }
 0x64b   : > { %3075 = vmatmul.mubr.bf16.gmra.mxu0 %v2868_v62 }
 0x64c   : > { %v2873_v51 = vpack.c.bf16 %v2857_v28, %v2855_v9  ;;  %v2872_v11 = vpack.c.bf16 %v2856_v61, %v2854_v2 }
 0x64e   : > { %3090 = vmatprep.mubr.bf16.mxu1 %v2873_v51 }
 0x64f   : > { %3091 = vmatmul.mubr.bf16.gmra.mxu1 %v2872_v11 }
 0x6d5   : > { %v4280_v46 = vpop.f32.mrf.mxu0 }
 0x6d7   : > { %v4281_v21 = vpop.f32.mrf.mxu0 }
 0x6d8   : > { %v4282_v39 = vadd.f32 %v4281_v21, %v4280_v46 }
 0x6d9   : > { %v4283_v13 = vpop.f32.mrf.mxu0 }
 0x6db   : > { %v4284_v47 = vpop.f32.mrf.mxu0 }
 0x6dc   : > { %v4285_v38 = vadd.f32 %v4284_v47, %v4283_v13 }
 0x6dd   : > { %v4286_v8 = vpop.f32.mrf.mxu0 }
 0x6de   : > { %v3870_v25 = vpack.c.bf16 %v4285_v38, %v4282_v39 }
 0x6df   : > { %v4287_v20 = vpop.f32.mrf.mxu0 }
 0x6e0   : > { %3871 = vst [vmem:[%s5517_s13] sm:$0xff] %v3870_v25   ;;  %v4288_v55 = vadd.f32 %v4287_v20, %v4286_v8 }
 0x6e1   : > { %v4289_v35 = vpop.f32.mrf.mxu0 }
 0x6e3   : > { %v4290_v33 = vpop.f32.mrf.mxu0 }
 0x6e4   : > { %v4291_v24 = vadd.f32 %v4290_v33, %v4289_v35 }
 0x6e5   : > { %v4292_v37 = vpop.f32.mrf.mxu0 }
 0x6e6   : > { %v3875_v27 = vpack.c.bf16 %v4291_v24, %v4288_v55 }
 0x6e7   : > { %v4293_v0 = vpop.f32.mrf.mxu0 }
 0x6e8   : > { %3937 = vst [vmem:[%s5517_s13 + $0x8] sm:$0xff] %v3875_v27   ;;  %v4294_v23 = vadd.f32 %v4293_v0, %v4292_v37 }
 0x6e9   : > { %v4295_v49 = vpop.f32.mrf.mxu0 }
 0x6eb   : > { %v4296_v59 = vpop.f32.mrf.mxu0 }
 0x6ec   : > { %v4297_v63 = vadd.f32 %v4296_v59, %v4295_v49 }
 0x6ed   : > { %v4298_v4 = vpop.f32.mrf.mxu0 }
 0x6ee   : > { %v3880_v29 = vpack.c.bf16 %v4297_v63, %v4294_v23 }
 0x6ef   : > { %v4299_v48 = vpop.f32.mrf.mxu0 }
 0x6f0   : > { %3938 = vst [vmem:[%s5517_s13 + $0x10] sm:$0xff] %v3880_v29   ;;  %v4300_v54 = vadd.f32 %v4299_v48, %v4298_v4 }
 0x6f1   : > { %v4301_v52 = vpop.f32.mrf.mxu0 }
 0x6f3   : > { %v4302_v19 = vpop.f32.mrf.mxu0 }
 0x6f4   : > { %v4303_v56 = vadd.f32 %v4302_v19, %v4301_v52 }
 0x6f5   : > { %v4304_v30 = vpop.f32.mrf.mxu0 }
 0x6f6   : > { %v3885_v14 = vpack.c.bf16 %v4303_v56, %v4300_v54 }
 0x6f7   : > { %v4305_v17 = vpop.f32.mrf.mxu0 }
 0x6f8   : > { %3939 = vst [vmem:[%s5517_s13 + $0x18] sm:$0xff] %v3885_v14   ;;  %v4306_v5 = vadd.f32 %v4305_v17, %v4304_v30 }
 0x6f9   : > { %v4307_v15 = vpop.f32.mrf.mxu0 }
 0x6fb   : > { %v4308_v36 = vpop.f32.mrf.mxu0 }
 0x6fc   : > { %v4309_v10 = vadd.f32 %v4308_v36, %v4307_v15 }
 0x6fe   : > { %v3890_v7 = vpack.c.bf16 %v4309_v10, %v4306_v5 }
 0x700   : > { %3940 = vst [vmem:[%s5517_s13 + $0x20] sm:$0xff] %v3890_v7  }
 0x707   : > { %v4316_v22 = vpop.f32.mrf.mxu1 }
 0x709   : > { %v4317_v6 = vpop.f32.mrf.mxu1 }
 0x70a   : > { %v4318_v32 = vadd.f32 %v4317_v6, %v4316_v22 }
 0x70b   : > { %v4319_v53 = vpop.f32.mrf.mxu1  ;;  %v4310_v40 = vpop.f32.mrf.mxu0 }
 0x70d   : > { %v4320_v16 = vpop.f32.mrf.mxu1  ;;  %v4311_v31 = vpop.f32.mrf.mxu0 }
 0x70e   : > { %v4321_v12 = vadd.f32 %v4320_v16, %v4319_v53  ;;  %v4312_v58 = vadd.f32 %v4311_v31, %v4310_v40 }
 0x70f   : > { %v4322_v26 = vpop.f32.mrf.mxu1  ;;  %v4313_v42 = vpop.f32.mrf.mxu0 }
 0x710   : > { %v3900_v34 = vpack.c.bf16 %v4321_v12, %v4318_v32 }
 0x711   : > { %v4323_v43 = vpop.f32.mrf.mxu1  ;;  %v4314_v50 = vpop.f32.mrf.mxu0 }
 0x712   : > { %3942 = vst [vmem:[%s5517_s13 + $0x30] sm:$0xff] %v3900_v34   ;;  %v4315_v3 = vadd.f32 %v4314_v50, %v4313_v42  ;;  %v4324_v44 = vadd.f32 %v4323_v43, %v4322_v26 }
 0x713   : > { %v4325_v41 = vpop.f32.mrf.mxu1 }
 0x714   : > { %v3895_v18 = vpack.c.bf16 %v4315_v3, %v4312_v58 }
 0x715   : > { %v4326_v45 = vpop.f32.mrf.mxu1 }
 0x716   : > { %v4327_v60 = vadd.f32 %v4326_v45, %v4325_v41  ;;  %3941 = vst [vmem:[%s5517_s13 + $0x28] sm:$0xff] %v3895_v18  }
 0x718   : > { %v3905_v1 = vpack.c.bf16 %v4327_v60, %v4324_v44 }
 0x71a   : > { %3943 = vst [vmem:[%s5517_s13 + $0x38] sm:$0xff] %v3905_v1  }
 0x71b   : > { %4964 = shalt.err (!%p4961_p10)
}
 0x71c   : > { %s4965_s0 = scalar_lea.hbm %s6280_s21, 1024  ;;  %s4969_s9 = scalar_lea.hbm %s6482_s22, 8192 }
 0x71d   : > { %p4966_p9 = scmp.ne.s32.totalorder %s6280_s21, %s4965_s0  ;;  %p4970_p7 = scmp.lt.s32.totalorder %s6280_s21, %s6482_s22 }
 0x71e   : > { %p4971_p12 = scmp.lt.s32.totalorder %s4969_s9, %s4965_s0 }
 0x71f   : > { %p4967_p3 = pnand %p4966_p9, %p6483_p6 }
 0x720   : > { %p4972_p5 = por %p4971_p12, %p4970_p7 }
 0x721   : > { %p4968_p13 = pneg %p4967_p3 }
 0x723   : > { %p4973_p0 = pnand %p4972_p5, %p4968_p13 }
 0x725   : > { %4976 = shalt.err (!%p4973_p0)
}
 0x726   : > { %s5145_s25 = smov 128   ;;  %s5146_s19 = smov 4  }
 0x727   : > { %4360 = dma.vmem_to_hbm [thread:$0]  (%p6483_p6), %s6282_s27, 1024, %s6280_s21, %s6287_s12, %s5143_s30, %s5145_s25, %s5146_s19  }
 0x728 PF: > { %s6484_s7 = sld [smem:[#allocation25_spill]]  ;;  %p4391_p11 = scmp.ge.s32.totalorder %s5129_s18, 2 }
 0x729   : > { %s6485_s2 = sld [smem:[#allocation38_spill]] }
 0x72e   : > { %s3212_s24 = sand.u32 1, %s6484_s7  }
 0x72f   : > { %p6486_p8 = scmp.ne.s32.totalorder %s6485_s2, 0  ;;  %s3213_s10 = scalar_lea.sflag [#allocation8], %s3212_s24 }
 0x731   : > { %p4383_p1 = pnand %p4391_p11, %p6486_p8 }
 0x733   : > { %p4384_p4 = pneg %p4383_p1 }
 0x735   : > { %5064 = dma.done.wait (%p4384_p4), %s3213_s10, 1024  }
 0x736   : > { %5066 = vsyncadd (%p4384_p4), %s3213_s10, 4294966272  ;;  %s34_s18 = sadd.s32 1, %s5129_s18   ;;  %s6488_s27 = sld [smem:[#allocation26_spill]] }
 0x737   : > { %p6316_p2 = scmp.ge.s32.totalorder %s34_s18, 10   ;;  %s6489_s30 = sld [smem:[#allocation27_spill]] }
 0x738   : > { %s6490_s9 = sld [smem:[#allocation28_spill]]  ;;  %s6496_s28 = smov %s5077_s29 }
 0x739   : > { %s6491_s12 = sld [smem:[#allocation32_spill]]  ;;  %s6497_s29 = smov %s5445_s23 }
 0x73a   : > { %s6492_s13 = sld [smem:[#allocation33_spill]]  ;;  %s6498_s0 = smov %s5089_s8 }
 0x73b   : > { %s6493_s5 = sld [smem:[#allocation41_spill]]  ;;  %s6499_s8 = smov %s5413_s26 }
 0x73c   : > { %s6494_s16 = sld [smem:[#allocation42_spill]]  ;;  %s6500_s10 = smov %s5101_s11 }
 0x73d   : > { %s6501_s11 = smov %s5426_s6  ;;  %s6502_s14 = smov %s5125_s17 }
 0x73e   : > { %s6504_s17 = smov %s6514_s20  ;;  %33 = sbr.rel (!%p6316_p2) target bundleno = 26 (0x1a), region = 141 }
 0x741   : > { %s6503_s15 = smov %s6493_s5 }
 0x743   :  { %3218 = vsyncpa [#allocation7], 1 }
 0x744   :  { %3220 = vsyncpa [#allocation7 + $0x1], 1 }
 0x745   :  { %3221 = vsyncpa [#allocation10], 1 }
 0x746   :  { %3223 = vsyncpa [#allocation10 + $0x1], 1 }
 0x747   :  { %3224 = vsyncpa [#allocation13], 1 }
 0x748   :  { %3226 = vsyncpa [#allocation13 + $0x1], 1 }
 0x749   :  { %3227 = vsyncpa [#allocation16], 1 }
 0x74a   :  { %3228 = vsyncpa [#allocation8], 1 }
 0x74b   :  { %3230 = vsyncpa [#allocation8 + $0x1], 1 }

</bundles_post_ra>
